<compile_context>
chip_gen: v7x
topology: tpu7x:2x2x1
jax: 0.10.0
libtpu: 0.0.40
codegen_flags: <defaults>
</compile_context>

<pallas_src>
import functools
import math

import jax
import jax.numpy as jnp
from jax import lax
from jax.experimental import pallas as pl
from jax.experimental.pallas import tpu as pltpu


def _choose_block_b(batch, seq, *, target_rows=256, max_rows=2048):
    """Largest batch-pack factor that keeps >=2 grid steps and <= max_rows rows."""
    cands = []
    for bt in range(1, batch + 1):
        if batch % bt:
            continue
        if batch >= 2 and batch // bt < 2:
            continue  # keep >=2 grid steps so both v7x TensorCores get work
        if bt * seq > max_rows:
            continue
        cands.append(bt)
    if not cands:
        return 1
    hit = [bt for bt in cands if bt * seq >= target_rows]
    return min(hit) if hit else max(cands)


def _mha_kernel(q_ref, k_ref, v_ref,
                wq_ref, bq_ref,
                wk_ref, bk_ref,
                wv_ref, bv_ref,
                wo_ref, bo_ref,
                out_ref, ctx_ref,
                *, num_heads, block_b, seq_len):
    """One grid step = `block_b` batch elements, presented as (block_b*S, D)."""
    rows, d_model = q_ref.shape            # rows = block_b * seq_len
    d_k = d_model // num_heads
    cdt = wq_ref.dtype                      # bf16 MXU operand dtype

    # bf16 operands, f32 accumulation. Full-width projections: M = rows.
    xq = q_ref[...].astype(cdt)
    xk = k_ref[...].astype(cdt)
    xv = v_ref[...].astype(cdt)
    qp = jnp.dot(xq, wq_ref[...], preferred_element_type=jnp.float32) + bq_ref[...]
    kp = jnp.dot(xk, wk_ref[...], preferred_element_type=jnp.float32) + bk_ref[...]
    vp = jnp.dot(xv, wv_ref[...], preferred_element_type=jnp.float32) + bv_ref[...]

    # Split back into per-batch-element slabs for the attention core.
    qp3 = qp.reshape(block_b, seq_len, d_model).astype(cdt)   # already scaled
    kp3 = kp.reshape(block_b, seq_len, d_model).astype(cdt)
    vp3 = vp.reshape(block_b, seq_len, d_model).astype(cdt)

    # Per-head core, statically unrolled over heads; each dot_general is
    # batched over the block_b packed batch elements so the small K=d_k
    # matmuls pipeline back-to-back on the MXU.  (d_k=32 lane slices are
    # acknowledged sub-tile; heads stay in the lane dim to avoid a relayout.)
    for h in range(num_heads):
        lo = h * d_k
        qh = qp3[:, :, lo:lo + d_k]          # (block_b, S, d_k), scaled
        kh = kp3[:, :, lo:lo + d_k]
        vh = vp3[:, :, lo:lo + d_k]

        # scores = qh @ kh^T  (batched over dim 0, no explicit transpose)
        s = lax.dot_general(qh, kh, (((2,), (2,)), ((0,), (0,))),
                            preferred_element_type=jnp.float32)   # (Bt, S, S)

        # Numerically stable softmax in f32 (VPU/EUP path kept f32).
        s = s - jnp.max(s, axis=-1, keepdims=True)
        p = jnp.exp(s)
        p = p * pl.reciprocal(jnp.sum(p, axis=-1, keepdims=True), approx=True)

        ctx_h = lax.dot_general(p.astype(cdt), vh, (((2,), (1,)), ((0,), (0,))),
                                preferred_element_type=jnp.float32)  # (Bt, S, d_k)

        # Accumulate into the VMEM context scratch instead of a vreg concat.
        ctx_ref[:, :, lo:lo + d_k] = ctx_h.astype(cdt)

    # Single full-width output projection, M = rows.
    ctx = ctx_ref[...].reshape(rows, d_model)
    out = jnp.dot(ctx, wo_ref[...], preferred_element_type=jnp.float32) + bo_ref[...]
    out_ref[...] = out.astype(out_ref.dtype)


def multi_head_attention(q, k, v, params, *, num_heads, block_b=None):
    """q, k, v: (B, S, D).  params: PyTorch-style nn.Linear weights/biases."""
    B, S, D = q.shape
    assert D % num_heads == 0, "d_model must be divisible by h"
    d_k = D // num_heads
    scale = 1.0 / math.sqrt(d_k)

    if block_b is None:
        block_b = _choose_block_b(B, S)
    assert B % block_b == 0
    rows = block_b * S
    grid = B // block_b
    # (8,128) tiling rule for the row-blocked activations.
    assert grid == 1 or rows % 8 == 0, "block rows must be a multiple of 8"

    cdt = jnp.bfloat16  # MXU operand dtype for weights / activations

    # nn.Linear stores W as (out, in) and computes x @ W^T + b.  Pre-transpose
    # once, fold the 1/sqrt(d_k) scale into the query projection, and cast the
    # weights to bf16 (biases stay f32 — added after the f32 accumulation).
    wq_t = (params["wq"].T * scale).astype(cdt)   # (D, D)
    wk_t = params["wk"].T.astype(cdt)
    wv_t = params["wv"].T.astype(cdt)
    wo_t = params["wo"].T.astype(cdt)
    bq = (params["bq"] * scale).reshape(1, D).astype(jnp.float32)
    bk = params["bk"].reshape(1, D).astype(jnp.float32)
    bv = params["bv"].reshape(1, D).astype(jnp.float32)
    bo = params["bo"].reshape(1, D).astype(jnp.float32)

    # Present q/k/v as (B*S, D) so the kernel's projections run with M = rows.
    q2 = q.reshape(B * S, D)
    k2 = k.reshape(B * S, D)
    v2 = v.reshape(B * S, D)

    def row_map(i):
        return (i, 0)

    def resident_map(i):
        return (0, 0)

    itemsize = jnp.dtype(q.dtype).itemsize
    flops = (
        2 * 4 * B * S * D * D      # q/k/v projections + output projection
        + 4 * B * S * S * D        # scores + context across all heads
    )
    transcendentals = B * num_heads * S * S
    bytes_accessed = (
        4 * B * S * D * itemsize                 # q, k, v inputs + output
        + 4 * D * D * 2 + 4 * D * 4              # bf16 weights + f32 biases
    )

    kernel = functools.partial(_mha_kernel, num_heads=num_heads,
                               block_b=block_b, seq_len=S)

    out = pl.pallas_call(
        kernel,
        out_shape=jax.ShapeDtypeStruct((B * S, D), q.dtype),
        grid_spec=pltpu.PrefetchScalarGridSpec(
            num_scalar_prefetch=0,
            grid=(grid,),
            in_specs=[
                pl.BlockSpec((rows, D), row_map),        # q (packed rows)
                pl.BlockSpec((rows, D), row_map),        # k
                pl.BlockSpec((rows, D), row_map),        # v
                pl.BlockSpec((D, D), resident_map),      # Wq^T (scaled, bf16)
                pl.BlockSpec((1, D), resident_map),      # bq (scaled, f32)
                pl.BlockSpec((D, D), resident_map),      # Wk^T
                pl.BlockSpec((1, D), resident_map),      # bk
                pl.BlockSpec((D, D), resident_map),      # Wv^T
                pl.BlockSpec((1, D), resident_map),      # bv
                pl.BlockSpec((D, D), resident_map),      # Wo^T
                pl.BlockSpec((1, D), resident_map),      # bo
            ],
            out_specs=pl.BlockSpec((rows, D), row_map),
            scratch_shapes=[
                pltpu.VMEM((block_b, S, D), cdt),        # per-step context
            ],
        ),
        compiler_params=pltpu.CompilerParams(
            dimension_semantics=("parallel",),
            # 48 MiB: headroom under v7x's 64 MiB physical VMEM, above the
            # default scoped limit on v5e/v6e.
            vmem_limit_bytes=48 * 1024 * 1024,
        ),
        cost_estimate=pl.CostEstimate(
            flops=flops,
            transcendentals=transcendentals,
            bytes_accessed=bytes_accessed,
        ),
    )(q2, k2, v2, wq_t, bq, wk_t, bk, wv_t, bv, wo_t, bo)
    return out.reshape(B, S, D)


def _reference_mha(q, k, v, params, *, num_heads):
    """Pure-JAX f32 reference matching the PyTorch forward (mask=None, eval dropout)."""
    B, S, D = q.shape
    d_k = D // num_heads

    def linear(x, w, b):
        return x @ w.T + b

    query = linear(q, params["wq"], params["bq"])
    key = linear(k, params["wk"], params["bk"])
    value = linear(v, params["wv"], params["bv"])

    def split_heads(x):
        return x.reshape(B, S, num_heads, d_k).transpose(0, 2, 1, 3)

    qh, kh, vh = split_heads(query), split_heads(key), split_heads(value)
    scores = jnp.einsum("bhqd,bhkd->bhqk", qh, kh) / math.sqrt(d_k)
    attn = jax.nn.softmax(scores, axis=-1)
    ctx = jnp.einsum("bhqk,bhkd->bhqd", attn, vh)
    ctx = ctx.transpose(0, 2, 1, 3).reshape(B, S, D)
    return linear(ctx, params["wo"], params["bo"])


if __name__ == "__main__":
    # Small shapes consistent with the module (d_model divisible by h); batch
    # chosen so batch-packing can reach 128 projection rows with a 2-step grid.
    B, S, D, H = 16, 16, 128, 4

    key = jax.random.PRNGKey(0)
    keys = jax.random.split(key, 12)

    def init_linear(kw, kb, fan_in, fan_out):
        bound = 1.0 / math.sqrt(fan_in)
        w = jax.random.uniform(kw, (fan_out, fan_in), jnp.float32, -bound, bound)
        b = jax.random.uniform(kb, (fan_out,), jnp.float32, -bound, bound)
        return w, b

    wq, bq = init_linear(keys[0], keys[1], D, D)
    wk, bk = init_linear(keys[2], keys[3], D, D)
    wv, bv = init_linear(keys[4], keys[5], D, D)
    wo, bo = init_linear(keys[6], keys[7], D, D)
    params = dict(wq=wq, bq=bq, wk=wk, bk=bk, wv=wv, bv=bv, wo=wo, bo=bo)

    q = jax.random.normal(keys[8], (B, S, D), jnp.float32)
    k = jax.random.normal(keys[9], (B, S, D), jnp.float32)
    v = jax.random.normal(keys[10], (B, S, D), jnp.float32)

    out = multi_head_attention(q, k, v, params, num_heads=H)
    out = jax.block_until_ready(out)

    ref = _reference_mha(q, k, v, params, num_heads=H)
    assert out.shape == (B, S, D)
    # Tolerance accounts for bf16 MXU operands (f32 accumulation) and the EUP
    # approximate reciprocal in the softmax denominator.
    assert jnp.allclose(out, ref, atol=2e-2, rtol=2e-2), "mismatch vs reference"

    print("KERNEL_OK")
</pallas_src>

<mosaic_0001>
module attributes {stable_mosaic.version = 11 : i64} {
  func.func @_mha_kernel(%arg0: i32, %arg1: memref<128x128xf32, #tpu.memory_space<vmem>>, %arg2: memref<128x128xf32, #tpu.memory_space<vmem>>, %arg3: memref<128x128xf32, #tpu.memory_space<vmem>>, %arg4: memref<128x128xbf16, #tpu.memory_space<vmem>>, %arg5: memref<1x128xf32, #tpu.memory_space<vmem>>, %arg6: memref<128x128xbf16, #tpu.memory_space<vmem>>, %arg7: memref<1x128xf32, #tpu.memory_space<vmem>>, %arg8: memref<128x128xbf16, #tpu.memory_space<vmem>>, %arg9: memref<1x128xf32, #tpu.memory_space<vmem>>, %arg10: memref<128x128xbf16, #tpu.memory_space<vmem>>, %arg11: memref<1x128xf32, #tpu.memory_space<vmem>>, %arg12: memref<128x128xf32, #tpu.memory_space<vmem>>, %arg13: memref<8x16x128xbf16, #tpu.memory_space<vmem>>) attributes {dimension_semantics = [#tpu.dimension_semantics<parallel>], iteration_bounds = array<i64: 2>, scalar_prefetch = 0 : i64, scratch_operands = 1 : i64, tpu.core_type = #tpu.core_type<tc>, window_params = [{transform_indices = @transform_0, window_bounds = array<i64: 128, 128>}, {transform_indices = @transform_1, window_bounds = array<i64: 128, 128>}, {transform_indices = @transform_2, window_bounds = array<i64: 128, 128>}, {pipeline_mode = #tpu.pipeline_mode<synchronous>, transform_indices = @transform_3, window_bounds = array<i64: 128, 128>}, {pipeline_mode = #tpu.pipeline_mode<synchronous>, transform_indices = @transform_4, window_bounds = array<i64: 1, 128>}, {pipeline_mode = #tpu.pipeline_mode<synchronous>, transform_indices = @transform_5, window_bounds = array<i64: 128, 128>}, {pipeline_mode = #tpu.pipeline_mode<synchronous>, transform_indices = @transform_6, window_bounds = array<i64: 1, 128>}, {pipeline_mode = #tpu.pipeline_mode<synchronous>, transform_indices = @transform_7, window_bounds = array<i64: 128, 128>}, {pipeline_mode = #tpu.pipeline_mode<synchronous>, transform_indices = @transform_8, window_bounds = array<i64: 1, 128>}, {pipeline_mode = #tpu.pipeline_mode<synchronous>, transform_indices = @transform_9, window_bounds = array<i64: 128, 128>}, {pipeline_mode = #tpu.pipeline_mode<synchronous>, transform_indices = @transform_10, window_bounds = array<i64: 1, 128>}, {transform_indices = @transform_11, window_bounds = array<i64: 128, 128>}]} {
    %c0 = arith.constant 0 : index
    %c0_0 = arith.constant 0 : index
    %0 = vector.load %arg1[%c0, %c0_0] : memref<128x128xf32, #tpu.memory_space<vmem>>, vector<128x128xf32>
    %1 = arith.truncf %0 : vector<128x128xf32> to vector<128x128xbf16>
    %c0_1 = arith.constant 0 : index
    %c0_2 = arith.constant 0 : index
    %2 = vector.load %arg2[%c0_1, %c0_2] : memref<128x128xf32, #tpu.memory_space<vmem>>, vector<128x128xf32>
    %3 = arith.truncf %2 : vector<128x128xf32> to vector<128x128xbf16>
    %c0_3 = arith.constant 0 : index
    %c0_4 = arith.constant 0 : index
    %4 = vector.load %arg3[%c0_3, %c0_4] : memref<128x128xf32, #tpu.memory_space<vmem>>, vector<128x128xf32>
    %5 = arith.truncf %4 : vector<128x128xf32> to vector<128x128xbf16>
    %c0_5 = arith.constant 0 : index
    %c0_6 = arith.constant 0 : index
    %6 = vector.load %arg4[%c0_5, %c0_6] : memref<128x128xbf16, #tpu.memory_space<vmem>>, vector<128x128xbf16>
    %cst = arith.constant dense<0.000000e+00> : vector<128x128xf32>
    %7 = tpu.matmul %1, %6, %cst {dimension_numbers = #tpu.dot_dimension_numbers<[1], [0], [0], [1], [0, 0, 1, 1], [], []>} : vector<128x128xbf16>, vector<128x128xbf16>, vector<128x128xf32> -> vector<128x128xf32>
    %c0_7 = arith.constant 0 : index
    %c0_8 = arith.constant 0 : index
    %8 = vector.load %arg5[%c0_7, %c0_8] : memref<1x128xf32, #tpu.memory_space<vmem>>, vector<1x128xf32>
    %9 = vector.broadcast %8 : vector<1x128xf32> to vector<128x128xf32>
    %10 = arith.addf %7, %9 : vector<128x128xf32>
    %c0_9 = arith.constant 0 : index
    %c0_10 = arith.constant 0 : index
    %11 = vector.load %arg6[%c0_9, %c0_10] : memref<128x128xbf16, #tpu.memory_space<vmem>>, vector<128x128xbf16>
    %cst_11 = arith.constant dense<0.000000e+00> : vector<128x128xf32>
    %12 = tpu.matmul %3, %11, %cst_11 {dimension_numbers = #tpu.dot_dimension_numbers<[1], [0], [0], [1], [0, 0, 1, 1], [], []>} : vector<128x128xbf16>, vector<128x128xbf16>, vector<128x128xf32> -> vector<128x128xf32>
    %c0_12 = arith.constant 0 : index
    %c0_13 = arith.constant 0 : index
    %13 = vector.load %arg7[%c0_12, %c0_13] : memref<1x128xf32, #tpu.memory_space<vmem>>, vector<1x128xf32>
    %14 = vector.broadcast %13 : vector<1x128xf32> to vector<128x128xf32>
    %15 = arith.addf %12, %14 : vector<128x128xf32>
    %c0_14 = arith.constant 0 : index
    %c0_15 = arith.constant 0 : index
    %16 = vector.load %arg8[%c0_14, %c0_15] : memref<128x128xbf16, #tpu.memory_space<vmem>>, vector<128x128xbf16>
    %cst_16 = arith.constant dense<0.000000e+00> : vector<128x128xf32>
    %17 = tpu.matmul %5, %16, %cst_16 {dimension_numbers = #tpu.dot_dimension_numbers<[1], [0], [0], [1], [0, 0, 1, 1], [], []>} : vector<128x128xbf16>, vector<128x128xbf16>, vector<128x128xf32> -> vector<128x128xf32>
    %c0_17 = arith.constant 0 : index
    %c0_18 = arith.constant 0 : index
    %18 = vector.load %arg9[%c0_17, %c0_18] : memref<1x128xf32, #tpu.memory_space<vmem>>, vector<1x128xf32>
    %19 = vector.broadcast %18 : vector<1x128xf32> to vector<128x128xf32>
    %20 = arith.addf %17, %19 : vector<128x128xf32>
    %21 = vector.shape_cast %10 : vector<128x128xf32> to vector<8x16x128xf32>
    %22 = arith.truncf %21 : vector<8x16x128xf32> to vector<8x16x128xbf16>
    %23 = vector.shape_cast %15 : vector<128x128xf32> to vector<8x16x128xf32>
    %24 = arith.truncf %23 : vector<8x16x128xf32> to vector<8x16x128xbf16>
    %25 = vector.shape_cast %20 : vector<128x128xf32> to vector<8x16x128xf32>
    %26 = arith.truncf %25 : vector<8x16x128xf32> to vector<8x16x128xbf16>
    %27 = vector.extract_strided_slice %22 {offsets = [0, 0, 0], sizes = [8, 16, 32], strides = [1, 1, 1]} : vector<8x16x128xbf16> to vector<8x16x32xbf16>
    %28 = vector.extract_strided_slice %24 {offsets = [0, 0, 0], sizes = [8, 16, 32], strides = [1, 1, 1]} : vector<8x16x128xbf16> to vector<8x16x32xbf16>
    %29 = vector.extract_strided_slice %26 {offsets = [0, 0, 0], sizes = [8, 16, 32], strides = [1, 1, 1]} : vector<8x16x128xbf16> to vector<8x16x32xbf16>
    %cst_19 = arith.constant dense<0.000000e+00> : vector<8x16x16xf32>
    %30 = tpu.matmul %27, %28, %cst_19 {dimension_numbers = #tpu.dot_dimension_numbers<[2], [2], [1], [1], [0, 0, 0, 1, 1, 1], [0], [0]>} : vector<8x16x32xbf16>, vector<8x16x32xbf16>, vector<8x16x16xf32> -> vector<8x16x16xf32>
    %cst_20 = arith.constant dense<0xFF800000> : vector<8x16xf32>
    %31 = vector.multi_reduction <maximumf>, %30, %cst_20 [2] : vector<8x16x16xf32> to vector<8x16xf32>
    %32 = vector.shape_cast %31 : vector<8x16xf32> to vector<8x16x1xf32>
    %33 = vector.broadcast %32 : vector<8x16x1xf32> to vector<8x16x16xf32>
    %34 = arith.subf %30, %33 : vector<8x16x16xf32>
    %35 = math.exp %34 : vector<8x16x16xf32>
    %cst_21 = arith.constant dense<0.000000e+00> : vector<8x16xf32>
    %36 = vector.multi_reduction <add>, %35, %cst_21 [2] : vector<8x16x16xf32> to vector<8x16xf32>
    %37 = vector.shape_cast %36 : vector<8x16xf32> to vector<8x16x1xf32>
    %38 = tpu.reciprocal %37 {approx = true} : vector<8x16x1xf32> -> vector<8x16x1xf32>
    %39 = vector.broadcast %38 : vector<8x16x1xf32> to vector<8x16x16xf32>
    %40 = arith.mulf %35, %39 : vector<8x16x16xf32>
    %41 = arith.truncf %40 : vector<8x16x16xf32> to vector<8x16x16xbf16>
    %cst_22 = arith.constant dense<0.000000e+00> : vector<8x16x32xf32>
    %42 = tpu.matmul %41, %29, %cst_22 {dimension_numbers = #tpu.dot_dimension_numbers<[2], [1], [1], [2], [0, 0, 0, 1, 1, 2], [0], [0]>} : vector<8x16x16xbf16>, vector<8x16x32xbf16>, vector<8x16x32xf32> -> vector<8x16x32xf32>
    %43 = arith.truncf %42 : vector<8x16x32xf32> to vector<8x16x32xbf16>
    %c0_23 = arith.constant 0 : index
    %c0_24 = arith.constant 0 : index
    %c0_25 = arith.constant 0 : index
    %44 = vector.load %arg13[%c0_23, %c0_24, %c0_25] : memref<8x16x128xbf16, #tpu.memory_space<vmem>>, vector<8x16x32xbf16>
    tpu.vector_store %arg13[%c0_23, %c0_24, %c0_25], %43 {strides = array<i32>} : memref<8x16x128xbf16, #tpu.memory_space<vmem>>, vector<8x16x32xbf16>,
    %45 = vector.extract_strided_slice %22 {offsets = [0, 0, 32], sizes = [8, 16, 32], strides = [1, 1, 1]} : vector<8x16x128xbf16> to vector<8x16x32xbf16>
    %46 = vector.extract_strided_slice %24 {offsets = [0, 0, 32], sizes = [8, 16, 32], strides = [1, 1, 1]} : vector<8x16x128xbf16> to vector<8x16x32xbf16>
    %47 = vector.extract_strided_slice %26 {offsets = [0, 0, 32], sizes = [8, 16, 32], strides = [1, 1, 1]} : vector<8x16x128xbf16> to vector<8x16x32xbf16>
    %cst_26 = arith.constant dense<0.000000e+00> : vector<8x16x16xf32>
    %48 = tpu.matmul %45, %46, %cst_26 {dimension_numbers = #tpu.dot_dimension_numbers<[2], [2], [1], [1], [0, 0, 0, 1, 1, 1], [0], [0]>} : vector<8x16x32xbf16>, vector<8x16x32xbf16>, vector<8x16x16xf32> -> vector<8x16x16xf32>
    %cst_27 = arith.constant dense<0xFF800000> : vector<8x16xf32>
    %49 = vector.multi_reduction <maximumf>, %48, %cst_27 [2] : vector<8x16x16xf32> to vector<8x16xf32>
    %50 = vector.shape_cast %49 : vector<8x16xf32> to vector<8x16x1xf32>
    %51 = vector.broadcast %50 : vector<8x16x1xf32> to vector<8x16x16xf32>
    %52 = arith.subf %48, %51 : vector<8x16x16xf32>
    %53 = math.exp %52 : vector<8x16x16xf32>
    %cst_28 = arith.constant dense<0.000000e+00> : vector<8x16xf32>
    %54 = vector.multi_reduction <add>, %53, %cst_28 [2] : vector<8x16x16xf32> to vector<8x16xf32>
    %55 = vector.shape_cast %54 : vector<8x16xf32> to vector<8x16x1xf32>
    %56 = tpu.reciprocal %55 {approx = true} : vector<8x16x1xf32> -> vector<8x16x1xf32>
    %57 = vector.broadcast %56 : vector<8x16x1xf32> to vector<8x16x16xf32>
    %58 = arith.mulf %53, %57 : vector<8x16x16xf32>
    %59 = arith.truncf %58 : vector<8x16x16xf32> to vector<8x16x16xbf16>
    %cst_29 = arith.constant dense<0.000000e+00> : vector<8x16x32xf32>
    %60 = tpu.matmul %59, %47, %cst_29 {dimension_numbers = #tpu.dot_dimension_numbers<[2], [1], [1], [2], [0, 0, 0, 1, 1, 2], [0], [0]>} : vector<8x16x16xbf16>, vector<8x16x32xbf16>, vector<8x16x32xf32> -> vector<8x16x32xf32>
    %61 = arith.truncf %60 : vector<8x16x32xf32> to vector<8x16x32xbf16>
    %c0_30 = arith.constant 0 : index
    %c0_31 = arith.constant 0 : index
    %c32 = arith.constant 32 : index
    %62 = vector.load %arg13[%c0_30, %c0_31, %c32] : memref<8x16x128xbf16, #tpu.memory_space<vmem>>, vector<8x16x32xbf16>
    tpu.vector_store %arg13[%c0_30, %c0_31, %c32], %61 {strides = array<i32>} : memref<8x16x128xbf16, #tpu.memory_space<vmem>>, vector<8x16x32xbf16>,
    %63 = vector.extract_strided_slice %22 {offsets = [0, 0, 64], sizes = [8, 16, 32], strides = [1, 1, 1]} : vector<8x16x128xbf16> to vector<8x16x32xbf16>
    %64 = vector.extract_strided_slice %24 {offsets = [0, 0, 64], sizes = [8, 16, 32], strides = [1, 1, 1]} : vector<8x16x128xbf16> to vector<8x16x32xbf16>
    %65 = vector.extract_strided_slice %26 {offsets = [0, 0, 64], sizes = [8, 16, 32], strides = [1, 1, 1]} : vector<8x16x128xbf16> to vector<8x16x32xbf16>
    %cst_32 = arith.constant dense<0.000000e+00> : vector<8x16x16xf32>
    %66 = tpu.matmul %63, %64, %cst_32 {dimension_numbers = #tpu.dot_dimension_numbers<[2], [2], [1], [1], [0, 0, 0, 1, 1, 1], [0], [0]>} : vector<8x16x32xbf16>, vector<8x16x32xbf16>, vector<8x16x16xf32> -> vector<8x16x16xf32>
    %cst_33 = arith.constant dense<0xFF800000> : vector<8x16xf32>
    %67 = vector.multi_reduction <maximumf>, %66, %cst_33 [2] : vector<8x16x16xf32> to vector<8x16xf32>
    %68 = vector.shape_cast %67 : vector<8x16xf32> to vector<8x16x1xf32>
    %69 = vector.broadcast %68 : vector<8x16x1xf32> to vector<8x16x16xf32>
    %70 = arith.subf %66, %69 : vector<8x16x16xf32>
    %71 = math.exp %70 : vector<8x16x16xf32>
    %cst_34 = arith.constant dense<0.000000e+00> : vector<8x16xf32>
    %72 = vector.multi_reduction <add>, %71, %cst_34 [2] : vector<8x16x16xf32> to vector<8x16xf32>
    %73 = vector.shape_cast %72 : vector<8x16xf32> to vector<8x16x1xf32>
    %74 = tpu.reciprocal %73 {approx = true} : vector<8x16x1xf32> -> vector<8x16x1xf32>
    %75 = vector.broadcast %74 : vector<8x16x1xf32> to vector<8x16x16xf32>
    %76 = arith.mulf %71, %75 : vector<8x16x16xf32>
    %77 = arith.truncf %76 : vector<8x16x16xf32> to vector<8x16x16xbf16>
    %cst_35 = arith.constant dense<0.000000e+00> : vector<8x16x32xf32>
    %78 = tpu.matmul %77, %65, %cst_35 {dimension_numbers = #tpu.dot_dimension_numbers<[2], [1], [1], [2], [0, 0, 0, 1, 1, 2], [0], [0]>} : vector<8x16x16xbf16>, vector<8x16x32xbf16>, vector<8x16x32xf32> -> vector<8x16x32xf32>
    %79 = arith.truncf %78 : vector<8x16x32xf32> to vector<8x16x32xbf16>
    %c0_36 = arith.constant 0 : index
    %c0_37 = arith.constant 0 : index
    %c64 = arith.constant 64 : index
    %80 = vector.load %arg13[%c0_36, %c0_37, %c64] : memref<8x16x128xbf16, #tpu.memory_space<vmem>>, vector<8x16x32xbf16>
    tpu.vector_store %arg13[%c0_36, %c0_37, %c64], %79 {strides = array<i32>} : memref<8x16x128xbf16, #tpu.memory_space<vmem>>, vector<8x16x32xbf16>,
    %81 = vector.extract_strided_slice %22 {offsets = [0, 0, 96], sizes = [8, 16, 32], strides = [1, 1, 1]} : vector<8x16x128xbf16> to vector<8x16x32xbf16>
    %82 = vector.extract_strided_slice %24 {offsets = [0, 0, 96], sizes = [8, 16, 32], strides = [1, 1, 1]} : vector<8x16x128xbf16> to vector<8x16x32xbf16>
    %83 = vector.extract_strided_slice %26 {offsets = [0, 0, 96], sizes = [8, 16, 32], strides = [1, 1, 1]} : vector<8x16x128xbf16> to vector<8x16x32xbf16>
    %cst_38 = arith.constant dense<0.000000e+00> : vector<8x16x16xf32>
    %84 = tpu.matmul %81, %82, %cst_38 {dimension_numbers = #tpu.dot_dimension_numbers<[2], [2], [1], [1], [0, 0, 0, 1, 1, 1], [0], [0]>} : vector<8x16x32xbf16>, vector<8x16x32xbf16>, vector<8x16x16xf32> -> vector<8x16x16xf32>
    %cst_39 = arith.constant dense<0xFF800000> : vector<8x16xf32>
    %85 = vector.multi_reduction <maximumf>, %84, %cst_39 [2] : vector<8x16x16xf32> to vector<8x16xf32>
    %86 = vector.shape_cast %85 : vector<8x16xf32> to vector<8x16x1xf32>
    %87 = vector.broadcast %86 : vector<8x16x1xf32> to vector<8x16x16xf32>
    %88 = arith.subf %84, %87 : vector<8x16x16xf32>
    %89 = math.exp %88 : vector<8x16x16xf32>
    %cst_40 = arith.constant dense<0.000000e+00> : vector<8x16xf32>
    %90 = vector.multi_reduction <add>, %89, %cst_40 [2] : vector<8x16x16xf32> to vector<8x16xf32>
    %91 = vector.shape_cast %90 : vector<8x16xf32> to vector<8x16x1xf32>
    %92 = tpu.reciprocal %91 {approx = true} : vector<8x16x1xf32> -> vector<8x16x1xf32>
    %93 = vector.broadcast %92 : vector<8x16x1xf32> to vector<8x16x16xf32>
    %94 = arith.mulf %89, %93 : vector<8x16x16xf32>
    %95 = arith.truncf %94 : vector<8x16x16xf32> to vector<8x16x16xbf16>
    %cst_41 = arith.constant dense<0.000000e+00> : vector<8x16x32xf32>
    %96 = tpu.matmul %95, %83, %cst_41 {dimension_numbers = #tpu.dot_dimension_numbers<[2], [1], [1], [2], [0, 0, 0, 1, 1, 2], [0], [0]>} : vector<8x16x16xbf16>, vector<8x16x32xbf16>, vector<8x16x32xf32> -> vector<8x16x32xf32>
    %97 = arith.truncf %96 : vector<8x16x32xf32> to vector<8x16x32xbf16>
    %c0_42 = arith.constant 0 : index
    %c0_43 = arith.constant 0 : index
    %c96 = arith.constant 96 : index
    %98 = vector.load %arg13[%c0_42, %c0_43, %c96] : memref<8x16x128xbf16, #tpu.memory_space<vmem>>, vector<8x16x32xbf16>
    tpu.vector_store %arg13[%c0_42, %c0_43, %c96], %97 {strides = array<i32>} : memref<8x16x128xbf16, #tpu.memory_space<vmem>>, vector<8x16x32xbf16>,
    %c0_44 = arith.constant 0 : index
    %c0_45 = arith.constant 0 : index
    %c0_46 = arith.constant 0 : index
    %99 = vector.load %arg13[%c0_44, %c0_45, %c0_46] : memref<8x16x128xbf16, #tpu.memory_space<vmem>>, vector<8x16x128xbf16>
    %100 = vector.shape_cast %99 : vector<8x16x128xbf16> to vector<128x128xbf16>
    %c0_47 = arith.constant 0 : index
    %c0_48 = arith.constant 0 : index
    %101 = vector.load %arg10[%c0_47, %c0_48] : memref<128x128xbf16, #tpu.memory_space<vmem>>, vector<128x128xbf16>
    %cst_49 = arith.constant dense<0.000000e+00> : vector<128x128xf32>
    %102 = tpu.matmul %100, %101, %cst_49 {dimension_numbers = #tpu.dot_dimension_numbers<[1], [0], [0], [1], [0, 0, 1, 1], [], []>} : vector<128x128xbf16>, vector<128x128xbf16>, vector<128x128xf32> -> vector<128x128xf32>
    %c0_50 = arith.constant 0 : index
    %c0_51 = arith.constant 0 : index
    %103 = vector.load %arg11[%c0_50, %c0_51] : memref<1x128xf32, #tpu.memory_space<vmem>>, vector<1x128xf32>
    %104 = vector.broadcast %103 : vector<1x128xf32> to vector<128x128xf32>
    %105 = arith.addf %102, %104 : vector<128x128xf32>
    %c0_52 = arith.constant 0 : index
    %c0_53 = arith.constant 0 : index
    %106 = vector.load %arg12[%c0_52, %c0_53] : memref<128x128xf32, #tpu.memory_space<vmem>>, vector<128x128xf32>
    tpu.vector_store %arg12[%c0_52, %c0_53], %105 {strides = array<i32>} : memref<128x128xf32, #tpu.memory_space<vmem>>, vector<128x128xf32>,
    return
  }
  func.func @transform_0(%arg0: i32) -> (i32, i32) {
    %c0_i32 = arith.constant 0 : i32
    %c0_i32_0 = arith.constant 0 : i32
    return %arg0, %c0_i32 : i32, i32
  }
  func.func @transform_1(%arg0: i32) -> (i32, i32) {
    %c0_i32 = arith.constant 0 : i32
    %c0_i32_0 = arith.constant 0 : i32
    return %arg0, %c0_i32 : i32, i32
  }
  func.func @transform_2(%arg0: i32) -> (i32, i32) {
    %c0_i32 = arith.constant 0 : i32
    %c0_i32_0 = arith.constant 0 : i32
    return %arg0, %c0_i32 : i32, i32
  }
  func.func @transform_3(%arg0: i32) -> (i32, i32) {
    %c0_i32 = arith.constant 0 : i32
    %c0_i32_0 = arith.constant 0 : i32
    %c0_i32_1 = arith.constant 0 : i32
    return %c0_i32, %c0_i32_0 : i32, i32
  }
  func.func @transform_4(%arg0: i32) -> (i32, i32) {
    %c0_i32 = arith.constant 0 : i32
    %c0_i32_0 = arith.constant 0 : i32
    %c0_i32_1 = arith.constant 0 : i32
    return %c0_i32, %c0_i32_0 : i32, i32
  }
  func.func @transform_5(%arg0: i32) -> (i32, i32) {
    %c0_i32 = arith.constant 0 : i32
    %c0_i32_0 = arith.constant 0 : i32
    %c0_i32_1 = arith.constant 0 : i32
    return %c0_i32, %c0_i32_0 : i32, i32
  }
  func.func @transform_6(%arg0: i32) -> (i32, i32) {
    %c0_i32 = arith.constant 0 : i32
    %c0_i32_0 = arith.constant 0 : i32
    %c0_i32_1 = arith.constant 0 : i32
    return %c0_i32, %c0_i32_0 : i32, i32
  }
  func.func @transform_7(%arg0: i32) -> (i32, i32) {
    %c0_i32 = arith.constant 0 : i32
    %c0_i32_0 = arith.constant 0 : i32
    %c0_i32_1 = arith.constant 0 : i32
    return %c0_i32, %c0_i32_0 : i32, i32
  }
  func.func @transform_8(%arg0: i32) -> (i32, i32) {
    %c0_i32 = arith.constant 0 : i32
    %c0_i32_0 = arith.constant 0 : i32
    %c0_i32_1 = arith.constant 0 : i32
    return %c0_i32, %c0_i32_0 : i32, i32
  }
  func.func @transform_9(%arg0: i32) -> (i32, i32) {
    %c0_i32 = arith.constant 0 : i32
    %c0_i32_0 = arith.constant 0 : i32
    %c0_i32_1 = arith.constant 0 : i32
    return %c0_i32, %c0_i32_0 : i32, i32
  }
  func.func @transform_10(%arg0: i32) -> (i32, i32) {
    %c0_i32 = arith.constant 0 : i32
    %c0_i32_0 = arith.constant 0 : i32
    %c0_i32_1 = arith.constant 0 : i32
    return %c0_i32, %c0_i32_0 : i32, i32
  }
  func.func @transform_11(%arg0: i32) -> (i32, i32) {
    %c0_i32 = arith.constant 0 : i32
    %c0_i32_0 = arith.constant 0 : i32
    return %arg0, %c0_i32 : i32, i32
  }
}

</mosaic_0001>

<bundles_post_ra>
// kernel: tpu_custom_call.1
= control target key start
LH: loop header
LB: loop body
LE: loop exit
PB: predicated region body
PF: predicated region fallthrough
CT: control target
= control target key end

     0   :  { %s8953_s0 = inlined_call_operand.hbm [shape: f32[256,128], index: 0, kind: input, shape index: {}]   ;;  %s8954_s1 = inlined_call_operand.hbm [shape: f32[256,128], index: 1, kind: input, shape index: {}]   ;;  %s8955_s2 = inlined_call_operand.hbm [shape: f32[256,128], index: 2, kind: input, shape index: {}]   ;;  %s8956_s3 = inlined_call_operand.hbm [shape: bf16[128,128], index: 3, kind: input, shape index: {}]   ;;  %s8957_s4 = inlined_call_operand.vmem [shape: f32[1,128], index: 4, kind: input, shape index: {}]   ;;  %s8958_s5 = inlined_call_operand.hbm [shape: bf16[128,128], index: 5, kind: input, shape index: {}]   ;;  %s8959_s6 = inlined_call_operand.vmem [shape: f32[1,128], index: 6, kind: input, shape index: {}]   ;;  %s8960_s7 = inlined_call_operand.hbm [shape: bf16[128,128], index: 7, kind: input, shape index: {}]   ;;  %s8961_s8 = inlined_call_operand.vmem [shape: f32[1,128], index: 8, kind: input, shape index: {}]   ;;  %s8962_s9 = inlined_call_operand.hbm [shape: bf16[128,128], index: 9, kind: input, shape index: {}]   ;;  %s8963_s10 = inlined_call_operand.vmem [shape: f32[1,128], index: 10, kind: input, shape index: {}]   ;;  %s8964_s11 = inlined_call_operand.hbm [shape: f32[256,128], index: 11, kind: output, shape index: {}]  }
   0x1   :  { %9005 = sst [smem:[#allocation36_spill]] %s8954_s1 }
   0x2   :  { %9006 = sst [smem:[#allocation37_spill]] %s8956_s3 }
   0x3   :  { %9007 = sst [smem:[#allocation38_spill]] %s8959_s6 }
   0x4   :  { %9008 = sst [smem:[#allocation39_spill]] %s8960_s7 }
   0x5   :  { %9009 = sst [smem:[#allocation40_spill]] %s8961_s8 }
   0x6   :  { %9010 = sst [smem:[#allocation41_spill]] %s8963_s10 }
   0x7   :  { %9011 = sst [smem:[#allocation42_spill]] %s8964_s11 }
   0x8   :  { %16 = vsyncpa [#allocation4], 0 }
   0x9   :  { %18 = vsyncpa [#allocation4 + $0x1], 0 }
   0xa   :  { %19 = vsyncpa [#allocation7], 0 }
   0xb   :  { %21 = vsyncpa [#allocation7 + $0x1], 0 }
   0xc   :  { %22 = vsyncpa [#allocation10], 0 }
   0xd   :  { %23 = vsyncpa [#allocation13], 0 }
   0xe   :  { %24 = vsyncpa [#allocation5], 0 }
   0xf   :  { %26 = vsyncpa [#allocation5 + $0x1], 0  ;;  %s7105_s17 = smov 0   ;;  %s7107_s18 = smov 0  }
  0x10   :  { %s7109_s19 = smov 0   ;;  %s7111_s20 = smov 0  }
  0x11 LB: > { %9012 = sst [smem:[#allocation21_spill]] %s7012_s17  ;;  %s7126_s21 = sadd.s32 4294967295, %s7024_s20   ;;  %s7024_s20 = sphi %s7111_s20, %s9084_s20   ;;  %s7020_s19 = sphi %s7109_s19, %s9088_s19   ;;  %s7016_s18 = sphi %s7107_s18, %s9087_s18   ;;  %s7012_s17 = sphi %s7105_s17, %s9086_s17  }
  0x12   : > { %9013 = sst [smem:[#allocation22_spill]] %s7024_s20  ;;  %s5510_s22 = sadd.s32 4294967294, %s7024_s20  }
  0x13   : > { %p52_p0 = scmp.ne.s32.totalorder %s7016_s18, %s7012_s17  ;;  %p8965_p1 = scmp.eq.s32.totalorder %s7126_s21, 0 }
  0x14   : > { %p302_p3 = scmp.eq.s32.totalorder %s5510_s22, 1  ;;  %p5511_p5 = scmp.ge.s32.totalorder %s7024_s20, 1 }
  0x15   : > { %p7135_p4 = por %p8965_p1, %p52_p0  ;;  %p309_p7 = scmp.lt.s32.totalorder %s7024_s20, 3 }
  0x16   : > { %p7140_p6 = por %p302_p3, %p52_p0  ;;  %s7026_s26 = smov [#allocation9]  }
  0x17   : > { %s9014_s23 = scalar_select %p7135_p4, 1, 0 }
  0x18   : > { %s9015_s24 = scalar_select %p7140_p6, 1, 0 }
  0x19   : > { %p7145_p8 = pnand %p5511_p5, %p309_p7  ;;  %s321_s27 = sshll.u32 %s7026_s26, 4  ;;  %s7149_s27 = int_to_ptr.vmem [resolvable:$true] %s321_s27 }
  0x1a   : > { %9016 = sst [smem:[#allocation23_spill]] %s9015_s24  ;;  %s7027_s29 = smov [#allocation12]  }
  0x1b   : > { %s9017_s25 = scalar_select %p7145_p8, 1, 0 }
  0x1c   : > { %p6372_p9 = pneg %p7145_p8  ;;  %s353_s30 = sshll.u32 %s7027_s29, 4  ;;  %s7160_s30 = int_to_ptr.vmem [resolvable:$true] %s353_s30 }
  0x1d   : > { %s9019_s3 = sld [smem:[#allocation37_spill]] }
  0x1e   : > { %p7156_p11 = pnand %p6372_p9, %p8965_p1 }
  0x20   : > { %s9018_s28 = scalar_select %p7156_p11, 1, 0 }
  0x21   : > { %p7170_p13 = pneg %p7156_p11 }
  0x23   : > { %s6744_s14 = scalar_lea.hbm %s9019_s3, 1024 }
  0x24   : > { %p6745_p12 = scmp.ne.s32.totalorder %s9019_s3, %s6744_s14  ;;  %p6751_p5 = scmp.lt.u32.totalorder %s6744_s14, %s9019_s3 }
  0x25   : > { %s9020_s22 = scalar_select %p7170_p13, 1, 0 }
  0x26   : > { %p6747_p0 = pnand %p7170_p13, %p6745_p12 }
  0x28   : > { %p6748_p3 = pneg %p6747_p0 }
  0x2a   : > { %p6753_p7 = pnand %p6751_p5, %p6748_p3 }
  0x2c   : > { %6756 = shalt.err (!%p6753_p7)
}
  0x2d   : > { %s6757_s12 = scalar_lea.vmem %s7149_s27, 1024  ;;  %p6765_p2 = scmp.lt.s32.totalorder %s7149_s27, %s7149_s27 }
  0x2e   : > { %p6758_p9 = scmp.ne.s32.totalorder %s7149_s27, %s6757_s12  ;;  %p6766_p6 = scmp.lt.s32.totalorder %s6757_s12, %s6757_s12 }
  0x30   : > { %p6760_p10 = pnand %p6758_p9, %p7170_p13  ;;  %p6767_p12 = por %p6766_p6, %p6765_p2 }
  0x32   : > { %p6761_p1 = pneg %p6760_p10 }
  0x34   : > { %p6768_p0 = pnand %p6767_p12, %p6761_p1 }
  0x36   : > { %6771 = shalt.err (!%p6768_p0)
}
  0x37   : > { %s8970_s13 = smov 64   ;;  %s8972_s14 = smov 4  }
  0x38   : > { %6375 = dma.hbm_to_vmem [thread:$0]  (!%p7156_p11), %s9019_s3, 1024, %s7149_s27, [#allocation10], %s8970_s13, %s8970_s13, %s8972_s14  }
  0x39   : > { %s9021_s7 = sld [smem:[#allocation39_spill]] }
  0x3f   : > { %s6772_s12 = scalar_lea.hbm %s9021_s7, 1024 }
  0x40   : > { %p6773_p1 = scmp.ne.s32.totalorder %s9021_s7, %s6772_s12  ;;  %p6779_p10 = scmp.lt.u32.totalorder %s6772_s12, %s9021_s7 }
  0x42   : > { %p6775_p2 = pnand %p6773_p1, %p7170_p13 }
  0x44   : > { %p6776_p6 = pneg %p6775_p2 }
  0x46   : > { %p6781_p3 = pnand %p6779_p10, %p6776_p6 }
  0x48   : > { %6784 = shalt.err (!%p6781_p3)
}
  0x49   : > { %s6785_s27 = scalar_lea.vmem %s7160_s30, 1024  ;;  %p6793_p12 = scmp.lt.s32.totalorder %s7160_s30, %s7160_s30 }
  0x4a   : > { %p6786_p5 = scmp.ne.s32.totalorder %s7160_s30, %s6785_s27  ;;  %p6794_p0 = scmp.lt.s32.totalorder %s6785_s27, %s6785_s27 }
  0x4c   : > { %p6788_p7 = pnand %p6786_p5, %p7170_p13  ;;  %p6795_p1 = por %p6794_p0, %p6793_p12 }
  0x4e   : > { %p6789_p9 = pneg %p6788_p7 }
  0x50   : > { %p6796_p2 = pnand %p6795_p1, %p6789_p9 }
  0x52   : > { %6799 = shalt.err (!%p6796_p2)
}
  0x53   : > { %6381 = dma.hbm_to_vmem [thread:$0]  (!%p7156_p11), %s9021_s7, 1024, %s7160_s30, [#allocation13], %s8970_s13, %s8970_s13, %s8972_s14  }
  0x54   : > { %s7221_s17 = sadd.s32 1, %s7024_s20   ;;  %s39_s24 = sadd.s32 1, %s7020_s19 }
  0x55   : > { %9022 = sst [smem:[#allocation24_spill]] %s7221_s17  ;;  %s36_s15 = ssub.s32 %s7024_s20, %s7221_s17 }
  0x56   : > { %p46_p6 = scmp.ne.s32.totalorder %s7020_s19, %s7016_s18  ;;  %p37_p10 = scmp.eq.s32.totalorder %s36_s15, 0 }
  0x57   : > { %p47_p3 = scmp.eq.s32.totalorder %s7024_s20, 0  ;;  %p9023_p5 = scmp.eq.s32.totalorder %s7126_s21, 1 }
  0x58   : > { %p6403_p9 = scmp.lt.s32.totalorder %s7024_s20, 2  ;;  %s8969_s29 = sand.u32 1, %s7020_s19  }
  0x59   : > { %p7231_p7 = por %p9023_p5, %p46_p6  ;;  %p48_p12 = por %p47_p3, %p46_p6 }
  0x5a   : > { %s7237_s26 = scalar_select %p37_p10, %s7020_s19, %s39_s24  }
  0x5b   : > { %s9024_s16 = scalar_select %p7231_p7, 1, 0 }
  0x5c   : > { %9026 = sst [smem:[#allocation26_spill]] %s7237_s26  ;;  %s7242_s30 = sshll.u32 %s8969_s29, 7 }
  0x5d   : > { %9025 = sst [smem:[#allocation25_spill]] %s9024_s16  ;;  %s7245_s12 = sshll.u32 %s7024_s20, 11 }
  0x5e   : > { %p7247_p0 = pnand %p6403_p9, %p48_p12  ;;  %s407_s10 = sand.u32 1, %s7024_s20  }
  0x5f   : > { %s9028_s1 = sld [smem:[#allocation36_spill]]  ;;  %s411_s29 = scalar_lea.vmem [#allocation6], %s7242_s30 }
  0x60   : > { %s9027_s27 = scalar_select %p7247_p0, 1, 0 }
  0x61   : > { %s418_s13 = sshll.u32 %s411_s29, 4  ;;  %s7030_s14 = smov [#allocation11]   ;;  %s7259_s13 = int_to_ptr.vmem [resolvable:$true] %s418_s13 }
  0x62   : > { %s7261_s3 = sshll.u32 %s7030_s14, 4  ;;  %s7263_s7 = scalar_lea.sflag [#allocation7], %s407_s10  ;;  %s338_s3 = int_to_ptr.vmem [resolvable:$true] %s7261_s3 }
  0x63   : > { %p7269_p2 = pneg %p7247_p0 }
  0x65   : > { %s7256_s24 = scalar_lea.hbm %s9028_s1, %s7245_s12  ;;  %s6805_s17 = scalar_lea.hbm %s9028_s1, 4096 }
  0x66   : > { %s6800_s26 = scalar_lea.hbm %s7256_s24, 2048  ;;  %p6806_p3 = scmp.lt.u32.totalorder %s7256_s24, %s9028_s1 }
  0x67   : > { %p6801_p1 = scmp.ne.s32.totalorder %s7256_s24, %s6800_s26  ;;  %p6807_p5 = scmp.lt.u32.totalorder %s6805_s17, %s6800_s26 }
  0x68   : > { %s9029_s11 = scalar_select %p7269_p2, 1, 0 }
  0x69   : > { %p6803_p6 = pnand %p7269_p2, %p6801_p1  ;;  %p6808_p9 = por %p6807_p5, %p6806_p3 }
  0x6a   : > { %p6809_p12 = scmp.lt.u32.totalorder %s6800_s26, %s7256_s24 }
  0x6b   : > { %p6804_p10 = pneg %p6803_p6 }
  0x6c   : > { %p6810_p7 = por %p6809_p12, %p6808_p9 }
  0x6e   : > { %p6811_p4 = pnand %p6810_p7, %p6804_p10 }
  0x70   : > { %6814 = shalt.err (!%p6811_p4)
}
  0x71   : > { %s6815_s10 = scalar_lea.vmem %s7259_s13, 2048  ;;  %s7031_s15 = smov [#allocation6]  }
  0x72   : > { %p6816_p1 = scmp.ne.s32.totalorder %s7259_s13, %s6815_s10  ;;  %s6820_s29 = sshll.u32 %s7031_s15, 4  ;;  %s6821_s29 = int_to_ptr.vmem [resolvable:$false] %s6820_s29 }
  0x73   : > { %s6822_s20 = scalar_lea.vmem %s6821_s29, 4096  ;;  %p6823_p11 = scmp.lt.s32.totalorder %s7259_s13, %s6821_s29 }
  0x74   : > { %p6818_p6 = pnand %p6816_p1, %p7269_p2  ;;  %p6824_p13 = scmp.lt.s32.totalorder %s6822_s20, %s6815_s10 }
  0x76   : > { %p6819_p8 = pneg %p6818_p6  ;;  %p6825_p3 = por %p6824_p13, %p6823_p11 }
  0x78   : > { %p6826_p5 = pnand %p6825_p3, %p6819_p8 }
  0x7a   : > { %6829 = shalt.err (!%p6826_p5)
}
  0x7b   : > { %s8988_s17 = smov 128   ;;  %s8990_s26 = smov 8  }
  0x7c   : > { %6391 = dma.hbm_to_vmem [thread:$0]  (!%p7247_p0), %s7256_s24, 2048, %s7259_s13, %s7263_s7, %s8988_s17, %s8988_s17, %s8990_s26  }
  0x7d   : > { %s6830_s10 = scalar_lea.hbm %s8958_s5, 1024  ;;  %p9030_p8 = scmp.ne.s32.totalorder %s9020_s22, 0 }
  0x7e   : > { %p6831_p4 = scmp.ne.s32.totalorder %s8958_s5, %s6830_s10  ;;  %p6837_p7 = scmp.lt.u32.totalorder %s6830_s10, %s8958_s5 }
  0x80   : > { %p6833_p11 = pnand %p6831_p4, %p9030_p8 }
  0x82   : > { %p6834_p13 = pneg %p6833_p11 }
  0x84   : > { %p6839_p10 = pnand %p6837_p7, %p6834_p13 }
  0x86   : > { %6842 = shalt.err (!%p6839_p10)
}
  0x87   : > { %s6843_s8 = scalar_lea.vmem %s338_s3, 1024  ;;  %p6851_p6 = scmp.lt.s32.totalorder %s338_s3, %s338_s3 }
  0x88   : > { %p6844_p9 = scmp.ne.s32.totalorder %s338_s3, %s6843_s8  ;;  %p6852_p3 = scmp.lt.s32.totalorder %s6843_s8, %s6843_s8 }
  0x8a   : > { %p6846_p12 = pnand %p6844_p9, %p9030_p8  ;;  %p6853_p5 = por %p6852_p3, %p6851_p6 }
  0x8c   : > { %p6847_p1 = pneg %p6846_p12 }
  0x8e   : > { %p6854_p0 = pnand %p6853_p5, %p6847_p1 }
  0x90   : > { %6857 = shalt.err (!%p6854_p0)
}
  0x91   : > { %p9031_p4 = scmp.ne.s32.totalorder %s9018_s28, 0  ;;  %s9032_s13 = smov 4  }
  0x92   : > { %s9033_s24 = smov 64   ;;  %s7034_s14 = smov [#allocation14]  }
  0x93   : > { %6378 = dma.hbm_to_vmem [thread:$0]  (!%p9031_p4), %s8958_s5, 1024, %s338_s3, [#allocation10], %s9033_s24, %s9033_s24, %s9032_s13  }
  0x94   : > { %s369_s15 = sshll.u32 %s7034_s14, 4  ;;  %s6858_s8 = scalar_lea.hbm %s8962_s9, 1024  ;;  %s370_s15 = int_to_ptr.vmem [resolvable:$true] %s369_s15 }
  0x95   : > { %p6859_p0 = scmp.ne.s32.totalorder %s8962_s9, %s6858_s8  ;;  %p6865_p7 = scmp.lt.u32.totalorder %s6858_s8, %s8962_s9 }
  0x97   : > { %p6861_p11 = pnand %p6859_p0, %p9030_p8 }
  0x99   : > { %p6862_p13 = pneg %p6861_p11 }
  0x9b   : > { %p6867_p10 = pnand %p6865_p7, %p6862_p13 }
  0x9d   : > { %6870 = shalt.err (!%p6867_p10)
}
  0x9e   : > { %s6871_s3 = scalar_lea.vmem %s370_s15, 1024  ;;  %p6879_p6 = scmp.lt.s32.totalorder %s370_s15, %s370_s15 }
  0x9f   : > { %p6872_p9 = scmp.ne.s32.totalorder %s370_s15, %s6871_s3  ;;  %p6880_p3 = scmp.lt.s32.totalorder %s6871_s3, %s6871_s3 }
  0xa1   : > { %p6874_p12 = pnand %p6872_p9, %p9030_p8  ;;  %p6881_p5 = por %p6880_p3, %p6879_p6 }
  0xa3   : > { %p6875_p1 = pneg %p6874_p12 }
  0xa5   : > { %p6882_p2 = pnand %p6881_p5, %p6875_p1 }
  0xa7   : > { %6885 = shalt.err (!%p6882_p2)
}
  0xa8   : > { %6384 = dma.hbm_to_vmem [thread:$0]  (!%p9031_p4), %s8962_s9, 1024, %s370_s15, [#allocation13], %s9033_s24, %s9033_s24, %s9032_s13  }
  0xa9   : > { %s7343_s1 = scalar_lea.hbm %s8953_s0, %s7245_s12  ;;  %s390_s28 = scalar_lea.vmem [#allocation3], %s7242_s30 }
  0xaa   : > { %s397_s16 = sshll.u32 %s390_s28, 4  ;;  %s9034_s14 = sand.u32 1, %s7020_s19   ;;  %s7346_s16 = int_to_ptr.vmem [resolvable:$true] %s397_s16 }
  0xab   : > { %s7350_s10 = scalar_lea.sflag [#allocation4], %s9034_s14  ;;  %s6886_s29 = scalar_lea.hbm %s7343_s1, 2048 }
  0xac   : > { %p6887_p2 = scmp.ne.s32.totalorder %s7343_s1, %s6886_s29  ;;  %p9035_p8 = scmp.ne.s32.totalorder %s9029_s11, 0 }
  0xad   : > { %s6891_s15 = scalar_lea.hbm %s8953_s0, 4096  ;;  %p6892_p11 = scmp.lt.u32.totalorder %s7343_s1, %s8953_s0 }
  0xae   : > { %p6889_p4 = pnand %p6887_p2, %p9035_p8  ;;  %p6893_p13 = scmp.lt.u32.totalorder %s6891_s15, %s6886_s29 }
  0xaf   : > { %p6895_p10 = scmp.lt.u32.totalorder %s6886_s29, %s7343_s1 }
  0xb0   : > { %p6890_p0 = pneg %p6889_p4  ;;  %p6894_p7 = por %p6893_p13, %p6892_p11 }
  0xb2   : > { %p6896_p9 = por %p6895_p10, %p6894_p7 }
  0xb4   : > { %p6897_p12 = pnand %p6896_p9, %p6890_p0 }
  0xb6   : > { %6900 = shalt.err (!%p6897_p12)
}
  0xb7   : > { %s6901_s3 = scalar_lea.vmem %s7346_s16, 2048  ;;  %s7035_s6 = smov [#allocation3]  }
  0xb8   : > { %p6902_p1 = scmp.ne.s32.totalorder %s7346_s16, %s6901_s3  ;;  %s6906_s17 = sshll.u32 %s7035_s6, 4  ;;  %s6907_s17 = int_to_ptr.vmem [resolvable:$false] %s6906_s17 }
  0xb9   : > { %s6908_s22 = scalar_lea.vmem %s6907_s17, 4096  ;;  %p6909_p5 = scmp.lt.s32.totalorder %s7346_s16, %s6907_s17 }
  0xba   : > { %p6904_p6 = pnand %p6902_p1, %p9035_p8  ;;  %p6910_p2 = scmp.lt.s32.totalorder %s6908_s22, %s6901_s3 }
  0xbc   : > { %p6905_p3 = pneg %p6904_p6  ;;  %p6911_p4 = por %p6910_p2, %p6909_p5 }
  0xbe   : > { %p6912_p11 = pnand %p6911_p4, %p6905_p3 }
  0xc0   : > { %6915 = shalt.err (!%p6912_p11)
}
  0xc1   : > { %p9036_p0 = scmp.ne.s32.totalorder %s9027_s27, 0  ;;  %s9037_s26 = smov 8  }
  0xc2   : > { %s9038_s28 = smov 128   ;;  %s7381_s13 = scalar_lea.hbm %s8955_s2, %s7245_s12 }
  0xc3   : > { %6388 = dma.hbm_to_vmem [thread:$0]  (!%p9036_p0), %s7343_s1, 2048, %s7346_s16, %s7350_s10, %s9038_s28, %s9038_s28, %s9037_s26  }
  0xc4   : > { %s432_s24 = scalar_lea.vmem [#allocation8], %s7242_s30  ;;  %s6916_s8 = scalar_lea.hbm %s7381_s13, 2048 }
  0xc5   : > { %s439_s15 = sshll.u32 %s432_s24, 4  ;;  %p6917_p13 = scmp.ne.s32.totalorder %s7381_s13, %s6916_s8  ;;  %s7384_s15 = int_to_ptr.vmem [resolvable:$true] %s439_s15 }
  0xc6   : > { %s6921_s16 = scalar_lea.hbm %s8955_s2, 4096  ;;  %p6922_p9 = scmp.lt.u32.totalorder %s7381_s13, %s8955_s2 }
  0xc7   : > { %p6919_p7 = pnand %p6917_p13, %p9035_p8  ;;  %p6923_p12 = scmp.lt.u32.totalorder %s6921_s16, %s6916_s8 }
  0xc8   : > { %p6925_p6 = scmp.lt.u32.totalorder %s6916_s8, %s7381_s13 }
  0xc9   : > { %p6920_p10 = pneg %p6919_p7  ;;  %p6924_p1 = por %p6923_p12, %p6922_p9 }
  0xcb   : > { %p6926_p3 = por %p6925_p6, %p6924_p1 }
  0xcd   : > { %p6927_p5 = pnand %p6926_p3, %p6920_p10 }
  0xcf   : > { %6930 = shalt.err (!%p6927_p5)
}
  0xd0   : > { %s6931_s30 = scalar_lea.vmem %s7384_s15, 2048  ;;  %s7036_s3 = smov [#allocation8]  }
  0xd1   : > { %p6932_p2 = scmp.ne.s32.totalorder %s7384_s15, %s6931_s30  ;;  %s6936_s6 = sshll.u32 %s7036_s3, 4  ;;  %s6937_s6 = int_to_ptr.vmem [resolvable:$false] %s6936_s6 }
  0xd2   : > { %s6938_s17 = scalar_lea.vmem %s6937_s6, 4096  ;;  %p6939_p13 = scmp.lt.s32.totalorder %s7384_s15, %s6937_s6 }
  0xd3   : > { %p6934_p4 = pnand %p6932_p2, %p9035_p8  ;;  %p6940_p7 = scmp.lt.s32.totalorder %s6938_s17, %s6931_s30 }
  0xd5   : > { %p6935_p11 = pneg %p6934_p4  ;;  %p6941_p9 = por %p6940_p7, %p6939_p13 }
  0xd7   : > { %p6942_p12 = pnand %p6941_p9, %p6935_p11 }
  0xd9   : > { %6945 = shalt.err (!%p6942_p12)
}
  0xda   : > { %6394 = dma.hbm_to_vmem [thread:$0]  (!%p9036_p0), %s7381_s13, 2048, %s7384_s15, %s7263_s7, %s9038_s28, %s9038_s28, %s9037_s26  }
  0xdb   : > { %p9039_p8 = scmp.ne.s32.totalorder %s9017_s25, 0 }
  0xdd   : > { %451 = sbr.rel (%p9039_p8) target bundleno = 3628 (0xe2c), region = 64 }
  0xe4   : > { %s7414_s11 = sand.u32 1, %s7016_s18   ;;  %p9040_p10 = scmp.ne.s32.totalorder %s9014_s23, 0 }
  0xe5   : > { %s7417_s22 = sshll.u32 %s7414_s11, 7  ;;  %s454_s27 = scalar_lea.sflag [#allocation4], %s7414_s11 }
  0xe6   : > { %s7421_s14 = scalar_lea.vmem [#allocation3], %s7417_s22 }
  0xe7   : > { %6991 = dma.done.wait (%p9040_p10), %s454_s27, 2048  }
  0xe8   : > { %6993 = vsyncadd (%p9040_p10), %s454_s27, 4294965248  ;;  %s462_s7 = sand.u32 1, %s7126_s21   ;;  %s7429_s26 = scalar_lea.vmem [#allocation6], %s7417_s22 }
  0xe9   : > { %s463_s25 = scalar_lea.sflag [#allocation7], %s462_s7 }
  0xea   : > { %6995 = dma.done.wait (%p9040_p10), %s463_s25, 4096  }
  0xeb   : > { %6997 = vsyncadd (%p9040_p10), %s463_s25, 4294963200  ;;  %s7436_s28 = scalar_lea.vmem [#allocation8], %s7417_s22  ;;  %p9041_p0 = scmp.eq.s32.totalorder %s7126_s21, 0 }
  0xed   : > { %6999 = dma.done.wait (%p9041_p0), [#allocation10], 2048   ;;  %p9042_p1 = pmov %p9041_p0 }
  0xee   : > { %p9043_p6 = pmov %p9041_p0 }
  0xef   : > { %7001 = vsyncadd (%p9042_p1), [#allocation10], 4294965248 }
  0xf0   : > { %7003 = dma.done.wait (%p9043_p6), [#allocation13], 2048   ;;  %p9044_p3 = pmov %p9041_p0 }
  0xf1   : > { %v6456_v0 = vld [vmem:[#allocation9] sm:$0xff]   ;;  %v6457_v1 = vld [vmem:[#allocation9 + $0x8] sm:$0xff]   ;;  %v6458_v2 = vld [vmem:[#allocation9 + $0x10] sm:$0xff]   ;;  %vm7038_vm0 = vmmov 0   ;;  %s9045_s15 = sld [smem:[#allocation38_spill]]  ;;  %vm1145_vm1 = vcmask 261120  }
  0xf2   : > { %7005 = vsyncadd (%p9044_p3), [#allocation13], 4294965248  ;;  %5836 = vmatprep.subr.bf16.mxu1 %v6456_v0  ;;  %v6459_v3 = vld [vmem:[#allocation9 + $0x18] sm:$0xff]   ;;  %v545_v4 = vld [vmem:[%s7421_s14] sm:$0xff]  ;;  %s9046_s1 = sld [smem:[#allocation40_spill]]  ;;  %vm1522_vm2 = vcmask 130048  }
  0xf3   : > { %5837 = vmatpush3.bf16.msra.mxu1 %v6456_v0  ;;  %v546_v5 = vld [vmem:[%s7421_s14 + $0x8] sm:$0xff]  ;;  %v6460_v7 = vld [vmem:[#allocation9 + $0x20] sm:$0xff]   ;;  %v6462_v9 = vld [vmem:[#allocation9 + $0x30] sm:$0xff]   ;;  %s7039_s16 = smov 96   ;;  %s7040_s10 = smov 64   ;;  %vm3107_vm3 = vcmask 523520  }
  0xf4   : > { %5838 = vmatprep.subr.bf16.mxu1 %v6457_v1  ;;  %v561_v6 = vpack.c.bf16 %v546_v5, %v545_v4  ;;  %v6461_v8 = vld [vmem:[#allocation9 + $0x28] sm:$0xff]   ;;  %v6463_v10 = vld [vmem:[#allocation9 + $0x38] sm:$0xff]   ;;  %v547_v11 = vld [vmem:[%s7421_s14 + $0x10] sm:$0xff]  ;;  %s7041_s12 = smov 32   ;;  %vm4124_vm4 = vcmask 785920   ;;  %vm5141_vm5 = vcmask 1048320  }
  0xf5   : > { %v548_v12 = vld [vmem:[%s7421_s14 + $0x18] sm:$0xff]  ;;  %v6464_v13 = vld [vmem:[#allocation11] sm:$0xff]   ;;  %v550_v15 = vld [vmem:[%s7421_s14 + $0x28] sm:$0xff]  ;;  %s9075_s6 = sld [smem:[#allocation41_spill]]  ;;  %s8884_s17 = scalar_lea.vmem [#allocation15], %s7417_s22 }
  0xf6   : > { %5852 = vmatprep.mubr.bf16.mxu1 %v561_v6  ;;  %v549_v14 = vld [vmem:[%s7421_s14 + $0x20] sm:$0xff]  ;;  %v562_v16 = vpack.c.bf16 %v548_v12, %v547_v11  ;;  %v6465_v17 = vld [vmem:[#allocation11 + $0x8] sm:$0xff]   ;;  %v551_v19 = vld [vmem:[%s7421_s14 + $0x30] sm:$0xff]  ;;  %s5643_s22 = sshll.u32 %s7126_s21, 11  ;;  %s5356_s27 = sshll.u32 %s8884_s17, 4  ;;  %s8906_s27 = int_to_ptr.vmem [resolvable:$true] %s5356_s27 }
  0xf7   : > { %5839 = vmatpush3.bf16.msra.mxu1 %v6457_v1  ;;  %v563_v18 = vpack.c.bf16 %v550_v15, %v549_v14  ;;  %v552_v20 = vld [vmem:[%s7421_s14 + $0x38] sm:$0xff]  ;;  %v6466_v21 = vld [vmem:[#allocation11 + $0x10] sm:$0xff]   ;;  %v553_v22 = vld [vmem:[%s7421_s14 + $0x40] sm:$0xff]  ;;  %s5343_s21 = scalar_lea.sflag [#allocation5], %s7414_s11  ;;  %s6946_s23 = scalar_lea.vmem %s8906_s27, 2048 }
  0xf8   : > { %5840 = vmatprep.subr.bf16.mxu1 %v6458_v2  ;;  %v554_v23 = vld [vmem:[%s7421_s14 + $0x48] sm:$0xff]  ;;  %v564_v24 = vpack.c.bf16 %v552_v20, %v551_v19  ;;  %v6467_v26 = vld [vmem:[#allocation11 + $0x18] sm:$0xff]   ;;  %v555_v27 = vld [vmem:[%s7421_s14 + $0x50] sm:$0xff]  ;;  %v8994_v20 = vmov 0.0   ;;  %p6947_p5 = scmp.ne.s32.totalorder %s8906_s27, %s6946_s23  ;;  %s7042_s29 = smov [#allocation15]  }
  0xf9   : > { %v565_v25 = vpack.c.bf16 %v554_v23, %v553_v22  ;;  %v556_v28 = vld [vmem:[%s7421_s14 + $0x58] sm:$0xff]  ;;  %v6468_v29 = vld [vmem:[#allocation11 + $0x20] sm:$0xff]   ;;  %v558_v31 = vld [vmem:[%s7421_s14 + $0x68] sm:$0xff]  ;;  %s6950_s13 = sshll.u32 %s7042_s29, 4  ;;  %s6951_s13 = int_to_ptr.vmem [resolvable:$false] %s6950_s13 }
  0xfa   : > { %v557_v30 = vld [vmem:[%s7421_s14 + $0x60] sm:$0xff]  ;;  %v566_v32 = vpack.c.bf16 %v556_v28, %v555_v27  ;;  %v6469_v34 = vld [vmem:[#allocation11 + $0x28] sm:$0xff]   ;;  %v559_v35 = vld [vmem:[%s7421_s14 + $0x70] sm:$0xff]  ;;  %s6952_s24 = scalar_lea.vmem %s6951_s13, 4096  ;;  %p6953_p13 = scmp.lt.s32.totalorder %s8906_s27, %s6951_s13 }
  0xfb   : > { %5841 = vmatpush3.bf16.msra.mxu1 %v6458_v2  ;;  %v567_v33 = vpack.c.bf16 %v558_v31, %v557_v30  ;;  %v560_v36 = vld [vmem:[%s7421_s14 + $0x78] sm:$0xff]  ;;  %v6470_v37 = vld [vmem:[#allocation11 + $0x30] sm:$0xff]   ;;  %v569_v38 = vld [vmem:[%s7429_s26] sm:$0xff]  ;;  %s9076_s14 = sld [smem:[#allocation25_spill]]  ;;  %p6954_p7 = scmp.lt.s32.totalorder %s6952_s24, %s6946_s23 }
  0xfc   : > { %5842 = vmatprep.subr.bf16.mxu1 %v6459_v3  ;;  %v570_v39 = vld [vmem:[%s7429_s26 + $0x8] sm:$0xff]  ;;  %v568_v40 = vpack.c.bf16 %v560_v36, %v559_v35  ;;  %v6471_v42 = vld [vmem:[#allocation11 + $0x38] sm:$0xff]   ;;  %v571_v43 = vld [vmem:[%s7429_s26 + $0x10] sm:$0xff] }
  0xfd   : > { %v585_v41 = vpack.c.bf16 %v570_v39, %v569_v38  ;;  %v572_v44 = vld [vmem:[%s7429_s26 + $0x18] sm:$0xff]  ;;  %v573_v45 = vld [vmem:[%s7429_s26 + $0x20] sm:$0xff]  ;;  %v574_v46 = vld [vmem:[%s7429_s26 + $0x28] sm:$0xff]  ;;  %p6955_p9 = por %p6954_p7, %p6953_p13 }
  0xfe   : > { %v586_v47 = vpack.c.bf16 %v572_v44, %v571_v43  ;;  %v587_v48 = vpack.c.bf16 %v574_v46, %v573_v45  ;;  %v575_v49 = vld [vmem:[%s7429_s26 + $0x30] sm:$0xff]  ;;  %v576_v50 = vld [vmem:[%s7429_s26 + $0x38] sm:$0xff]  ;;  %v577_v51 = vld [vmem:[%s7429_s26 + $0x40] sm:$0xff] }
  0xff   : > { %5843 = vmatpush3.bf16.msra.mxu1 %v6459_v3  ;;  %v578_v52 = vld [vmem:[%s7429_s26 + $0x48] sm:$0xff]  ;;  %v588_v53 = vpack.c.bf16 %v576_v50, %v575_v49  ;;  %v579_v55 = vld [vmem:[%s7429_s26 + $0x50] sm:$0xff]  ;;  %v580_v56 = vld [vmem:[%s7429_s26 + $0x58] sm:$0xff] }
 0x100   : > { %5844 = vmatprep.subr.bf16.mxu1 %v6460_v7  ;;  %v589_v54 = vpack.c.bf16 %v578_v52, %v577_v51  ;;  %v581_v57 = vld [vmem:[%s7429_s26 + $0x60] sm:$0xff]  ;;  %v582_v58 = vld [vmem:[%s7429_s26 + $0x68] sm:$0xff]  ;;  %v590_v59 = vpack.c.bf16 %v580_v56, %v579_v55  ;;  %v583_v61 = vld [vmem:[%s7429_s26 + $0x70] sm:$0xff] }
 0x101   : > { %v591_v60 = vpack.c.bf16 %v582_v58, %v581_v57  ;;  %v584_v62 = vld [vmem:[%s7429_s26 + $0x78] sm:$0xff]  ;;  %v6472_v0 = vld [vmem:[#allocation12] sm:$0xff]   ;;  %v6473_v1 = vld [vmem:[#allocation12 + $0x8] sm:$0xff]   ;;  %s9077_s26 = sld [smem:[#allocation42_spill]]  ;;  %p9078_p2 = scmp.ne.s32.totalorder %s9076_s14, 0 }
 0x102   : > { %v592_v63 = vpack.c.bf16 %v584_v62, %v583_v61  ;;  %5900 = vmatprep.subr.bf16.mxu0 %v6472_v0  ;;  %v6474_v2 = vld [vmem:[#allocation12 + $0x10] sm:$0xff]   ;;  %v6475_v3 = vld [vmem:[#allocation12 + $0x18] sm:$0xff]   ;;  %v6476_v4 = vld [vmem:[#allocation12 + $0x20] sm:$0xff]  }
 0x103   : > { %5845 = vmatpush3.bf16.msra.mxu1 %v6460_v7  ;;  %5901 = vmatpush3.bf16.msra.mxu0 %v6472_v0  ;;  %v6477_v5 = vld [vmem:[#allocation12 + $0x28] sm:$0xff]   ;;  %v6478_v6 = vld [vmem:[#allocation12 + $0x30] sm:$0xff]   ;;  %v6479_v7 = vld [vmem:[#allocation12 + $0x38] sm:$0xff]   ;;  %p6948_p4 = pnand %p6947_p5, %p9078_p2 }
 0x104   : > { %5846 = vmatprep.subr.bf16.mxu1 %v6461_v8  ;;  %5902 = vmatprep.subr.bf16.mxu0 %v6473_v1  ;;  %v595_v11 = vld [vmem:[%s7436_s28 + $0x10] sm:$0xff]  ;;  %v596_v12 = vld [vmem:[%s7436_s28 + $0x18] sm:$0xff]  ;;  %v597_v14 = vld [vmem:[%s7436_s28 + $0x20] sm:$0xff] }
 0x105   : > { %v598_v15 = vld [vmem:[%s7436_s28 + $0x28] sm:$0xff]  ;;  %v605_v27 = vld [vmem:[%s7436_s28 + $0x60] sm:$0xff]  ;;  %v607_v30 = vld [vmem:[%s7436_s28 + $0x70] sm:$0xff]  ;;  %p6949_p11 = pneg %p6948_p4 }
 0x106   : > { %v602_v22 = vld [vmem:[%s7436_s28 + $0x48] sm:$0xff]  ;;  %v608_v31 = vld [vmem:[%s7436_s28 + $0x78] sm:$0xff] }
 0x107   : > { %5847 = vmatpush3.bf16.msra.mxu1 %v6461_v8  ;;  %5903 = vmatpush3.bf16.msra.mxu0 %v6473_v1  ;;  %v593_v8 = vld [vmem:[%s7436_s28] sm:$0xff]  ;;  %v606_v28 = vld [vmem:[%s7436_s28 + $0x68] sm:$0xff]  ;;  %p6956_p12 = pnand %p6955_p9, %p6949_p11 }
 0x108   : > { %5848 = vmatprep.subr.bf16.mxu1 %v6462_v9  ;;  %5904 = vmatprep.subr.bf16.mxu0 %v6474_v2 }
 0x10b   : > { %5849 = vmatpush3.bf16.msra.mxu1 %v6462_v9  ;;  %5905 = vmatpush3.bf16.msra.mxu0 %v6474_v2  ;;  %v594_v9 = vld [vmem:[%s7436_s28 + $0x8] sm:$0xff] }
 0x10c   : > { %5850 = vmatprep.subr.bf16.mxu1 %v6463_v10  ;;  %5906 = vmatprep.subr.bf16.mxu0 %v6475_v3 }
 0x10f   : > { %5851 = vmatpush3.bf16.msra.mxu1 %v6463_v10  ;;  %5907 = vmatpush3.bf16.msra.mxu0 %v6475_v3  ;;  %v609_v10 = vpack.c.bf16 %v594_v9, %v593_v8 }
 0x110   : > { %5868 = vmatprep.subr.bf16.mxu1 %v6464_v13  ;;  %5908 = vmatprep.subr.bf16.mxu0 %v6476_v4 }
 0x111   : > { %5916 = vmatprep.mubr.bf16.mxu0 %v609_v10 }
 0x112   : > { %5853 = vmatmul.mubr.bf16.vlgmr.msra.gmra.mrb[0].mxu1 %v562_v16  ;;  %v611_v16 = vpack.c.bf16 %v598_v15, %v597_v14 }
 0x113   : > { %5869 = vmatpush3.bf16.msra.mxu1 %v6464_v13  ;;  %5856 = vmatprep.mubr.bf16.mxu1 %v563_v18  ;;  %v610_v13 = vpack.c.bf16 %v596_v12, %v595_v11  ;;  %v600_v18 = vld [vmem:[%s7436_s28 + $0x38] sm:$0xff]  ;;  %v5544_v11 = vld [vmem:[%s9045_s15] ss:$0 sm:$0xff] }
 0x114   : > { %5870 = vmatprep.subr.bf16.mxu1 %v6465_v17  ;;  %5909 = vmatpush3.bf16.msra.mxu0 %v6476_v4 }
 0x115   : > { %5910 = vmatprep.subr.bf16.mxu0 %v6477_v5 }
 0x117   : > { %5871 = vmatpush3.bf16.msra.mxu1 %v6465_v17  ;;  %v599_v17 = vld [vmem:[%s7436_s28 + $0x30] sm:$0xff] }
 0x118   : > { %5872 = vmatprep.subr.bf16.mxu1 %v6466_v21  ;;  %5911 = vmatpush3.bf16.msra.mxu0 %v6477_v5  ;;  %v612_v19 = vpack.c.bf16 %v600_v18, %v599_v17 }
 0x119   : > { %5912 = vmatprep.subr.bf16.mxu0 %v6478_v6 }
 0x11a   : > { %5857 = vmatmul.mubr.bf16.gmra.mrb[4].mxu1 %v564_v24  ;;  %v603_v24 = vld [vmem:[%s7436_s28 + $0x50] sm:$0xff] }
 0x11b   : > { %5873 = vmatpush3.bf16.msra.mxu1 %v6466_v21  ;;  %5860 = vmatprep.mubr.bf16.mxu1 %v565_v25  ;;  %v601_v21 = vld [vmem:[%s7436_s28 + $0x40] sm:$0xff]  ;;  %v604_v25 = vld [vmem:[%s7436_s28 + $0x58] sm:$0xff]  ;;  %s8904_s28 = scalar_lea.hbm %s9077_s26, %s5643_s22 }
 0x11c   : > { %5874 = vmatprep.subr.bf16.mxu1 %v6467_v26  ;;  %5913 = vmatpush3.bf16.msra.mxu0 %v6478_v6  ;;  %v613_v23 = vpack.c.bf16 %v602_v22, %v601_v21 }
 0x11d   : > { %5914 = vmatprep.subr.bf16.mxu0 %v6479_v7 }
 0x11f   : > { %5875 = vmatpush3.bf16.msra.mxu1 %v6467_v26  ;;  %v614_v26 = vpack.c.bf16 %v604_v25, %v603_v24 }
 0x120   : > { %5876 = vmatprep.subr.bf16.mxu1 %v6468_v29  ;;  %5915 = vmatpush3.bf16.msra.mxu0 %v6479_v7 }
 0x121   : > { %5956 = vmatprep.subr.bf16.mxu0 %v8994_v20 }
 0x122   : > { %5861 = vmatmul.mubr.bf16.gmra.mrb[8].mxu1 %v566_v32  ;;  %v616_v32 = vpack.c.bf16 %v608_v31, %v607_v30 }
 0x123   : > { %5877 = vmatpush3.bf16.msra.mxu1 %v6468_v29  ;;  %5864 = vmatprep.mubr.bf16.mxu1 %v567_v33  ;;  %v615_v29 = vpack.c.bf16 %v606_v28, %v605_v27 }
 0x124   : > { %5878 = vmatprep.subr.bf16.mxu1 %v6469_v34  ;;  %5917 = vmatmul.mubr.bf16.vlgmr.msra.gmra.mrb[0].mxu0 %v610_v13 }
 0x125   : > { %5920 = vmatprep.mubr.bf16.mxu0 %v611_v16 }
 0x127   : > { %5879 = vmatpush3.bf16.msra.mxu1 %v6469_v34  ;;  %v5535_v34 = vld [vmem:[%s8957_s4] ss:$0 sm:$0xff] }
 0x128   : > { %5880 = vmatprep.subr.bf16.mxu1 %v6470_v37 }
 0x12a   : > { %5865 = vmatmul.mubr.bf16.gmra.mrb[12].mxu1 %v568_v40 }
 0x12b   : > { %5881 = vmatpush3.bf16.msra.mxu1 %v6470_v37  ;;  %5884 = vmatprep.mubr.bf16.mxu1 %v585_v41 }
 0x12c   : > { %5882 = vmatprep.subr.bf16.mxu1 %v6471_v42  ;;  %5921 = vmatmul.mubr.bf16.gmra.mrb[4].mxu0 %v612_v19 }
 0x12d   : > { %5924 = vmatprep.mubr.bf16.mxu0 %v613_v23 }
 0x12f   : > { %5883 = vmatpush3.bf16.msra.mxu1 %v6471_v42 }
 0x130   : > { %5932 = vmatprep.subr.bf16.mxu1 %v8994_v20 }
 0x132   : > { %5885 = vmatmul.mubr.bf16.vlgmr.msra.gmra.mrb[16].mxu1 %v586_v47 }
 0x133   : > { %5888 = vmatprep.mubr.bf16.mxu1 %v587_v48 }
 0x134   : > { %5925 = vmatmul.mubr.bf16.gmra.mrb[8].mxu0 %v614_v26 }
 0x135   : > { %5928 = vmatprep.mubr.bf16.mxu0 %v615_v29 }
 0x13a   : > { %5889 = vmatmul.mubr.bf16.gmra.mrb[20].mxu1 %v588_v53 }
 0x13b   : > { %5892 = vmatprep.mubr.bf16.mxu1 %v589_v54 }
 0x13c   : > { %5929 = vmatmul.mubr.bf16.gmra.mrb[12].mxu0 %v616_v32 }
 0x13d   : > { %5958 = vmatprep.mubr.msk.bf16.mxu0 %vm7038_vm0, %v8994_v20 }
 0x142   : > { %5893 = vmatmul.mubr.bf16.gmra.mrb[24].mxu1 %v590_v59 }
 0x143   : > { %5896 = vmatprep.mubr.bf16.mxu1 %v591_v60 }
 0x14a   : > { %5897 = vmatmul.mubr.bf16.gmra.mrb[28].mxu1 %v592_v63 }
 0x14b   : > { %5934 = vmatprep.mubr.msk.bf16.mxu1 %vm7038_vm0, %v8994_v20 }
 0x1e5   : > { %v5854_v33 = vpop.f32.mrb[0].mxu1 }
 0x1e6   : > { %v722_v35 = vpop.f32.mrb[1].mxu1  ;;  %v731_v37 = vadd.f32 %v5854_v33, %v5535_v34 }
 0x1e7   : > { %v5855_v36 = vpop.f32.mrb[2].mxu1  ;;  %v723_v40 = vadd.f32 %v5535_v34, %v722_v35 }
 0x1e8   : > { %v734_v38 = vadd.f32 %v5855_v36, %v5535_v34  ;;  %v725_v39 = vpop.f32.mrb[3].mxu1 }
 0x1e9   : > { %v726_v41 = vadd.f32 %v5535_v34, %v725_v39 }
 0x1ea   : > { %v7503_v42 = vpack.c.bf16 %v734_v38, %v731_v37 }
 0x1eb   : > { %v7505_v43 = vpack.c.bf16 %v726_v41, %v723_v40 }
 0x1ed   : > { %v5858_v44 = vpop.f32.mrb[4].mxu1 }
 0x1ee   : > { %v738_v45 = vpop.f32.mrb[5].mxu1  ;;  %v747_v47 = vadd.f32 %v5858_v44, %v5535_v34 }
 0x1ef   : > { %v5859_v46 = vpop.f32.mrb[6].mxu1  ;;  %v739_v50 = vadd.f32 %v5535_v34, %v738_v45 }
 0x1f0   : > { %v750_v48 = vadd.f32 %v5859_v46, %v5535_v34  ;;  %v741_v49 = vpop.f32.mrb[7].mxu1 }
 0x1f1   : > { %v742_v51 = vadd.f32 %v5535_v34, %v741_v49 }
 0x1f2   : > { %v7507_v52 = vpack.c.bf16 %v750_v48, %v747_v47 }
 0x1f3   : > { %v7509_v53 = vpack.c.bf16 %v742_v51, %v739_v50 }
 0x1f5   : > { %v5862_v54 = vpop.f32.mrb[8].mxu1 }
 0x1f6   : > { %v754_v55 = vpop.f32.mrb[9].mxu1  ;;  %v763_v57 = vadd.f32 %v5862_v54, %v5535_v34 }
 0x1f7   : > { %v5863_v56 = vpop.f32.mrb[10].mxu1  ;;  %v755_v60 = vadd.f32 %v5535_v34, %v754_v55 }
 0x1f8   : > { %v766_v58 = vadd.f32 %v5863_v56, %v5535_v34  ;;  %v757_v59 = vpop.f32.mrb[11].mxu1 }
 0x1f9   : > { %v758_v61 = vadd.f32 %v5535_v34, %v757_v59 }
 0x1fa   : > { %v7511_v62 = vpack.c.bf16 %v766_v58, %v763_v57 }
 0x1fb   : > { %v7513_v63 = vpack.c.bf16 %v758_v61, %v755_v60 }
 0x1fd   : > { %v5866_v0 = vpop.f32.mrb[12].mxu1 }
 0x1fe   : > { %v770_v1 = vpop.f32.mrb[13].mxu1  ;;  %v779_v3 = vadd.f32 %v5866_v0, %v5535_v34 }
 0x1ff   : > { %v5867_v2 = vpop.f32.mrb[14].mxu1  ;;  %v771_v6 = vadd.f32 %v5535_v34, %v770_v1 }
 0x200   : > { %v782_v4 = vadd.f32 %v5867_v2, %v5535_v34  ;;  %v773_v5 = vpop.f32.mrb[15].mxu1  ;;  %v5918_v2 = vpop.f32.mrb[0].mxu0 }
 0x201   : > { %v774_v7 = vadd.f32 %v5535_v34, %v773_v5 }
 0x202   : > { %v7515_v8 = vpack.c.bf16 %v782_v4, %v779_v3  ;;  %v5553_v3 = vld [vmem:[%s9046_s1] ss:$0 sm:$0xff]  ;;  %v1058_v4 = vpop.f32.mrb[1].mxu0 }
 0x203   : > { %v7517_v9 = vpack.c.bf16 %v774_v7, %v771_v6  ;;  %v1067_v5 = vadd.f32 %v5918_v2, %v5553_v3  ;;  %v5919_v6 = vpop.f32.mrb[2].mxu0 }
 0x204   : > { %v1061_v7 = vpop.f32.mrb[3].mxu0 }
 0x205   : > { %v5886_v10 = vpop.f32.mrb[16].mxu1 }
 0x206   : > { %v890_v12 = vpop.f32.mrb[17].mxu1  ;;  %v899_v14 = vadd.f32 %v5886_v10, %v5544_v11  ;;  %v1059_v10 = vadd.f32 %v5553_v3, %v1058_v4 }
 0x207   : > { %v5887_v13 = vpop.f32.mrb[18].mxu1  ;;  %v891_v17 = vadd.f32 %v5544_v11, %v890_v12  ;;  %v1062_v12 = vadd.f32 %v5553_v3, %v1061_v7 }
 0x208   : > { %v902_v15 = vadd.f32 %v5887_v13, %v5544_v11  ;;  %v893_v16 = vpop.f32.mrb[19].mxu1 }
 0x209   : > { %v894_v18 = vadd.f32 %v5544_v11, %v893_v16 }
 0x20a   : > { %v7522_v19 = vpack.c.bf16 %v902_v15, %v899_v14  ;;  %v7599_v14 = vpack.c.bf16 %v1062_v12, %v1059_v10  ;;  %v5922_v15 = vpop.f32.mrb[4].mxu0 }
 0x20b   : > { %v7524_v21 = vpack.c.bf16 %v894_v18, %v891_v17  ;;  %v1074_v16 = vpop.f32.mrb[5].mxu0  ;;  %v1083_v17 = vadd.f32 %v5922_v15, %v5553_v3 }
 0x20c   : > { %v1197_v34 = vsel %vm1145_vm1, %v7522_v19, 0  ;;  %v1075_v18 = vadd.f32 %v5553_v3, %v1074_v16 }
 0x20d   : > { %v1150_v22 = vsel %vm1145_vm1, %v7524_v21, 0  ;;  %v5890_v23 = vpop.f32.mrb[20].mxu1 }
 0x20e   : > { %5933 = vmatpush3.bf16.xpose.msra.mxu1 %v1150_v22  ;;  %v915_v24 = vadd.f32 %v5890_v23, %v5544_v11  ;;  %v906_v25 = vpop.f32.mrb[21].mxu1  ;;  %v5923_v22 = vpop.f32.mrb[6].mxu0 }
 0x20f   : > { %v907_v26 = vadd.f32 %v5544_v11, %v906_v25  ;;  %v5891_v27 = vpop.f32.mrb[22].mxu1  ;;  %5938 = vmatprep.subr.bf16.mxu1 %v8994_v20  ;;  %v1086_v23 = vadd.f32 %v5923_v22, %v5553_v3 }
 0x210   : > { %v918_v28 = vadd.f32 %v5891_v27, %v5544_v11  ;;  %v909_v29 = vpop.f32.mrb[23].mxu1 }
 0x211   : > { %v910_v30 = vadd.f32 %v5544_v11, %v909_v29 }
 0x212   : > { %v7529_v31 = vpack.c.bf16 %v918_v28, %v915_v24  ;;  %v1077_v24 = vpop.f32.mrb[7].mxu0 }
 0x213   : > { %v7531_v32 = vpack.c.bf16 %v910_v30, %v907_v26  ;;  %v1078_v25 = vadd.f32 %v5553_v3, %v1077_v24  ;;  %v7605_v26 = vpack.c.bf16 %v1086_v23, %v1083_v17  ;;  %v5926_v27 = vpop.f32.mrb[8].mxu0 }
 0x214   : > { %v1291_v60 = vsel %vm1145_vm1, %v7529_v31, 0  ;;  %v1099_v29 = vadd.f32 %v5926_v27, %v5553_v3  ;;  %v1090_v30 = vpop.f32.mrb[9].mxu0 }
 0x215   : > { %v5894_v33 = vpop.f32.mrb[24].mxu1  ;;  %5935 = vmatmul.mubr.msk.bf16.vlgmr.msra.gmra.mrb[32].mxu1 %vm1145_vm1, %v7505_v43  ;;  %v1244_v47 = vsel %vm1145_vm1, %v7531_v32, 0  ;;  %v7607_v28 = vpack.c.bf16 %v1078_v25, %v1075_v18 }
 0x216   : > { %v931_v35 = vadd.f32 %v5894_v33, %v5544_v11  ;;  %v922_v36 = vpop.f32.mrb[25].mxu1  ;;  %5939 = vmatpush3.bf16.xpose.msra.mxu1 %v1197_v34  ;;  %5940 = vmatprep.mubr.msk.bf16.mxu1 %vm7038_vm0, %v8994_v20  ;;  %v1091_v33 = vadd.f32 %v5553_v3, %v1090_v30  ;;  %v5927_v34 = vpop.f32.mrb[10].mxu0 }
 0x217   : > { %v923_v37 = vadd.f32 %v5544_v11, %v922_v36  ;;  %v5895_v38 = vpop.f32.mrb[26].mxu1  ;;  %5944 = vmatprep.subr.bf16.mxu1 %v8994_v20  ;;  %v1093_v36 = vpop.f32.mrb[11].mxu0 }
 0x218   : > { %v934_v39 = vadd.f32 %v5895_v38, %v5544_v11  ;;  %v925_v40 = vpop.f32.mrb[27].mxu1  ;;  %v5930_v38 = vpop.f32.mrb[12].mxu0 }
 0x219   : > { %v926_v41 = vadd.f32 %v5544_v11, %v925_v40  ;;  %v1115_v40 = vadd.f32 %v5930_v38, %v5553_v3 }
 0x21a   : > { %v7540_v44 = vpack.c.bf16 %v934_v39, %v931_v35  ;;  %v1102_v35 = vadd.f32 %v5927_v34, %v5553_v3 }
 0x21b   : > { %v7542_v45 = vpack.c.bf16 %v926_v41, %v923_v37  ;;  %v1094_v37 = vadd.f32 %v5553_v3, %v1093_v36  ;;  %v1106_v41 = vpop.f32.mrb[13].mxu0 }
 0x21c   : > { %v1385_v0 = vsel %vm1145_vm1, %v7540_v44, 0  ;;  %v7609_v39 = vpack.c.bf16 %v1102_v35, %v1099_v29 }
 0x21d   : > { %v5898_v46 = vpop.f32.mrb[28].mxu1  ;;  %5941 = vmatmul.mubr.msk.bf16.vlgmr.msra.gmra.mrb[36].mxu1 %vm1145_vm1, %v7503_v42  ;;  %v1338_v48 = vsel %vm1145_vm1, %v7542_v45, 0 }
 0x21e   : > { %v947_v49 = vadd.f32 %v5898_v46, %v5544_v11  ;;  %v938_v50 = vpop.f32.mrb[29].mxu1  ;;  %5945 = vmatpush3.bf16.xpose.msra.mxu1 %v1244_v47  ;;  %5957 = vmatpush3.bf16.xpose.msra.mxu0 %v1338_v48  ;;  %v7611_v46 = vpack.c.bf16 %v1094_v37, %v1091_v33  ;;  %v1107_v47 = vadd.f32 %v5553_v3, %v1106_v41  ;;  %v5931_v48 = vpop.f32.mrb[14].mxu0 }
 0x21f   : > { %v939_v51 = vadd.f32 %v5544_v11, %v938_v50  ;;  %v5899_v54 = vpop.f32.mrb[30].mxu1  ;;  %5946 = vmatprep.mubr.msk.bf16.mxu1 %vm7038_vm0, %v8994_v20  ;;  %5950 = vmatprep.subr.bf16.mxu1 %v8994_v20  ;;  %v1109_v50 = vpop.f32.mrb[15].mxu0 }
 0x220   : > { %v950_v55 = vadd.f32 %v5899_v54, %v5544_v11  ;;  %v941_v56 = vpop.f32.mrb[31].mxu1  ;;  %5968 = vmatprep.subr.bf16.mxu0 %v8994_v20 }
 0x221   : > { %v942_v57 = vadd.f32 %v5544_v11, %v941_v56  ;;  %v1070_v11 = vadd.f32 %v5919_v6, %v5553_v3 }
 0x222   : > { %v7554_v58 = vpack.c.bf16 %v950_v55, %v947_v49  ;;  %v1118_v49 = vadd.f32 %v5931_v48, %v5553_v3 }
 0x223   : > { %v7556_v59 = vpack.c.bf16 %v942_v57, %v939_v51  ;;  %v7597_v13 = vpack.c.bf16 %v1070_v11, %v1067_v5  ;;  %v1110_v51 = vadd.f32 %v5553_v3, %v1109_v50 }
 0x224   : > { %v1479_v1 = vsel %vm1145_vm1, %v7554_v58, 0  ;;  %v7613_v54 = vpack.c.bf16 %v1118_v49, %v1115_v40 }
 0x225   : > { %5947 = vmatmul.mubr.msk.bf16.vlgmr.msra.gmra.mrb[40].mxu1 %vm1145_vm1, %v7509_v53  ;;  %5959 = vmatmul.mubr.msk.bf16.vlgmr.msra.gmra.mrb[16].mxu0 %vm1145_vm1, %v7513_v63  ;;  %v1432_v61 = vsel %vm1145_vm1, %v7556_v59, 0  ;;  %v7615_v55 = vpack.c.bf16 %v1110_v51, %v1107_v47 }
 0x226   : > { %5951 = vmatpush3.bf16.xpose.msra.mxu1 %v1291_v60  ;;  %5969 = vmatpush3.bf16.xpose.msra.mxu0 %v1432_v61 }
 0x227   : > { %5952 = vmatprep.mubr.msk.bf16.mxu1 %vm7038_vm0, %v8994_v20  ;;  %5970 = vmatprep.mubr.msk.bf16.mxu0 %vm7038_vm0, %v8994_v20 }
 0x228   : > { %5962 = vmatprep.subr.bf16.mxu1 %v8994_v20  ;;  %5980 = vmatprep.subr.bf16.mxu0 %v8994_v20 }
 0x22d   : > { %5953 = vmatmul.mubr.msk.bf16.vlgmr.msra.gmra.mrb[44].mxu1 %vm1145_vm1, %v7507_v52  ;;  %5971 = vmatmul.mubr.msk.bf16.vlgmr.msra.gmra.mrb[20].mxu0 %vm1145_vm1, %v7517_v9 }
 0x22e   : > { %5963 = vmatpush3.bf16.xpose.msra.mxu1 %v1385_v0  ;;  %5964 = vmatprep.mubr.msk.bf16.mxu1 %vm7038_vm0, %v8994_v20 }
 0x22f   : > { %5974 = vmatprep.subr.bf16.mxu1 %v8994_v20  ;;  %5982 = vmatprep.mubr.msk.bf16.mxu0 %vm7038_vm0, %v8994_v20 }
 0x230   : > { %5981 = vmatpush3.bf16.msra.mxu0 %v7599_v14 }
 0x231   : > { %5992 = vmatprep.subr.bf16.mxu0 %v8994_v20 }
 0x235   : > { %5965 = vmatmul.mubr.msk.bf16.vlgmr.msra.gmra.mrb[48].mxu1 %vm1145_vm1, %v7511_v62 }
 0x236   : > { %5975 = vmatpush3.bf16.xpose.msra.mxu1 %v1479_v1  ;;  %5976 = vmatprep.mubr.msk.bf16.mxu1 %vm7038_vm0, %v8994_v20 }
 0x237   : > { %5986 = vmatprep.subr.bf16.mxu1 %v8994_v20 }
 0x23d   : > { %5977 = vmatmul.mubr.msk.bf16.vlgmr.msra.gmra.mrb[52].mxu1 %vm1145_vm1, %v7515_v8 }
 0x23e   : > { %5988 = vmatprep.mubr.msk.bf16.mxu1 %vm7038_vm0, %v8994_v20  ;;  %5987 = vmatpush3.bf16.msra.mxu1 %v7597_v13 }
 0x23f   : > { %5998 = vmatprep.subr.bf16.mxu1 %v8994_v20 }
 0x2e8   : > { %v7617_v56 = vpop.f32.mrb[32].mxu1 }
 0x2e9   : > { %v5936_v57 = vpop.f32.mrb[33].mxu1  ;;  %v1523_v60 = vsel %vm1522_vm2, %v7617_v56, -inf }
 0x2ea   : > { %1524 = vmax.xlane.f32.xlu0 %v1523_v60  ;;  %v7621_v61 = vpop.f32.mrb[34].mxu1 }
 0x2eb   : > { %v5937_v0 = vpop.f32.mrb[35].mxu1  ;;  %v1526_v1 = vsel %vm1522_vm2, %v7621_v61, -inf }
 0x2ee   : > { %1527 = vmax.xlane.f32.xlu0 %v1526_v1 }
 0x2f0   : > { %v7625_v2 = vpop.f32.mrb[36].mxu1 }
 0x2f1   : > { %v5942_v3 = vpop.f32.mrb[37].mxu1  ;;  %v1529_v4 = vsel %vm1522_vm2, %v7625_v2, -inf }
 0x2f2   : > { %1530 = vmax.xlane.f32.xlu1 %v1529_v4  ;;  %v7629_v5 = vpop.f32.mrb[38].mxu1 }
 0x2f3   : > { %v5943_v6 = vpop.f32.mrb[39].mxu1  ;;  %v1532_v7 = vsel %vm1522_vm2, %v7629_v5, -inf }
 0x2f6   : > { %1533 = vmax.xlane.f32.xlu1 %v1532_v7 }
 0x2f8   : > { %v7633_v10 = vpop.f32.mrb[40].mxu1  ;;  %v7635_v11 = vpop.f32.mrb[16].mxu0 }
 0x2f9   : > { %v5948_v12 = vpop.f32.mrb[41].mxu1  ;;  %v5960_v15 = vpop.f32.mrb[17].mxu0  ;;  %v1535_v16 = vsel %vm1522_vm2, %v7633_v10, -inf  ;;  %v1547_v40 = vsel %vm1522_vm2, %v7635_v11, -inf }
 0x2fa   : > { %v7639_v17 = vpop.f32.mrb[18].mxu0  ;;  %1536 = vmax.xlane.f32.xlu0 %v1535_v16  ;;  %v7641_v18 = vpop.f32.mrb[42].mxu1 }
 0x2fb   : > { %v5949_v22 = vpop.f32.mrb[43].mxu1  ;;  %v5961_v23 = vpop.f32.mrb[19].mxu0  ;;  %v1538_v24 = vsel %vm1522_vm2, %v7641_v18, -inf  ;;  %v1550_v41 = vsel %vm1522_vm2, %v7639_v17, -inf }
 0x2fc   : > { %1539 = vmax.xlane.f32.xlu1 %v1538_v24 }
 0x300   : > { %v7645_v25 = vpop.f32.mrb[44].mxu1  ;;  %v7647_v27 = vpop.f32.mrb[20].mxu0 }
 0x301   : > { %v5954_v29 = vpop.f32.mrb[45].mxu1  ;;  %v5972_v30 = vpop.f32.mrb[21].mxu0  ;;  %v1541_v33 = vsel %vm1522_vm2, %v7645_v25, -inf  ;;  %v1559_v60 = vsel %vm1522_vm2, %v7647_v27, -inf }
 0x302   : > { %v7651_v34 = vpop.f32.mrb[22].mxu0  ;;  %1542 = vmax.xlane.f32.xlu0 %v1541_v33  ;;  %v7653_v35 = vpop.f32.mrb[46].mxu1 }
 0x303   : > { %v5955_v36 = vpop.f32.mrb[47].mxu1  ;;  %v5973_v37 = vpop.f32.mrb[23].mxu0  ;;  %v1544_v38 = vsel %vm1522_vm2, %v7653_v35, -inf  ;;  %v1562_v0 = vsel %vm1522_vm2, %v7651_v34, -inf }
 0x304   : > { %1545 = vmax.xlane.f32.xlu1 %v1544_v38 }
 0x306   : > { %1548 = vmax.xlane.f32.xlu0 %v1547_v40 }
 0x308   : > { %1551 = vmax.xlane.f32.xlu1 %v1550_v41  ;;  %v7661_v47 = vpop.f32.mrb[48].mxu1 }
 0x309   : > { %v5966_v48 = vpop.f32.mrb[49].mxu1  ;;  %v1553_v49 = vsel %vm1522_vm2, %v7661_v47, -inf }
 0x30a   : > { %1554 = vmax.xlane.f32.xlu0 %v1553_v49  ;;  %v7665_v50 = vpop.f32.mrb[50].mxu1 }
 0x30b   : > { %v5967_v51 = vpop.f32.mrb[51].mxu1  ;;  %v1556_v57 = vsel %vm1522_vm2, %v7665_v50, -inf }
 0x30c   : > { %1557 = vmax.xlane.f32.xlu1 %v1556_v57 }
 0x30e   : > { %1560 = vmax.xlane.f32.xlu0 %v1559_v60 }
 0x310   : > { %1563 = vmax.xlane.f32.xlu1 %v1562_v0  ;;  %v7673_v1 = vpop.f32.mrb[52].mxu1 }
 0x311   : > { %v5978_v3 = vpop.f32.mrb[53].mxu1  ;;  %v1565_v4 = vsel %vm1522_vm2, %v7673_v1, -inf }
 0x312   : > { %1566 = vmax.xlane.f32.xlu0 %v1565_v4  ;;  %v7677_v6 = vpop.f32.mrb[54].mxu1 }
 0x313   : > { %v5979_v7 = vpop.f32.mrb[55].mxu1  ;;  %v1568_v12 = vsel %vm1522_vm2, %v7677_v6, -inf }
 0x314   : > { %1569 = vmax.xlane.f32.xlu1 %v1568_v12 }
 0x377   : > { %v1525_v15 = vpop.xlane.xlu0 %1524 }
 0x378   : > { %v1571_v16 = vsub.f32 %v7617_v56, %v1525_v15 }
 0x37a   : > { %v1587_v22 = vmul.f32 1.442695, %v1571_v16 }
 0x37b   : > { %v1528_v23 = vpop.xlane.xlu0 %1527 }
 0x37c   : > { %6488 = vpow2.f32 %v1587_v22  ;;  %v1572_v24 = vsub.f32 %v7621_v61, %v1528_v23 }
 0x37e   : > { %v1589_v29 = vmul.f32 1.442695, %v1572_v24 }
 0x37f   : > { %v1531_v30 = vpop.xlane.xlu1 %1530 }
 0x380   : > { %6490 = vpow2.f32 %v1589_v29  ;;  %v1573_v33 = vsub.f32 %v7625_v2, %v1531_v30 }
 0x382   : > { %v1591_v36 = vmul.f32 1.442695, %v1573_v33 }
 0x383   : > { %v1534_v37 = vpop.xlane.xlu1 %1533 }
 0x384   : > { %6492 = vpow2.f32 %v1591_v36  ;;  %v1574_v38 = vsub.f32 %v7629_v5, %v1534_v37 }
 0x386   : > { %v7685_v40 = vpop.eup %6488  ;;  %v1593_v41 = vmul.f32 1.442695, %v1574_v38 }
 0x387   : > { %v1537_v48 = vpop.xlane.xlu0 %1536  ;;  %v1619_v56 = vsel %vm1522_vm2, %v7685_v40, 0.0 }
 0x388   : > { %6494 = vpow2.f32 %v1593_v41  ;;  %v1575_v61 = vsub.f32 %v7633_v10, %v1537_v48  ;;  %1620 = vadd.xlane.f32.xlu0 %v1619_v56 }
 0x389   : > { %v1540_v49 = vpop.xlane.xlu1 %1539 }
 0x38a   : > { %v7690_v51 = vpop.eup %6490  ;;  %v1595_v2 = vmul.f32 1.442695, %v1575_v61  ;;  %v1576_v57 = vsub.f32 %v7641_v18, %v1540_v49 }
 0x38b   : > { %v1622_v5 = vsel %vm1522_vm2, %v7690_v51, 0.0 }
 0x38c   : > { %6496 = vpow2.f32 %v1595_v2  ;;  %v1597_v60 = vmul.f32 1.442695, %v1576_v57  ;;  %1623 = vadd.xlane.f32.xlu1 %v1622_v5 }
 0x38e   : > { %v7695_v0 = vpop.eup %6492  ;;  %6498 = vpow2.f32 %v1597_v60 }
 0x38f   : > { %v1543_v3 = vpop.xlane.xlu0 %1542  ;;  %v1625_v10 = vsel %vm1522_vm2, %v7695_v0, 0.0 }
 0x390   : > { %v1577_v4 = vsub.f32 %v7645_v25, %v1543_v3  ;;  %1626 = vadd.xlane.f32.xlu0 %v1625_v10 }
 0x391   : > { %v1546_v7 = vpop.xlane.xlu1 %1545 }
 0x392   : > { %v7700_v12 = vpop.eup %6494  ;;  %v1599_v18 = vmul.f32 1.442695, %v1577_v4  ;;  %v1578_v15 = vsub.f32 %v7653_v35, %v1546_v7 }
 0x393   : > { %v1549_v16 = vpop.xlane.xlu0 %1548  ;;  %v1628_v22 = vsel %vm1522_vm2, %v7700_v12, 0.0 }
 0x394   : > { %6500 = vpow2.f32 %v1599_v18  ;;  %v1579_v23 = vsub.f32 %v7635_v11, %v1549_v16  ;;  %1629 = vadd.xlane.f32.xlu1 %v1628_v22  ;;  %v1601_v33 = vmul.f32 1.442695, %v1578_v15 }
 0x395   : > { %v1552_v24 = vpop.xlane.xlu1 %1551 }
 0x396   : > { %v7706_v29 = vpop.eup %6496  ;;  %v1603_v30 = vmul.f32 1.442695, %v1579_v23  ;;  %v1580_v25 = vsub.f32 %v7639_v17, %v1552_v24 }
 0x397   : > { %v1555_v36 = vpop.xlane.xlu0 %1554  ;;  %v1631_v37 = vsel %vm1522_vm2, %v7706_v29, 0.0 }
 0x398   : > { %v7711_v35 = vpop.eup %6498  ;;  %6502 = vpow2.f32 %v1603_v30  ;;  %v1605_v38 = vmul.f32 1.442695, %v1580_v25  ;;  %v1581_v41 = vsub.f32 %v7661_v47, %v1555_v36  ;;  %1632 = vadd.xlane.f32.xlu0 %v1631_v37 }
 0x399   : > { %v1558_v11 = vpop.xlane.xlu1 %1557  ;;  %v1634_v48 = vsel %vm1522_vm2, %v7711_v35, 0.0 }
 0x39a   : > { %6504 = vpow2.f32 %v1605_v38  ;;  %v1607_v56 = vmul.f32 1.442695, %v1581_v41  ;;  %1635 = vadd.xlane.f32.xlu1 %v1634_v48  ;;  %v1582_v17 = vsub.f32 %v7665_v50, %v1558_v11 }
 0x39b   : > { %6506 = vpow2.f32 %v1601_v33  ;;  %v1561_v61 = vpop.xlane.xlu0 %1560 }
 0x39c   : > { %6508 = vpow2.f32 %v1607_v56  ;;  %v1583_v49 = vsub.f32 %v7647_v27, %v1561_v61  ;;  %v1609_v60 = vmul.f32 1.442695, %v1582_v17 }
 0x39d   : > { %v1564_v2 = vpop.xlane.xlu1 %1563 }
 0x39e   : > { %v7718_v57 = vpop.eup %6500  ;;  %v1611_v5 = vmul.f32 1.442695, %v1583_v49  ;;  %v1584_v47 = vsub.f32 %v7651_v34, %v1564_v2 }
 0x39f   : > { %v1567_v3 = vpop.xlane.xlu0 %1566  ;;  %v1637_v10 = vsel %vm1522_vm2, %v7718_v57, 0.0 }
 0x3a0   : > { %6510 = vpow2.f32 %v1611_v5  ;;  %v1613_v4 = vmul.f32 1.442695, %v1584_v47  ;;  %v1585_v7 = vsub.f32 %v7673_v1, %v1567_v3  ;;  %1638 = vadd.xlane.f32.xlu0 %v1637_v10 }
 0x3a1   : > { %v1570_v11 = vpop.xlane.xlu1 %1569 }
 0x3a2   : > { %v7724_v50 = vpop.eup %6502  ;;  %6512 = vpow2.f32 %v1613_v4  ;;  %v1615_v27 = vmul.f32 1.442695, %v1585_v7  ;;  %v1586_v48 = vsub.f32 %v7677_v6, %v1570_v11 }
 0x3a3   : > { %6514 = vpow2.f32 %v1609_v60  ;;  %v1643_v18 = vsel %vm1522_vm2, %v7724_v50, 0.0 }
 0x3a4   : > { %v7728_v15 = vpop.eup %6504  ;;  %6516 = vpow2.f32 %v1615_v27  ;;  %1644 = vadd.xlane.f32.xlu0 %v1643_v18  ;;  %v1617_v56 = vmul.f32 1.442695, %v1586_v48 }
 0x3a5   : > { %v7730_v34 = vpop.eup %6506  ;;  %v1646_v16 = vsel %vm1522_vm2, %v7728_v15, 0.0 }
 0x3a6   : > { %v7734_v22 = vpop.eup %6508  ;;  %1647 = vadd.xlane.f32.xlu1 %v1646_v16  ;;  %v1640_v23 = vsel %vm1522_vm2, %v7730_v34, 0.0  ;;  %6518 = vpow2.f32 %v1617_v56 }
 0x3a7   : > { %v1649_v1 = vsel %vm1522_vm2, %v7734_v22, 0.0 }
 0x3a8   : > { %1650 = vadd.xlane.f32.xlu0 %v1649_v1 }
 0x3aa   : > { %v7740_v24 = vpop.eup %6510  ;;  %1641 = vadd.xlane.f32.xlu1 %v1640_v23 }
 0x3ab   : > { %v1655_v30 = vsel %vm1522_vm2, %v7740_v24, 0.0 }
 0x3ac   : > { %v7744_v25 = vpop.eup %6512  ;;  %1656 = vadd.xlane.f32.xlu0 %v1655_v30 }
 0x3ad   : > { %v7746_v33 = vpop.eup %6514  ;;  %v1658_v36 = vsel %vm1522_vm2, %v7744_v25, 0.0 }
 0x3ae   : > { %v7750_v37 = vpop.eup %6516  ;;  %1659 = vadd.xlane.f32.xlu1 %v1658_v36  ;;  %v1652_v41 = vsel %vm1522_vm2, %v7746_v33, 0.0 }
 0x3af   : > { %v1661_v38 = vsel %vm1522_vm2, %v7750_v37, 0.0 }
 0x3b0   : > { %1662 = vadd.xlane.f32.xlu0 %v1661_v38  ;;  %v7775_v17 = vpop.eup %6518 }
 0x3b1   : > { %v1664_v61 = vsel %vm1522_vm2, %v7775_v17, 0.0 }
 0x3b2   : > { %1653 = vadd.xlane.f32.xlu1 %v1652_v41 }
 0x3c3   : > { %2132 = vrot.lane.b32.xlu1 %v7522_v19, %s7039_s16 }
 0x3c6   : > { %2079 = vrot.lane.b32.xlu0 %v7524_v21, %s7039_s16 }
 0x3c7   : > { %2076 = vrot.lane.b32.xlu1 %v7505_v43, %s7039_s16 }
 0x3ca   : > { %2129 = vrot.lane.b32.xlu0 %v7503_v42, %s7039_s16 }
 0x3ce   : > { %2182 = vrot.lane.b32.xlu0 %v7509_v53, %s7039_s16 }
 0x3d2   : > { %2235 = vrot.lane.b32.xlu0 %v7507_v52, %s7039_s16 }
 0x3d6   : > { %2288 = vrot.lane.b32.xlu0 %v7513_v63, %s7039_s16 }
 0x3da   : > { %2341 = vrot.lane.b32.xlu0 %v7511_v62, %s7039_s16 }
 0x3de   : > { %2394 = vrot.lane.b32.xlu0 %v7517_v9, %s7039_s16 }
 0x3eb   : > { %1665 = vadd.xlane.f32.xlu1 %v1664_v61 }
 0x3fc   : > { %2185 = vrot.lane.b32.xlu1 %v7531_v32, %s7039_s16 }
 0x400   : > { %2238 = vrot.lane.b32.xlu1 %v7529_v31, %s7039_s16 }
 0x404   : > { %2291 = vrot.lane.b32.xlu1 %v7542_v45, %s7039_s16 }
 0x408   : > { %2344 = vrot.lane.b32.xlu1 %v7540_v44, %s7039_s16 }
 0x40c   : > { %2397 = vrot.lane.b32.xlu1 %v7556_v59, %s7039_s16 }
 0x410   : > { %2450 = vrot.lane.b32.xlu1 %v7554_v58, %s7039_s16 }
 0x414   : > { %2447 = vrot.lane.b32.xlu1 %v7515_v8, %s7039_s16 }
 0x415   : > { %v1621_v6 = vpop.xlane.xlu0 %1620 }
 0x416   : > { %6520 = vrcp.f32 %v1621_v6 }
 0x419   : > { %v1624_v49 = vpop.xlane.xlu1 %1623 }
 0x41a   : > { %6522 = vrcp.f32 %v1624_v49 }
 0x41d   : > { %v1627_v2 = vpop.xlane.xlu0 %1626 }
 0x41e   : > { %6524 = vrcp.f32 %v1627_v2 }
 0x420   : > { %v6521_v47 = vpop.eup %6520 }
 0x421   : > { %v1630_v5 = vpop.xlane.xlu1 %1629  ;;  %v1683_v3 = vmul.f32 %v6521_v47, %v7685_v40 }
 0x422   : > { %6526 = vrcp.f32 %v1630_v5 }
 0x424   : > { %v6523_v60 = vpop.eup %6522 }
 0x425   : > { %v1684_v10 = vmul.f32 %v6523_v60, %v7690_v51  ;;  %v1633_v4 = vpop.xlane.xlu0 %1632 }
 0x426   : > { %6528 = vrcp.f32 %v1633_v4 }
 0x427   : > { %v1636_v7 = vpop.xlane.xlu1 %1635  ;;  %v1699_v27 = vpack.c.bf16 %v1684_v10, %v1683_v3 }
 0x428   : > { %6530 = vrcp.f32 %v1636_v7  ;;  %v6525_v18 = vpop.eup %6524 }
 0x429   : > { %5983 = vmatmul.mubr.msk.bf16.vlgmr.msra.gmra.mrb[24].mxu0 %vm1522_vm2, %v1699_v27  ;;  %v1685_v40 = vmul.f32 %v6525_v18, %v7695_v0 }
 0x42a   : > { %5993 = vmatpush3.bf16.msra.mxu0 %v7607_v28  ;;  %5994 = vmatprep.mubr.msk.bf16.mxu0 %vm7038_vm0, %v8994_v20 }
 0x42b   : > { %6004 = vmatprep.subr.bf16.mxu0 %v8994_v20 }
 0x42c   : > { %v6527_v16 = vpop.eup %6526 }
 0x42d   : > { %v1686_v51 = vmul.f32 %v6527_v16, %v7700_v12  ;;  %v1639_v1 = vpop.xlane.xlu0 %1638 }
 0x42f   : > { %v1700_v23 = vpack.c.bf16 %v1686_v51, %v1685_v40 }
 0x430   : > { %v6529_v30 = vpop.eup %6528 }
 0x431   : > { %v1645_v36 = vpop.xlane.xlu0 %1644  ;;  %5989 = vmatmul.mubr.msk.bf16.vlgmr.msra.gmra.mrb[56].mxu1 %vm1522_vm2, %v1700_v23  ;;  %v1687_v41 = vmul.f32 %v6529_v30, %v7706_v29 }
 0x432   : > { %v6531_v38 = vpop.eup %6530  ;;  %6532 = vrcp.f32 %v1645_v36  ;;  %5999 = vmatpush3.bf16.msra.mxu1 %v7605_v26  ;;  %6000 = vmatprep.mubr.msk.bf16.mxu1 %vm7038_vm0, %v8994_v20 }
 0x433   : > { %v1688_v11 = vmul.f32 %v6531_v38, %v7711_v35  ;;  %v1648_v0 = vpop.xlane.xlu1 %1647  ;;  %6010 = vmatprep.subr.bf16.mxu1 %v8994_v20 }
 0x434   : > { %6534 = vrcp.f32 %v1648_v0 }
 0x435   : > { %v1651_v12 = vpop.xlane.xlu0 %1650  ;;  %v1701_v48 = vpack.c.bf16 %v1688_v11, %v1687_v41  ;;  %6536 = vrcp.f32 %v1639_v1 }
 0x437   : > { %5995 = vmatmul.mubr.msk.bf16.vlgmr.msra.gmra.mrb[28].mxu0 %vm1522_vm2, %v1701_v48  ;;  %v1642_v56 = vpop.xlane.xlu1 %1641 }
 0x438   : > { %6005 = vmatpush3.bf16.msra.mxu0 %v7611_v46  ;;  %6538 = vrcp.f32 %v1642_v56  ;;  %6006 = vmatprep.mubr.msk.bf16.mxu0 %vm7038_vm0, %v8994_v20 }
 0x439   : > { %v1657_v61 = vpop.xlane.xlu0 %1656  ;;  %6016 = vmatprep.subr.bf16.mxu0 %v8994_v20 }
 0x43a   : > { %6540 = vrcp.f32 %v1657_v61 }
 0x43b   : > { %v1660_v29 = vpop.xlane.xlu1 %1659 }
 0x43c   : > { %v6533_v35 = vpop.eup %6532  ;;  %6542 = vrcp.f32 %v1660_v29 }
 0x43d   : > { %6544 = vrcp.f32 %v1651_v12  ;;  %v1691_v49 = vmul.f32 %v6533_v35, %v7724_v50  ;;  %v1663_v7 = vpop.xlane.xlu0 %1662 }
 0x43e   : > { %v6535_v6 = vpop.eup %6534 }
 0x43f   : > { %v1692_v2 = vmul.f32 %v6535_v6, %v7728_v15  ;;  %v1654_v5 = vpop.xlane.xlu1 %1653  ;;  %v6537_v47 = vpop.eup %6536 }
 0x440   : > { %6546 = vrcp.f32 %v1654_v5  ;;  %v1689_v10 = vmul.f32 %v6537_v47, %v7718_v57 }
 0x441   : > { %v1703_v60 = vpack.c.bf16 %v1692_v2, %v1691_v49  ;;  %6548 = vrcp.f32 %v1663_v7 }
 0x442   : > { %v6539_v3 = vpop.eup %6538 }
 0x443   : > { %v1690_v4 = vmul.f32 %v6539_v3, %v7730_v34  ;;  %6007 = vmatmul.mubr.msk.bf16.vlgmr.msra.gmra.mrb[32].mxu0 %vm1522_vm2, %v1703_v60  ;;  %v2080_v34 = vpop.permute.xlu0 %2079 }
 0x444   : > { %v6541_v27 = vpop.eup %6540  ;;  %6017 = vmatpush3.bf16.msra.mxu0 %v7615_v55  ;;  %6018 = vmatprep.mubr.msk.bf16.mxu0 %vm7038_vm0, %v8994_v20 }
 0x445   : > { %v1702_v50 = vpack.c.bf16 %v1690_v4, %v1689_v10  ;;  %6028 = vmatprep.subr.bf16.mxu0 %v8994_v20  ;;  %v1695_v18 = vmul.f32 %v6541_v27, %v7740_v24  ;;  %v2085_v24 = vsel %vm1145_vm1, %v2080_v34, 0 }
 0x446   : > { %v6543_v15 = vpop.eup %6542 }
 0x447   : > { %v1696_v16 = vmul.f32 %v6543_v15, %v7744_v25  ;;  %6001 = vmatmul.mubr.msk.bf16.vlgmr.msra.gmra.mrb[60].mxu1 %vm1522_vm2, %v1702_v50  ;;  %v6545_v57 = vpop.eup %6544  ;;  %v2133_v25 = vpop.permute.xlu1 %2132 }
 0x448   : > { %6011 = vmatpush3.bf16.msra.mxu1 %v7609_v39  ;;  %6012 = vmatprep.mubr.msk.bf16.mxu1 %vm7038_vm0, %v8994_v20  ;;  %v1693_v1 = vmul.f32 %v6545_v57, %v7734_v22  ;;  %v2138_v2 = vsel %vm1145_vm1, %v2133_v25, 0 }
 0x449   : > { %v1705_v40 = vpack.c.bf16 %v1696_v16, %v1695_v18  ;;  %6022 = vmatprep.subr.bf16.mxu1 %v8994_v20 }
 0x44a   : > { %v6547_v51 = vpop.eup %6546 }
 0x44b   : > { %v1694_v23 = vmul.f32 %v6547_v51, %v7746_v33  ;;  %6019 = vmatmul.mubr.msk.bf16.vlgmr.msra.gmra.mrb[36].mxu0 %vm1522_vm2, %v1705_v40  ;;  %v2077_v22 = vpop.permute.xlu1 %2076  ;;  %v2130_v33 = vpop.permute.xlu0 %2129 }
 0x44c   : > { %6030 = vmatprep.mubr.msk.bf16.mxu0 %vm7038_vm0, %v8994_v20  ;;  %v6549_v12 = vpop.eup %6548 }
 0x44d   : > { %6029 = vmatpush3.bf16.xpose.msra.mxu0 %v2085_v24  ;;  %v1704_v30 = vpack.c.bf16 %v1694_v23, %v1693_v1  ;;  %v1697_v61 = vmul.f32 %v6549_v12, %v7750_v37 }
 0x44e   : > { %6040 = vmatprep.subr.bf16.mxu0 %v8994_v20 }
 0x44f   : > { %6013 = vmatmul.mubr.msk.bf16.vlgmr.msra.gmra.mrb[64].mxu1 %vm1522_vm2, %v1704_v30  ;;  %v2183_v38 = vpop.permute.xlu0 %2182 }
 0x450   : > { %6023 = vmatpush3.bf16.msra.mxu1 %v7613_v54  ;;  %6024 = vmatprep.mubr.msk.bf16.mxu1 %vm7038_vm0, %v8994_v20 }
 0x451   : > { %6034 = vmatprep.subr.bf16.mxu1 %v8994_v20 }
 0x453   : > { %v2236_v48 = vpop.permute.xlu0 %2235 }
 0x454   : > { %6031 = vmatmul.mubr.msk.bf16.vlgmr.msra.gmra.mrb[40].mxu0 %vm1145_vm1, %v2077_v22 }
 0x455   : > { %6042 = vmatprep.mubr.msk.bf16.mxu0 %vm7038_vm0, %v8994_v20 }
 0x457   : > { %v2289_v5 = vpop.permute.xlu0 %2288 }
 0x45b   : > { %v2342_v60 = vpop.permute.xlu0 %2341 }
 0x45f   : > { %v2395_v10 = vpop.permute.xlu0 %2394 }
 0x478   : > { %v1666_v36 = vpop.xlane.xlu1 %1665 }
 0x479   : > { %6550 = vrcp.f32 %v1666_v36 }
 0x47c   : > { %v2186_v41 = vpop.permute.xlu1 %2185 }
 0x47d   : > { %v2191_v11 = vsel %vm1145_vm1, %v2186_v41, 0 }
 0x47e   : > { %6041 = vmatpush3.bf16.xpose.msra.mxu0 %v2191_v11 }
 0x47f   : > { %6052 = vmatprep.subr.bf16.mxu0 %v8994_v20 }
 0x480   : > { %v2239_v0 = vpop.permute.xlu1 %2238 }
 0x481   : > { %v2244_v3 = vsel %vm1145_vm1, %v2239_v0, 0 }
 0x483   : > { %v6551_v56 = vpop.eup %6550 }
 0x484   : > { %v1698_v29 = vmul.f32 %v6551_v56, %v7775_v17  ;;  %v2292_v35 = vpop.permute.xlu1 %2291 }
 0x485   : > { %v2297_v6 = vsel %vm1145_vm1, %v2292_v35, 0  ;;  %6043 = vmatmul.mubr.msk.bf16.vlgmr.msra.gmra.mrb[44].mxu0 %vm1145_vm1, %v2183_v38 }
 0x486   : > { %6053 = vmatpush3.bf16.xpose.msra.mxu0 %v2297_v6  ;;  %v1706_v49 = vpack.c.bf16 %v1698_v29, %v1697_v61  ;;  %6054 = vmatprep.mubr.msk.bf16.mxu0 %vm7038_vm0, %v8994_v20 }
 0x487   : > { %6064 = vmatprep.subr.bf16.mxu0 %v8994_v20 }
 0x488   : > { %6025 = vmatmul.mubr.msk.bf16.vlgmr.msra.gmra.mrb[68].mxu1 %vm1522_vm2, %v1706_v49  ;;  %v2345_v37 = vpop.permute.xlu1 %2344 }
 0x489   : > { %6035 = vmatpush3.bf16.xpose.msra.mxu1 %v2138_v2  ;;  %6036 = vmatprep.mubr.msk.bf16.mxu1 %vm7038_vm0, %v8994_v20  ;;  %v2350_v4 = vsel %vm1145_vm1, %v2345_v37, 0 }
 0x48a   : > { %6046 = vmatprep.subr.bf16.mxu1 %v8994_v20 }
 0x48c   : > { %v2398_v17 = vpop.permute.xlu1 %2397 }
 0x48d   : > { %v2403_v47 = vsel %vm1145_vm1, %v2398_v17, 0  ;;  %6055 = vmatmul.mubr.msk.bf16.vlgmr.msra.gmra.mrb[48].mxu0 %vm1145_vm1, %v2289_v5 }
 0x48e   : > { %6065 = vmatpush3.bf16.xpose.msra.mxu0 %v2403_v47  ;;  %6066 = vmatprep.mubr.msk.bf16.mxu0 %vm7038_vm0, %v8994_v20 }
 0x48f   : > { %6076 = vmatprep.subr.bf16.mxu0 %v8994_v20 }
 0x490   : > { %6037 = vmatmul.mubr.msk.bf16.vlgmr.msra.gmra.mrb[72].mxu1 %vm1145_vm1, %v2130_v33  ;;  %v2451_v7 = vpop.permute.xlu1 %2450 }
 0x491   : > { %6047 = vmatpush3.bf16.xpose.msra.mxu1 %v2244_v3  ;;  %6048 = vmatprep.mubr.msk.bf16.mxu1 %vm7038_vm0, %v8994_v20  ;;  %v2456_v27 = vsel %vm1145_vm1, %v2451_v7, 0 }
 0x492   : > { %6058 = vmatprep.subr.bf16.mxu1 %v8994_v20 }
 0x494   : > { %v2448_v50 = vpop.permute.xlu1 %2447 }
 0x495   : > { %6067 = vmatmul.mubr.msk.bf16.vlgmr.msra.gmra.mrb[52].mxu0 %vm1145_vm1, %v2395_v10 }
 0x496   : > { %6078 = vmatprep.mubr.msk.bf16.mxu0 %vm7038_vm0, %v8994_v20 }
 0x498   : > { %6049 = vmatmul.mubr.msk.bf16.vlgmr.msra.gmra.mrb[76].mxu1 %vm1145_vm1, %v2236_v48 }
 0x499   : > { %6059 = vmatpush3.bf16.xpose.msra.mxu1 %v2350_v4  ;;  %6060 = vmatprep.mubr.msk.bf16.mxu1 %vm7038_vm0, %v8994_v20 }
 0x49a   : > { %6070 = vmatprep.subr.bf16.mxu1 %v8994_v20 }
 0x4a0   : > { %6061 = vmatmul.mubr.msk.bf16.vlgmr.msra.gmra.mrb[80].mxu1 %vm1145_vm1, %v2342_v60 }
 0x4a1   : > { %6071 = vmatpush3.bf16.xpose.msra.mxu1 %v2456_v27  ;;  %6072 = vmatprep.mubr.msk.bf16.mxu1 %vm7038_vm0, %v8994_v20 }
 0x4a2   : > { %6082 = vmatprep.subr.bf16.mxu1 %v8994_v20 }
 0x4a8   : > { %6073 = vmatmul.mubr.msk.bf16.vlgmr.msra.gmra.mrb[84].mxu1 %vm1145_vm1, %v2448_v50 }
 0x4a9   : > { %6084 = vmatprep.mubr.msk.bf16.mxu1 %vm7038_vm0, %v8994_v20 }
 0x4fc   : > { %v1744_v15 = vpop.f32.mrb[24].mxu0 }
 0x4fd   : > { %v5984_v18 = vpop.f32.mrb[25].mxu0 }
 0x4fe   : > { %v1747_v16 = vpop.f32.mrb[26].mxu0 }
 0x4ff   : > { %v2059_v57 = vpack.c.bf16 %v1747_v16, %v1744_v15  ;;  %v5985_v34 = vpop.f32.mrb[27].mxu0 }
 0x501   : > { %2067 = vst.msk [vmem:[#allocation2] sm:$0xff] %vm1145_vm1, %v2059_v57 }
 0x504   : > { %v1788_v40 = vpop.f32.mrb[56].mxu1 }
 0x505   : > { %v5990_v51 = vpop.f32.mrb[57].mxu1 }
 0x506   : > { %v1791_v1 = vpop.f32.mrb[58].mxu1 }
 0x507   : > { %v2060_v23 = vpack.c.bf16 %v1791_v1, %v1788_v40  ;;  %v5991_v24 = vpop.f32.mrb[59].mxu1 }
 0x509   : > { %2068 = vst.msk [vmem:[#allocation2 + $0x8] sm:$0xff] %vm1145_vm1, %v2060_v23 }
 0x50a   : > { %v1832_v25 = vpop.f32.mrb[28].mxu0 }
 0x50b   : > { %v5996_v30 = vpop.f32.mrb[29].mxu0 }
 0x50c   : > { %v1835_v22 = vpop.f32.mrb[30].mxu0 }
 0x50d   : > { %v2061_v33 = vpack.c.bf16 %v1835_v22, %v1832_v25  ;;  %v5997_v36 = vpop.f32.mrb[31].mxu0 }
 0x50f   : > { %2069 = vst.msk [vmem:[#allocation2 + $0x10] sm:$0xff] %vm1145_vm1, %v2061_v33 }
 0x516   : > { %v1920_v38 = vpop.f32.mrb[32].mxu0 }
 0x517   : > { %v6008_v41 = vpop.f32.mrb[33].mxu0 }
 0x518   : > { %v1923_v11 = vpop.f32.mrb[34].mxu0 }
 0x519   : > { %v2063_v0 = vpack.c.bf16 %v1923_v11, %v1920_v38  ;;  %v6009_v12 = vpop.f32.mrb[35].mxu0 }
 0x51a   : > { %v1876_v48 = vpop.f32.mrb[60].mxu1 }
 0x51b   : > { %2071 = vst.msk [vmem:[#allocation2 + $0x20] sm:$0xff] %vm1145_vm1, %v2063_v0  ;;  %v6002_v56 = vpop.f32.mrb[61].mxu1 }
 0x51c   : > { %v1879_v61 = vpop.f32.mrb[62].mxu1 }
 0x51d   : > { %v2062_v29 = vpack.c.bf16 %v1879_v61, %v1876_v48  ;;  %v6003_v35 = vpop.f32.mrb[63].mxu1 }
 0x51e   : > { %v2008_v6 = vpop.f32.mrb[36].mxu0 }
 0x51f   : > { %2070 = vst.msk [vmem:[#allocation2 + $0x18] sm:$0xff] %vm1145_vm1, %v2062_v29  ;;  %v6020_v49 = vpop.f32.mrb[37].mxu0 }
 0x520   : > { %v2011_v2 = vpop.f32.mrb[38].mxu0 }
 0x521   : > { %v2065_v5 = vpack.c.bf16 %v2011_v2, %v2008_v6  ;;  %v6021_v37 = vpop.f32.mrb[39].mxu0 }
 0x522   : > { %v1964_v17 = vpop.f32.mrb[64].mxu1 }
 0x523   : > { %2073 = vst.msk [vmem:[#allocation2 + $0x30] sm:$0xff] %vm1145_vm1, %v2065_v5  ;;  %v6014_v47 = vpop.f32.mrb[65].mxu1 }
 0x524   : > { %v1967_v60 = vpop.f32.mrb[66].mxu1 }
 0x525   : > { %v2064_v3 = vpack.c.bf16 %v1967_v60, %v1964_v17  ;;  %v6015_v10 = vpop.f32.mrb[67].mxu1 }
 0x527   : > { %2072 = vst.msk [vmem:[#allocation2 + $0x28] sm:$0xff] %vm1145_vm1, %v2064_v3  ;;  %v7892_v4 = vpop.f32.mrb[40].mxu0 }
 0x528   : > { %v6032_v7 = vpop.f32.mrb[41].mxu0  ;;  %v2499_v27 = vsel %vm1522_vm2, %v7892_v4, -inf }
 0x529   : > { %2500 = vmax.xlane.f32.xlu0 %v2499_v27  ;;  %v7896_v50 = vpop.f32.mrb[42].mxu0 }
 0x52a   : > { %v6033_v15 = vpop.f32.mrb[43].mxu0  ;;  %v2502_v18 = vsel %vm1522_vm2, %v7896_v50, -inf }
 0x52b   : > { %2503 = vmax.xlane.f32.xlu1 %v2502_v18 }
 0x53c   : > { %2732 = vrot.lane.b32.xlu1 %v7597_v13, %s7039_s16 }
 0x540   : > { %2780 = vrot.lane.b32.xlu1 %v7607_v28, %s7039_s16 }
 0x544   : > { %2828 = vrot.lane.b32.xlu1 %v7605_v26, %s7039_s16 }
 0x558   : > { %v7906_v16 = vpop.f32.mrb[44].mxu0 }
 0x559   : > { %v6044_v57 = vpop.f32.mrb[45].mxu0  ;;  %v2511_v61 = vsel %vm1522_vm2, %v7906_v16, -inf }
 0x55a   : > { %v7908_v34 = vpop.f32.mrb[46].mxu0 }
 0x55b   : > { %v2052_v40 = vpop.f32.mrb[68].mxu1  ;;  %v6045_v51 = vpop.f32.mrb[47].mxu0  ;;  %v2514_v48 = vsel %vm1522_vm2, %v7908_v34, -inf }
 0x55c   : > { %v6026_v1 = vpop.f32.mrb[69].mxu1 }
 0x55d   : > { %v2055_v23 = vpop.f32.mrb[70].mxu1 }
 0x55e   : > { %v2066_v24 = vpack.c.bf16 %v2055_v23, %v2052_v40  ;;  %v6027_v25 = vpop.f32.mrb[71].mxu1 }
 0x560   : > { %2074 = vst.msk [vmem:[#allocation2 + $0x38] sm:$0xff] %vm1145_vm1, %v2066_v24  ;;  %v7911_v30 = vpop.f32.mrb[48].mxu0 }
 0x561   : > { %v6056_v22 = vpop.f32.mrb[49].mxu0  ;;  %v2523_v24 = vsel %vm1522_vm2, %v7911_v30, -inf }
 0x562   : > { %v7913_v33 = vpop.f32.mrb[50].mxu0 }
 0x563   : > { %v7915_v36 = vpop.f32.mrb[72].mxu1  ;;  %v6057_v38 = vpop.f32.mrb[51].mxu0  ;;  %v2526_v60 = vsel %vm1522_vm2, %v7913_v33, -inf }
 0x564   : > { %v6038_v41 = vpop.f32.mrb[73].mxu1  ;;  %v2505_v11 = vsel %vm1522_vm2, %v7915_v36, -inf }
 0x565   : > { %2506 = vmax.xlane.f32.xlu0 %v2505_v11  ;;  %v7919_v0 = vpop.f32.mrb[74].mxu1 }
 0x566   : > { %v6039_v12 = vpop.f32.mrb[75].mxu1  ;;  %v2508_v5 = vsel %vm1522_vm2, %v7919_v0, -inf }
 0x568   : > { %2515 = vmax.xlane.f32.xlu1 %v2514_v48  ;;  %v7923_v56 = vpop.f32.mrb[52].mxu0 }
 0x569   : > { %v6068_v29 = vpop.f32.mrb[53].mxu0  ;;  %2512 = vmax.xlane.f32.xlu0 %v2511_v61  ;;  %v2535_v22 = vsel %vm1522_vm2, %v7923_v56, -inf }
 0x56a   : > { %v7927_v35 = vpop.f32.mrb[54].mxu0 }
 0x56b   : > { %v7929_v6 = vpop.f32.mrb[76].mxu1  ;;  %v6069_v49 = vpop.f32.mrb[55].mxu0  ;;  %v2538_v18 = vsel %vm1522_vm2, %v7927_v35, -inf }
 0x56c   : > { %v6050_v2 = vpop.f32.mrb[77].mxu1  ;;  %v2517_v23 = vsel %vm1522_vm2, %v7929_v6, -inf }
 0x56d   : > { %2509 = vmax.xlane.f32.xlu0 %v2508_v5  ;;  %v7933_v37 = vpop.f32.mrb[78].mxu1 }
 0x56e   : > { %v6051_v17 = vpop.f32.mrb[79].mxu1  ;;  %v2520_v47 = vsel %vm1522_vm2, %v7933_v37, -inf }
 0x56f   : > { %2521 = vmax.xlane.f32.xlu1 %v2520_v47 }
 0x573   : > { %2527 = vmax.xlane.f32.xlu1 %v2526_v60  ;;  %v7939_v3 = vpop.f32.mrb[80].mxu1 }
 0x574   : > { %v6062_v10 = vpop.f32.mrb[81].mxu1  ;;  %v2529_v25 = vsel %vm1522_vm2, %v7939_v3, -inf }
 0x575   : > { %v7941_v7 = vpop.f32.mrb[82].mxu1 }
 0x576   : > { %v6063_v27 = vpop.f32.mrb[83].mxu1  ;;  %v2532_v15 = vsel %vm1522_vm2, %v7941_v7, -inf }
 0x577   : > { %2533 = vmax.xlane.f32.xlu1 %v2532_v15 }
 0x57b   : > { %2539 = vmax.xlane.f32.xlu1 %v2538_v18  ;;  %v7947_v57 = vpop.f32.mrb[84].mxu1 }
 0x57c   : > { %v6074_v40 = vpop.f32.mrb[85].mxu1  ;;  %v2541_v41 = vsel %vm1522_vm2, %v7947_v57, -inf }
 0x57d   : > { %v7949_v51 = vpop.f32.mrb[86].mxu1 }
 0x57e   : > { %v6075_v1 = vpop.f32.mrb[87].mxu1  ;;  %v2544_v38 = vsel %vm1522_vm2, %v7949_v51, -inf }
 0x583   : > { %2684 = vrot.lane.b32.xlu0 %v7599_v14, %s7039_s16 }
 0x58c   : > { %2924 = vrot.lane.b32.xlu1 %v7609_v39, %s7039_s16 }
 0x5a2   : > { %2518 = vmax.xlane.f32.xlu0 %v2517_v23 }
 0x5a6   : > { %2524 = vmax.xlane.f32.xlu0 %v2523_v24 }
 0x5aa   : > { %2530 = vmax.xlane.f32.xlu0 %v2529_v25 }
 0x5ae   : > { %2536 = vmax.xlane.f32.xlu0 %v2535_v22 }
 0x5b0   : > { %2545 = vmax.xlane.f32.xlu1 %v2544_v38 }
 0x5b2   : > { %2542 = vmax.xlane.f32.xlu0 %v2541_v41 }
 0x5b6   : > { %v2501_v61 = vpop.xlane.xlu0 %2500 }
 0x5b7   : > { %v2547_v49 = vsub.f32 %v7892_v4, %v2501_v61 }
 0x5b8   : > { %v2504_v11 = vpop.xlane.xlu1 %2503 }
 0x5b9   : > { %v2548_v48 = vsub.f32 %v7896_v50, %v2504_v11  ;;  %v2563_v2 = vmul.f32 1.442695, %v2547_v49 }
 0x5bb   : > { %v2565_v29 = vmul.f32 1.442695, %v2548_v48 }
 0x5bc   : > { %v2733_v12 = vpop.permute.xlu1 %2732 }
 0x5bd   : > { %6083 = vmatpush3.bf16.msra.mxu1 %v2733_v12  ;;  %6552 = vpow2.f32 %v2565_v29 }
 0x5be   : > { %6094 = vmatprep.subr.bf16.mxu1 %v8994_v20  ;;  %6554 = vpow2.f32 %v2563_v2 }
 0x5c0   : > { %v7984_v50 = vpop.permute.xlu1 %2780 }
 0x5c1   : > { %3020 = vrot.lane.b32.xlu1 %v7613_v54, %s7039_s16 }
 0x5c4   : > { %v7986_v10 = vpop.permute.xlu1 %2828 }
 0x5c7   : > { %v7976_v5 = vpop.eup %6552 }
 0x5c8   : > { %2876 = vrot.lane.b32.xlu0 %v7611_v46, %s7039_s16  ;;  %v2598_v17 = vsel %vm1522_vm2, %v7976_v5, 0.0  ;;  %v7980_v47 = vpop.eup %6554 }
 0x5c9   : > { %v2595_v60 = vsel %vm1522_vm2, %v7980_v47, 0.0 }
 0x5cc   : > { %2972 = vrot.lane.b32.xlu0 %v7615_v55, %s7039_s16 }
 0x5e5   : > { %2599 = vadd.xlane.f32.xlu1 %v2598_v17 }
 0x5eb   : > { %2596 = vadd.xlane.f32.xlu0 %v2595_v60 }
 0x5f2   : > { %v2507_v4 = vpop.xlane.xlu0 %2506 }
 0x5f3   : > { %v2549_v27 = vsub.f32 %v7915_v36, %v2507_v4 }
 0x5f5   : > { %v2567_v15 = vmul.f32 1.442695, %v2549_v27  ;;  %v2516_v18 = vpop.xlane.xlu1 %2515 }
 0x5f6   : > { %v2513_v40 = vpop.xlane.xlu0 %2512  ;;  %v2552_v23 = vsub.f32 %v7908_v34, %v2516_v18 }
 0x5f7   : > { %6556 = vpow2.f32 %v2567_v15  ;;  %v2551_v1 = vsub.f32 %v7906_v16, %v2513_v40 }
 0x5f8   : > { %v2573_v41 = vmul.f32 1.442695, %v2552_v23 }
 0x5f9   : > { %v2571_v24 = vmul.f32 1.442695, %v2551_v1 }
 0x5fa   : > { %v2510_v25 = vpop.xlane.xlu0 %2509 }
 0x5fb   : > { %6558 = vpow2.f32 %v2571_v24  ;;  %v2550_v22 = vsub.f32 %v7919_v0, %v2510_v25 }
 0x5fc   : > { %v2522_v38 = vpop.xlane.xlu1 %2521 }
 0x5fd   : > { %v2569_v11 = vmul.f32 1.442695, %v2550_v22  ;;  %v2554_v12 = vsub.f32 %v7933_v37, %v2522_v38 }
 0x5fe   : > { %v2685_v48 = vpop.permute.xlu0 %2684 }
 0x5ff   : > { %6560 = vpow2.f32 %v2569_v11  ;;  %6077 = vmatpush3.bf16.msra.mxu0 %v2685_v48  ;;  %v2577_v16 = vmul.f32 1.442695, %v2554_v12 }
 0x600   : > { %v2528_v36 = vpop.xlane.xlu1 %2527  ;;  %6088 = vmatprep.subr.bf16.mxu0 %v8994_v20  ;;  %6562 = vpow2.f32 %v2573_v41 }
 0x601   : > { %v7994_v61 = vpop.eup %6556  ;;  %v2556_v34 = vsub.f32 %v7913_v33, %v2528_v36  ;;  %6564 = vpow2.f32 %v2577_v16 }
 0x602   : > { %v2601_v0 = vsel %vm1522_vm2, %v7994_v61, 0.0 }
 0x603   : > { %2602 = vadd.xlane.f32.xlu0 %v2601_v0  ;;  %v2581_v37 = vmul.f32 1.442695, %v2556_v34 }
 0x604   : > { %v2534_v29 = vpop.xlane.xlu1 %2533 }
 0x605   : > { %v7999_v49 = vpop.eup %6558  ;;  %v2558_v2 = vsub.f32 %v7941_v7, %v2534_v29  ;;  %6566 = vpow2.f32 %v2581_v37 }
 0x606   : > { %v2607_v17 = vsel %vm1522_vm2, %v7999_v49, 0.0 }
 0x607   : > { %2608 = vadd.xlane.f32.xlu0 %v2607_v17  ;;  %v2585_v33 = vmul.f32 1.442695, %v2558_v2 }
 0x608   : > { %v2540_v60 = vpop.xlane.xlu1 %2539 }
 0x609   : > { %v8004_v4 = vpop.eup %6560  ;;  %v2560_v27 = vsub.f32 %v7927_v35, %v2540_v60  ;;  %6568 = vpow2.f32 %v2585_v33 }
 0x60a   : > { %v2604_v15 = vsel %vm1522_vm2, %v8004_v4, 0.0  ;;  %v8009_v18 = vpop.eup %6562 }
 0x60b   : > { %2605 = vadd.xlane.f32.xlu1 %v2604_v15  ;;  %v2589_v40 = vmul.f32 1.442695, %v2560_v27  ;;  %v2610_v7 = vsel %vm1522_vm2, %v8009_v18, 0.0  ;;  %v8013_v1 = vpop.eup %6564 }
 0x60c   : > { %v2616_v23 = vsel %vm1522_vm2, %v8013_v1, 0.0  ;;  %v8034_v37 = vpop.permute.xlu1 %2924 }
 0x60d   : > { %6570 = vpow2.f32 %v2589_v40 }
 0x60f   : > { %2611 = vadd.xlane.f32.xlu1 %v2610_v7  ;;  %v8017_v24 = vpop.eup %6566 }
 0x610   : > { %v2622_v35 = vsel %vm1522_vm2, %v8017_v24, 0.0 }
 0x613   : > { %2617 = vadd.xlane.f32.xlu1 %v2616_v23  ;;  %v8021_v25 = vpop.eup %6568 }
 0x614   : > { %v2628_v22 = vsel %vm1522_vm2, %v8021_v25, 0.0 }
 0x617   : > { %2623 = vadd.xlane.f32.xlu1 %v2622_v35  ;;  %v8025_v38 = vpop.eup %6570 }
 0x618   : > { %v2634_v41 = vsel %vm1522_vm2, %v8025_v38, 0.0 }
 0x61b   : > { %2629 = vadd.xlane.f32.xlu1 %v2628_v22 }
 0x61f   : > { %2635 = vadd.xlane.f32.xlu1 %v2634_v41 }
 0x62f   : > { %v2519_v11 = vpop.xlane.xlu0 %2518 }
 0x630   : > { %v2553_v12 = vsub.f32 %v7929_v6, %v2519_v11  ;;  %3169 = vrot.lane.b32.xlu1 %v7522_v19, %s7040_s10 }
 0x632   : > { %v2575_v48 = vmul.f32 1.442695, %v2553_v12 }
 0x633   : > { %v2525_v36 = vpop.xlane.xlu0 %2524 }
 0x634   : > { %6572 = vpow2.f32 %v2575_v48  ;;  %v2555_v16 = vsub.f32 %v7911_v30, %v2525_v36 }
 0x636   : > { %v2579_v34 = vmul.f32 1.442695, %v2555_v16 }
 0x637   : > { %v2531_v0 = vpop.xlane.xlu0 %2530 }
 0x638   : > { %6574 = vpow2.f32 %v2579_v34  ;;  %v2557_v29 = vsub.f32 %v7939_v3, %v2531_v0 }
 0x63a   : > { %v2583_v2 = vmul.f32 1.442695, %v2557_v29 }
 0x63b   : > { %v2537_v17 = vpop.xlane.xlu0 %2536 }
 0x63c   : > { %6576 = vpow2.f32 %v2583_v2  ;;  %v2559_v6 = vsub.f32 %v7923_v56, %v2537_v17 }
 0x63d   : > { %v2546_v60 = vpop.xlane.xlu1 %2545 }
 0x63e   : > { %v8037_v33 = vpop.eup %6572  ;;  %v2587_v27 = vmul.f32 1.442695, %v2559_v6  ;;  %v2562_v15 = vsub.f32 %v7949_v51, %v2546_v60 }
 0x63f   : > { %v2543_v40 = vpop.xlane.xlu0 %2542  ;;  %v2613_v30 = vsel %vm1522_vm2, %v8037_v33, 0.0 }
 0x640   : > { %6578 = vpow2.f32 %v2587_v27  ;;  %v2561_v3 = vsub.f32 %v7947_v57, %v2543_v40  ;;  %2614 = vadd.xlane.f32.xlu0 %v2613_v30  ;;  %v2593_v23 = vmul.f32 1.442695, %v2562_v15 }
 0x641   : > { %v8075_v34 = vpop.permute.xlu1 %3020 }
 0x642   : > { %v8043_v7 = vpop.eup %6574  ;;  %v2591_v35 = vmul.f32 1.442695, %v2561_v3 }
 0x643   : > { %v2619_v56 = vsel %vm1522_vm2, %v8043_v7, 0.0  ;;  %v2877_v16 = vpop.permute.xlu0 %2876 }
 0x644   : > { %6580 = vpow2.f32 %v2591_v35  ;;  %2620 = vadd.xlane.f32.xlu0 %v2619_v56 }
 0x645   : > { %6582 = vpow2.f32 %v2593_v23 }
 0x646   : > { %v8047_v22 = vpop.eup %6576 }
 0x647   : > { %v2625_v51 = vsel %vm1522_vm2, %v8047_v22, 0.0  ;;  %v8081_v0 = vpop.permute.xlu0 %2972 }
 0x648   : > { %2626 = vadd.xlane.f32.xlu0 %v2625_v51 }
 0x64a   : > { %v8051_v41 = vpop.eup %6578 }
 0x64b   : > { %v2631_v57 = vsel %vm1522_vm2, %v8051_v41, 0.0 }
 0x64c   : > { %2632 = vadd.xlane.f32.xlu0 %v2631_v57 }
 0x64e   : > { %v8055_v11 = vpop.eup %6580 }
 0x64f   : > { %v2637_v12 = vsel %vm1522_vm2, %v8055_v11, 0.0  ;;  %v8059_v48 = vpop.eup %6582 }
 0x650   : > { %2638 = vadd.xlane.f32.xlu0 %v2637_v12  ;;  %v2640_v36 = vsel %vm1522_vm2, %v8059_v48, 0.0 }
 0x654   : > { %2641 = vadd.xlane.f32.xlu1 %v2640_v36 }
 0x665   : > { %3220 = vrot.lane.b32.xlu1 %v7531_v32, %s7040_s10 }
 0x666   : > { %3118 = vrot.lane.b32.xlu0 %v7524_v21, %s7040_s10 }
 0x669   : > { %3271 = vrot.lane.b32.xlu1 %v7529_v31, %s7040_s10 }
 0x66a   : > { %3116 = vrot.lane.b32.xlu0 %v7505_v43, %s7040_s10 }
 0x66d   : > { %3322 = vrot.lane.b32.xlu1 %v7542_v45, %s7040_s10 }
 0x66e   : > { %3167 = vrot.lane.b32.xlu0 %v7503_v42, %s7040_s10 }
 0x671   : > { %3373 = vrot.lane.b32.xlu1 %v7540_v44, %s7040_s10 }
 0x672   : > { %3218 = vrot.lane.b32.xlu0 %v7509_v53, %s7040_s10  ;;  %v2600_v29 = vpop.xlane.xlu1 %2599 }
 0x673   : > { %6584 = vrcp.f32 %v2600_v29 }
 0x675   : > { %3424 = vrot.lane.b32.xlu1 %v7556_v59, %s7040_s10 }
 0x676   : > { %3269 = vrot.lane.b32.xlu0 %v7507_v52, %s7040_s10 }
 0x678   : > { %v2597_v2 = vpop.xlane.xlu0 %2596 }
 0x679   : > { %6586 = vrcp.f32 %v2597_v2  ;;  %3475 = vrot.lane.b32.xlu1 %v7554_v58, %s7040_s10 }
 0x67a   : > { %3320 = vrot.lane.b32.xlu0 %v7513_v63, %s7040_s10 }
 0x67d   : > { %3473 = vrot.lane.b32.xlu1 %v7515_v8, %s7040_s10  ;;  %v6585_v17 = vpop.eup %6584 }
 0x67e   : > { %3371 = vrot.lane.b32.xlu0 %v7511_v62, %s7040_s10  ;;  %v2660_v60 = vmul.f32 %v6585_v17, %v7976_v5 }
 0x682   : > { %3422 = vrot.lane.b32.xlu0 %v7517_v9, %s7040_s10 }
 0x683   : > { %v6587_v6 = vpop.eup %6586 }
 0x684   : > { %v2659_v27 = vmul.f32 %v6587_v6, %v7980_v47 }
 0x686   : > { %v2675_v15 = vpack.c.bf16 %v2660_v60, %v2659_v27 }
 0x688   : > { %6079 = vmatmul.mubr.msk.bf16.vlgmr.msra.gmra.mrb[56].mxu0 %vm1522_vm2, %v2675_v15 }
 0x689   : > { %6089 = vmatpush3.bf16.msra.mxu0 %v7984_v50  ;;  %6090 = vmatprep.mubr.msk.bf16.mxu0 %vm7038_vm0, %v8994_v20 }
 0x68a   : > { %6100 = vmatprep.subr.bf16.mxu0 %v8994_v20 }
 0x690   : > { %v2603_v40 = vpop.xlane.xlu0 %2602 }
 0x691   : > { %6588 = vrcp.f32 %v2603_v40 }
 0x694   : > { %v2609_v30 = vpop.xlane.xlu0 %2608 }
 0x698   : > { %v2606_v3 = vpop.xlane.xlu1 %2605 }
 0x699   : > { %6590 = vrcp.f32 %v2606_v3 }
 0x69a   : > { %6592 = vrcp.f32 %v2609_v30 }
 0x69b   : > { %v6589_v5 = vpop.eup %6588 }
 0x69c   : > { %v2612_v23 = vpop.xlane.xlu1 %2611  ;;  %v2661_v35 = vmul.f32 %v6589_v5, %v7994_v61 }
 0x69d   : > { %6594 = vrcp.f32 %v2612_v23 }
 0x6a0   : > { %v2618_v61 = vpop.xlane.xlu1 %2617 }
 0x6a1   : > { %6596 = vrcp.f32 %v2618_v61 }
 0x6a3   : > { %v6591_v47 = vpop.eup %6590 }
 0x6a4   : > { %v2662_v56 = vmul.f32 %v6591_v47, %v8004_v4  ;;  %v6593_v50 = vpop.eup %6592 }
 0x6a5   : > { %v2663_v12 = vmul.f32 %v6593_v50, %v7999_v49  ;;  %v2624_v49 = vpop.xlane.xlu1 %2623 }
 0x6a6   : > { %v2676_v51 = vpack.c.bf16 %v2662_v56, %v2661_v35 }
 0x6a7   : > { %v6595_v57 = vpop.eup %6594 }
 0x6a8   : > { %v2664_v36 = vmul.f32 %v6595_v57, %v8009_v18  ;;  %6085 = vmatmul.mubr.msk.bf16.vlgmr.msra.gmra.mrb[88].mxu1 %vm1522_vm2, %v2676_v51 }
 0x6a9   : > { %6095 = vmatpush3.bf16.msra.mxu1 %v7986_v10  ;;  %6096 = vmatprep.mubr.msk.bf16.mxu1 %vm7038_vm0, %v8994_v20  ;;  %v2630_v10 = vpop.xlane.xlu1 %2629 }
 0x6aa   : > { %v2677_v29 = vpack.c.bf16 %v2664_v36, %v2663_v12  ;;  %6106 = vmatprep.subr.bf16.mxu1 %v8994_v20 }
 0x6ab   : > { %v6597_v6 = vpop.eup %6596 }
 0x6ac   : > { %6091 = vmatmul.mubr.msk.bf16.vlgmr.msra.gmra.mrb[60].mxu0 %vm1522_vm2, %v2677_v29  ;;  %v2666_v60 = vmul.f32 %v6597_v6, %v8013_v1 }
 0x6ad   : > { %6101 = vmatpush3.bf16.msra.mxu0 %v2877_v16  ;;  %6102 = vmatprep.mubr.msk.bf16.mxu0 %vm7038_vm0, %v8994_v20  ;;  %v2636_v2 = vpop.xlane.xlu1 %2635 }
 0x6ae   : > { %6112 = vmatprep.subr.bf16.mxu0 %v8994_v20 }
 0x6b1   : > { %v3170_v5 = vpop.permute.xlu1 %3169 }
 0x6cd   : > { %v2615_v4 = vpop.xlane.xlu0 %2614 }
 0x6ce   : > { %6598 = vrcp.f32 %v2615_v4 }
 0x6cf   : > { %6600 = vrcp.f32 %v2624_v49 }
 0x6d1   : > { %v2621_v18 = vpop.xlane.xlu0 %2620 }
 0x6d2   : > { %6602 = vrcp.f32 %v2621_v18 }
 0x6d3   : > { %6604 = vrcp.f32 %v2630_v10 }
 0x6d5   : > { %v2627_v17 = vpop.xlane.xlu0 %2626 }
 0x6d6   : > { %6606 = vrcp.f32 %v2627_v17 }
 0x6d7   : > { %6608 = vrcp.f32 %v2636_v2  ;;  %v3175_v2 = vsel %vm1145_vm1, %v3170_v5, 0 }
 0x6d8   : > { %v6599_v16 = vpop.eup %6598 }
 0x6d9   : > { %v2665_v27 = vmul.f32 %v6599_v16, %v8037_v33  ;;  %v2633_v15 = vpop.xlane.xlu0 %2632  ;;  %v6601_v40 = vpop.eup %6600 }
 0x6da   : > { %6610 = vrcp.f32 %v2633_v15  ;;  %v2668_v23 = vmul.f32 %v6601_v40, %v8017_v24 }
 0x6db   : > { %v2678_v30 = vpack.c.bf16 %v2666_v60, %v2665_v27 }
 0x6dc   : > { %v6603_v3 = vpop.eup %6602 }
 0x6dd   : > { %v2667_v47 = vmul.f32 %v6603_v3, %v8043_v7  ;;  %v2639_v35 = vpop.xlane.xlu0 %2638  ;;  %6097 = vmatmul.mubr.msk.bf16.vlgmr.msra.gmra.mrb[92].mxu1 %vm1522_vm2, %v2678_v30  ;;  %v6605_v56 = vpop.eup %6604 }
 0x6de   : > { %6107 = vmatpush3.bf16.msra.mxu1 %v8034_v37  ;;  %6108 = vmatprep.mubr.msk.bf16.mxu1 %vm7038_vm0, %v8994_v20  ;;  %6612 = vrcp.f32 %v2639_v35  ;;  %v2670_v50 = vmul.f32 %v6605_v56, %v8021_v25 }
 0x6df   : > { %v2679_v1 = vpack.c.bf16 %v2668_v23, %v2667_v47  ;;  %6118 = vmatprep.subr.bf16.mxu1 %v8994_v20 }
 0x6e0   : > { %v6607_v33 = vpop.eup %6606 }
 0x6e1   : > { %v2669_v24 = vmul.f32 %v6607_v33, %v8047_v22  ;;  %v3119_v51 = vpop.permute.xlu0 %3118  ;;  %6103 = vmatmul.mubr.msk.bf16.vlgmr.msra.gmra.mrb[64].mxu0 %vm1522_vm2, %v2679_v1  ;;  %v2642_v7 = vpop.xlane.xlu1 %2641 }
 0x6e2   : > { %v6609_v57 = vpop.eup %6608  ;;  %6113 = vmatpush3.bf16.msra.mxu0 %v8081_v0  ;;  %6614 = vrcp.f32 %v2642_v7  ;;  %6114 = vmatprep.mubr.msk.bf16.mxu0 %vm7038_vm0, %v8994_v20  ;;  %v3124_v49 = vsel %vm1145_vm1, %v3119_v51, 0 }
 0x6e3   : > { %v2680_v37 = vpack.c.bf16 %v2670_v50, %v2669_v24  ;;  %6124 = vmatprep.subr.bf16.mxu0 %v8994_v20  ;;  %v2672_v36 = vmul.f32 %v6609_v57, %v8025_v38 }
 0x6e4   : > { %v6611_v12 = vpop.eup %6610 }
 0x6e5   : > { %v2671_v25 = vmul.f32 %v6611_v12, %v8051_v41  ;;  %v3117_v22 = vpop.permute.xlu0 %3116  ;;  %6109 = vmatmul.mubr.msk.bf16.vlgmr.msra.gmra.mrb[96].mxu1 %vm1522_vm2, %v2680_v37  ;;  %v3221_v0 = vpop.permute.xlu1 %3220 }
 0x6e6   : > { %6119 = vmatpush3.bf16.msra.mxu1 %v8075_v34  ;;  %6120 = vmatprep.mubr.msk.bf16.mxu1 %vm7038_vm0, %v8994_v20  ;;  %v3226_v6 = vsel %vm1145_vm1, %v3221_v0, 0 }
 0x6e7   : > { %v2681_v29 = vpack.c.bf16 %v2672_v36, %v2671_v25  ;;  %6130 = vmatprep.subr.bf16.mxu1 %v8994_v20 }
 0x6e8   : > { %v6613_v61 = vpop.eup %6612 }
 0x6e9   : > { %6115 = vmatmul.mubr.msk.bf16.vlgmr.msra.gmra.mrb[68].mxu0 %vm1522_vm2, %v2681_v29  ;;  %v3168_v38 = vpop.permute.xlu0 %3167  ;;  %v2673_v34 = vmul.f32 %v6613_v61, %v8055_v11  ;;  %v3272_v10 = vpop.permute.xlu1 %3271 }
 0x6ea   : > { %6126 = vmatprep.mubr.msk.bf16.mxu0 %vm7038_vm0, %v8994_v20 }
 0x6eb   : > { %6125 = vmatpush3.bf16.xpose.msra.mxu0 %v3124_v49 }
 0x6ec   : > { %v6615_v41 = vpop.eup %6614  ;;  %6136 = vmatprep.subr.bf16.mxu0 %v8994_v20 }
 0x6ed   : > { %v2674_v4 = vmul.f32 %v6615_v41, %v8059_v48  ;;  %v3219_v17 = vpop.permute.xlu0 %3218  ;;  %v3323_v16 = vpop.permute.xlu1 %3322  ;;  %v3277_v48 = vsel %vm1145_vm1, %v3272_v10, 0 }
 0x6ee   : > { %v3328_v27 = vsel %vm1145_vm1, %v3323_v16, 0 }
 0x6ef   : > { %v2682_v18 = vpack.c.bf16 %v2674_v4, %v2673_v34 }
 0x6f1   : > { %6121 = vmatmul.mubr.msk.bf16.vlgmr.msra.gmra.mrb[100].mxu1 %vm1522_vm2, %v2682_v18  ;;  %v3270_v11 = vpop.permute.xlu0 %3269  ;;  %v3374_v60 = vpop.permute.xlu1 %3373 }
 0x6f2   : > { %6127 = vmatmul.mubr.msk.bf16.vlgmr.msra.gmra.mrb[72].mxu0 %vm1145_vm1, %v3117_v22  ;;  %6131 = vmatpush3.bf16.xpose.msra.mxu1 %v3175_v2  ;;  %v3379_v30 = vsel %vm1145_vm1, %v3374_v60, 0 }
 0x6f3   : > { %6137 = vmatpush3.bf16.xpose.msra.mxu0 %v3226_v6  ;;  %6132 = vmatprep.mubr.msk.bf16.mxu1 %vm7038_vm0, %v8994_v20 }
 0x6f4   : > { %6138 = vmatprep.mubr.msk.bf16.mxu0 %vm7038_vm0, %v8994_v20  ;;  %6142 = vmatprep.subr.bf16.mxu1 %v8994_v20 }
 0x6f5   : > { %6148 = vmatprep.subr.bf16.mxu0 %v8994_v20  ;;  %v3321_v15 = vpop.permute.xlu0 %3320  ;;  %v3425_v40 = vpop.permute.xlu1 %3424 }
 0x6f6   : > { %v3430_v3 = vsel %vm1145_vm1, %v3425_v40, 0 }
 0x6f9   : > { %6133 = vmatmul.mubr.msk.bf16.vlgmr.msra.gmra.mrb[104].mxu1 %vm1145_vm1, %v3168_v38  ;;  %v3372_v23 = vpop.permute.xlu0 %3371  ;;  %v3476_v5 = vpop.permute.xlu1 %3475 }
 0x6fa   : > { %6139 = vmatmul.mubr.msk.bf16.vlgmr.msra.gmra.mrb[76].mxu0 %vm1145_vm1, %v3219_v17  ;;  %6143 = vmatpush3.bf16.xpose.msra.mxu1 %v3277_v48  ;;  %v3481_v47 = vsel %vm1145_vm1, %v3476_v5, 0 }
 0x6fb   : > { %6149 = vmatpush3.bf16.xpose.msra.mxu0 %v3328_v27  ;;  %6144 = vmatprep.mubr.msk.bf16.mxu1 %vm7038_vm0, %v8994_v20 }
 0x6fc   : > { %6150 = vmatprep.mubr.msk.bf16.mxu0 %vm7038_vm0, %v8994_v20  ;;  %6154 = vmatprep.subr.bf16.mxu1 %v8994_v20 }
 0x6fd   : > { %6160 = vmatprep.subr.bf16.mxu0 %v8994_v20  ;;  %v3423_v35 = vpop.permute.xlu0 %3422  ;;  %v3474_v56 = vpop.permute.xlu1 %3473 }
 0x701   : > { %6145 = vmatmul.mubr.msk.bf16.vlgmr.msra.gmra.mrb[108].mxu1 %vm1145_vm1, %v3270_v11 }
 0x702   : > { %6151 = vmatmul.mubr.msk.bf16.vlgmr.msra.gmra.mrb[80].mxu0 %vm1145_vm1, %v3321_v15  ;;  %6155 = vmatpush3.bf16.xpose.msra.mxu1 %v3379_v30 }
 0x703   : > { %6161 = vmatpush3.bf16.xpose.msra.mxu0 %v3430_v3  ;;  %6156 = vmatprep.mubr.msk.bf16.mxu1 %vm7038_vm0, %v8994_v20 }
 0x704   : > { %6162 = vmatprep.mubr.msk.bf16.mxu0 %vm7038_vm0, %v8994_v20  ;;  %6166 = vmatprep.subr.bf16.mxu1 %v8994_v20 }
 0x705   : > { %6172 = vmatprep.subr.bf16.mxu0 %v8994_v20 }
 0x709   : > { %6157 = vmatmul.mubr.msk.bf16.vlgmr.msra.gmra.mrb[112].mxu1 %vm1145_vm1, %v3372_v23 }
 0x70a   : > { %6163 = vmatmul.mubr.msk.bf16.vlgmr.msra.gmra.mrb[84].mxu0 %vm1145_vm1, %v3423_v35  ;;  %6167 = vmatpush3.bf16.xpose.msra.mxu1 %v3481_v47 }
 0x70b   : > { %6168 = vmatprep.mubr.msk.bf16.mxu1 %vm7038_vm0, %v8994_v20  ;;  %6178 = vmatprep.subr.bf16.mxu1 %v8994_v20 }
 0x70c   : > { %6174 = vmatprep.mubr.msk.bf16.mxu0 %vm7038_vm0, %v8994_v20 }
 0x711   : > { %6169 = vmatmul.mubr.msk.bf16.vlgmr.msra.gmra.mrb[116].mxu1 %vm1145_vm1, %v3474_v56 }
 0x712   : > { %6180 = vmatprep.mubr.msk.bf16.mxu1 %vm7038_vm0, %v8994_v20 }
 0x75b   : > { %v8188_v1 = vpop.f32.mrb[56].mxu0 }
 0x75c   : > { %v6080_v33 = vpop.f32.mrb[57].mxu0 }
 0x75d   : > { %v8190_v50 = vpop.f32.mrb[58].mxu0 }
 0x75e   : > { %v6081_v51 = vpop.f32.mrb[59].mxu0 }
 0x77b   : > { %v8194_v7 = vpop.f32.mrb[88].mxu1 }
 0x77c   : > { %9047 = vst [vmem:[#allocation27_spill] sm:$0xff] %v8194_v7  ;;  %v6086_v57 = vpop.f32.mrb[89].mxu1 }
 0x77d   : > { %v8196_v37 = vpop.f32.mrb[90].mxu1 }
 0x77e   : > { %v6087_v36 = vpop.f32.mrb[91].mxu1 }
 0x77f   : > { %v8200_v25 = vpop.f32.mrb[60].mxu0 }
 0x780   : > { %v6092_v22 = vpop.f32.mrb[61].mxu0 }
 0x781   : > { %v8202_v0 = vpop.f32.mrb[62].mxu0 }
 0x782   : > { %v6093_v61 = vpop.f32.mrb[63].mxu0 }
 0x7b0   : > { %v8206_v49 = vpop.f32.mrb[92].mxu1 }
 0x7b1   : > { %9048 = vst [vmem:[#allocation28_spill] sm:$0xff] %v8206_v49  ;;  %v6098_v38 = vpop.f32.mrb[93].mxu1 }
 0x7b2   : > { %v8208_v41 = vpop.f32.mrb[94].mxu1 }
 0x7b3   : > { %9049 = vst [vmem:[#allocation29_spill] sm:$0xff] %v8208_v41  ;;  %v6099_v4 = vpop.f32.mrb[95].mxu1 }
 0x7b4   : > { %v8212_v10 = vpop.f32.mrb[64].mxu0 }
 0x7b5   : > { %v6104_v18 = vpop.f32.mrb[65].mxu0 }
 0x7b6   : > { %v8214_v2 = vpop.f32.mrb[66].mxu0 }
 0x7b7   : > { %v6105_v6 = vpop.f32.mrb[67].mxu0 }
 0x7b8   : > { %v8218_v16 = vpop.f32.mrb[96].mxu1 }
 0x7b9   : > { %9050 = vst [vmem:[#allocation30_spill] sm:$0xff] %v8218_v16  ;;  %v6110_v11 = vpop.f32.mrb[97].mxu1 }
 0x7ba   : > { %v8220_v48 = vpop.f32.mrb[98].mxu1 }
 0x7bb   : > { %9051 = vst [vmem:[#allocation31_spill] sm:$0xff] %v8220_v48  ;;  %v6111_v27 = vpop.f32.mrb[99].mxu1 }
 0x7bc   : > { %v8224_v15 = vpop.f32.mrb[68].mxu0 }
 0x7bd   : > { %9052 = vst [vmem:[#allocation32_spill] sm:$0xff] %v8224_v15  ;;  %v6116_v40 = vpop.f32.mrb[69].mxu0 }
 0x7be   : > { %v8226_v30 = vpop.f32.mrb[70].mxu0 }
 0x7bf   : > { %9053 = vst [vmem:[#allocation33_spill] sm:$0xff] %v8226_v30  ;;  %v6117_v23 = vpop.f32.mrb[71].mxu0 }
 0x7c4   : > { %v8230_v5 = vpop.f32.mrb[100].mxu1 }
 0x7c5   : > { %9054 = vst [vmem:[#allocation34_spill] sm:$0xff] %v8230_v5  ;;  %v8232_v47 = vpop.f32.mrb[72].mxu0  ;;  %v6122_v35 = vpop.f32.mrb[101].mxu1  ;;  %v9056_v5 = vmov 0.0  }
 0x7c6   : > { %v6128_v56 = vpop.f32.mrb[73].mxu0  ;;  %v3524_v33 = vsel %vm1522_vm2, %v8232_v47, -inf  ;;  %v8236_v51 = vpop.f32.mrb[102].mxu1 }
 0x7c7   : > { %9055 = vst [vmem:[#allocation35_spill] sm:$0xff] %v8236_v51  ;;  %3525 = vmax.xlane.f32.xlu0 %v3524_v33  ;;  %v8240_v36 = vpop.f32.mrb[74].mxu0  ;;  %v6123_v22 = vpop.f32.mrb[103].mxu1 }
 0x7c8   : > { %v6129_v61 = vpop.f32.mrb[75].mxu0  ;;  %v3527_v38 = vsel %vm1522_vm2, %v8240_v36, -inf }
 0x7c9   : > { %3528 = vmax.xlane.f32.xlu1 %v3527_v38 }
 0x7cc   : > { %v8244_v4 = vpop.f32.mrb[104].mxu1 }
 0x7cd   : > { %v8246_v18 = vpop.f32.mrb[76].mxu0  ;;  %v6134_v6 = vpop.f32.mrb[105].mxu1  ;;  %v3530_v11 = vsel %vm1522_vm2, %v8244_v4, -inf }
 0x7ce   : > { %v6140_v27 = vpop.f32.mrb[77].mxu0  ;;  %3531 = vmax.xlane.f32.xlu0 %v3530_v11  ;;  %v8250_v40 = vpop.f32.mrb[106].mxu1  ;;  %v3536_v33 = vsel %vm1522_vm2, %v8246_v18, -inf }
 0x7cf   : > { %v8252_v23 = vpop.f32.mrb[78].mxu0  ;;  %v6135_v35 = vpop.f32.mrb[107].mxu1  ;;  %v3533_v6 = vsel %vm1522_vm2, %v8250_v40, -inf }
 0x7d0   : > { %v6141_v56 = vpop.f32.mrb[79].mxu0 }
 0x7d2   : > { %3537 = vmax.xlane.f32.xlu0 %v3536_v33 }
 0x7d4   : > { %v8256_v22 = vpop.f32.mrb[108].mxu1 }
 0x7d5   : > { %v8258_v61 = vpop.f32.mrb[80].mxu0  ;;  %v6146_v38 = vpop.f32.mrb[109].mxu1 }
 0x7d6   : > { %v6152_v27 = vpop.f32.mrb[81].mxu0  ;;  %3534 = vmax.xlane.f32.xlu0 %v3533_v6  ;;  %v8262_v11 = vpop.f32.mrb[110].mxu1 }
 0x7d7   : > { %v8264_v57 = vpop.f32.mrb[82].mxu0  ;;  %v6147_v35 = vpop.f32.mrb[111].mxu1 }
 0x7d8   : > { %v6153_v56 = vpop.f32.mrb[83].mxu0 }
 0x7da   : > { %3755 = vrot.lane.b32.xlu1 %v7597_v13, %s7040_s10 }
 0x7dc   : > { %v8268_v33 = vpop.f32.mrb[112].mxu1 }
 0x7dd   : > { %v8270_v3 = vpop.f32.mrb[84].mxu0  ;;  %v6158_v60 = vpop.f32.mrb[113].mxu1 }
 0x7de   : > { %3802 = vrot.lane.b32.xlu1 %v7607_v28, %s7040_s10  ;;  %v6164_v38 = vpop.f32.mrb[85].mxu0  ;;  %v8274_v27 = vpop.f32.mrb[114].mxu1  ;;  %v3539_v60 = vsel %vm1522_vm2, %v8252_v23, -inf }
 0x7df   : > { %v8276_v6 = vpop.f32.mrb[86].mxu0  ;;  %v6159_v34 = vpop.f32.mrb[115].mxu1  ;;  %v3551_v38 = vsel %vm1522_vm2, %v8264_v57, -inf }
 0x7e0   : > { %v6165_v12 = vpop.f32.mrb[87].mxu0  ;;  %v3545_v34 = vsel %vm1522_vm2, %v8262_v11, -inf }
 0x7e1   : > { %v3542_v12 = vsel %vm1522_vm2, %v8256_v22, -inf }
 0x7e2   : > { %3849 = vrot.lane.b32.xlu1 %v7605_v26, %s7040_s10 }
 0x7e4   : > { %v8280_v35 = vpop.f32.mrb[116].mxu1 }
 0x7e5   : > { %v6170_v56 = vpop.f32.mrb[117].mxu1 }
 0x7e6   : > { %v8282_v17 = vpop.f32.mrb[118].mxu1  ;;  %v3557_v56 = vsel %vm1522_vm2, %v8274_v27, -inf }
 0x7e7   : > { %v6171_v29 = vpop.f32.mrb[119].mxu1 }
 0x7e8   : > { %v3548_v29 = vsel %vm1522_vm2, %v8258_v61, -inf }
 0x7ec   : > { %3708 = vrot.lane.b32.xlu0 %v7599_v14, %s7040_s10 }
 0x806   : > { %3540 = vmax.xlane.f32.xlu1 %v3539_v60  ;;  %v3554_v60 = vsel %vm1522_vm2, %v8268_v33, -inf }
 0x80a   : > { %3546 = vmax.xlane.f32.xlu1 %v3545_v34  ;;  %v3563_v34 = vsel %vm1522_vm2, %v8276_v6, -inf }
 0x80b   : > { %3543 = vmax.xlane.f32.xlu0 %v3542_v12  ;;  %v3560_v12 = vsel %vm1522_vm2, %v8270_v3, -inf }
 0x80e   : > { %3552 = vmax.xlane.f32.xlu1 %v3551_v38  ;;  %v3566_v38 = vsel %vm1522_vm2, %v8280_v35, -inf }
 0x80f   : > { %3549 = vmax.xlane.f32.xlu0 %v3548_v29  ;;  %v3569_v29 = vsel %vm1522_vm2, %v8282_v17, -inf }
 0x812   : > { %3558 = vmax.xlane.f32.xlu1 %v3557_v56 }
 0x813   : > { %3555 = vmax.xlane.f32.xlu0 %v3554_v60 }
 0x816   : > { %3564 = vmax.xlane.f32.xlu1 %v3563_v34 }
 0x817   : > { %3561 = vmax.xlane.f32.xlu0 %v3560_v12 }
 0x81b   : > { %3567 = vmax.xlane.f32.xlu0 %v3566_v38 }
 0x827   : > { %3943 = vrot.lane.b32.xlu1 %v7609_v39, %s7040_s10 }
 0x831   : > { %3896 = vrot.lane.b32.xlu0 %v7611_v46, %s7040_s10 }
 0x835   : > { %3990 = vrot.lane.b32.xlu0 %v7615_v55, %s7040_s10 }
 0x84b   : > { %3570 = vmax.xlane.f32.xlu1 %v3569_v29 }
 0x854   : > { %v3526_v56 = vpop.xlane.xlu0 %3525 }
 0x855   : > { %v3572_v60 = vsub.f32 %v8232_v47, %v3526_v56 }
 0x856   : > { %v3529_v34 = vpop.xlane.xlu1 %3528 }
 0x857   : > { %v3588_v12 = vmul.f32 1.442695, %v3572_v60 }
 0x859   : > { %6616 = vpow2.f32 %v3588_v12 }
 0x85a   : > { %v3756_v38 = vpop.permute.xlu1 %3755 }
 0x85b   : > { %6179 = vmatpush3.bf16.msra.mxu1 %v3756_v38  ;;  %v3532_v24 = vpop.xlane.xlu0 %3531 }
 0x85c   : > { %v3574_v20 = vsub.f32 %v8244_v4, %v3532_v24  ;;  %4037 = vrot.lane.b32.xlu1 %v7613_v54, %s7040_s10  ;;  %6190 = vmatprep.subr.bf16.mxu1 %v9056_v5 }
 0x85e   : > { %v3592_v51 = vmul.f32 1.442695, %v3574_v20  ;;  %v3573_v20 = vsub.f32 %v8240_v36, %v3529_v34 }
 0x85f   : > { %v3538_v15 = vpop.xlane.xlu0 %3537 }
 0x860   : > { %6618 = vpow2.f32 %v3592_v51  ;;  %v3576_v29 = vsub.f32 %v8246_v18, %v3538_v15  ;;  %v3590_v18 = vmul.f32 1.442695, %v3573_v20 }
 0x862   : > { %v3596_v30 = vmul.f32 1.442695, %v3576_v29 }
 0x863   : > { %v8320_v47 = vpop.eup %6616  ;;  %v3535_v56 = vpop.xlane.xlu0 %3534 }
 0x864   : > { %6620 = vpow2.f32 %v3596_v30  ;;  %v3620_v60 = vsel %vm1522_vm2, %v8320_v47, 0.0  ;;  %v3575_v30 = vsub.f32 %v8250_v40, %v3535_v56  ;;  %v8343_v40 = vpop.permute.xlu1 %3802 }
 0x865   : > { %3621 = vadd.xlane.f32.xlu0 %v3620_v60  ;;  %6622 = vpow2.f32 %v3590_v18 }
 0x866   : > { %v3594_v38 = vmul.f32 1.442695, %v3575_v30 }
 0x867   : > { %v3709_v24 = vpop.permute.xlu0 %3708 }
 0x868   : > { %6173 = vmatpush3.bf16.msra.mxu0 %v3709_v24  ;;  %6624 = vpow2.f32 %v3594_v38  ;;  %v8345_v56 = vpop.permute.xlu1 %3849 }
 0x869   : > { %6184 = vmatprep.subr.bf16.mxu0 %v9056_v5 }
 0x86a   : > { %v8325_v4 = vpop.eup %6618 }
 0x86b   : > { %v3626_v15 = vsel %vm1522_vm2, %v8325_v4, 0.0 }
 0x86c   : > { %3627 = vadd.xlane.f32.xlu0 %v3626_v15 }
 0x86e   : > { %v8330_v51 = vpop.eup %6620 }
 0x86f   : > { %v3632_v12 = vsel %vm1522_vm2, %v8330_v51, 0.0  ;;  %v8335_v29 = vpop.eup %6622 }
 0x870   : > { %3633 = vadd.xlane.f32.xlu0 %v3632_v12  ;;  %v3623_v36 = vsel %vm1522_vm2, %v8335_v29, 0.0 }
 0x872   : > { %v8339_v34 = vpop.eup %6624 }
 0x873   : > { %v3629_v60 = vsel %vm1522_vm2, %v8339_v34, 0.0 }
 0x880   : > { %3624 = vadd.xlane.f32.xlu1 %v3623_v36 }
 0x884   : > { %3630 = vadd.xlane.f32.xlu1 %v3629_v60 }
 0x893   : > { %v3541_v24 = vpop.xlane.xlu1 %3540 }
 0x894   : > { %v3577_v20 = vsub.f32 %v8252_v23, %v3541_v24 }
 0x896   : > { %v3598_v15 = vmul.f32 1.442695, %v3577_v20 }
 0x897   : > { %v3547_v18 = vpop.xlane.xlu1 %3546 }
 0x898   : > { %6626 = vpow2.f32 %v3598_v15  ;;  %v3579_v30 = vsub.f32 %v8262_v11, %v3547_v18  ;;  %v3544_v12 = vpop.xlane.xlu0 %3543 }
 0x899   : > { %v3578_v38 = vsub.f32 %v8256_v22, %v3544_v12 }
 0x89a   : > { %v3602_v36 = vmul.f32 1.442695, %v3579_v30 }
 0x89b   : > { %v3600_v16 = vmul.f32 1.442695, %v3578_v38  ;;  %v3553_v48 = vpop.xlane.xlu1 %3552 }
 0x89c   : > { %6628 = vpow2.f32 %v3602_v36  ;;  %v3581_v60 = vsub.f32 %v8264_v57, %v3553_v48  ;;  %v3550_v49 = vpop.xlane.xlu0 %3549 }
 0x89d   : > { %6630 = vpow2.f32 %v3600_v16  ;;  %v3580_v41 = vsub.f32 %v8258_v61, %v3550_v49 }
 0x89e   : > { %v3606_v7 = vmul.f32 1.442695, %v3581_v60 }
 0x89f   : > { %v3604_v23 = vmul.f32 1.442695, %v3580_v41  ;;  %v3559_v24 = vpop.xlane.xlu1 %3558 }
 0x8a0   : > { %6632 = vpow2.f32 %v3606_v7  ;;  %v3583_v20 = vsub.f32 %v8274_v27, %v3559_v24  ;;  %v3556_v11 = vpop.xlane.xlu0 %3555 }
 0x8a1   : > { %6634 = vpow2.f32 %v3604_v23  ;;  %v3582_v22 = vsub.f32 %v8268_v33, %v3556_v11 }
 0x8a2   : > { %v8354_v15 = vpop.eup %6626  ;;  %v3610_v18 = vmul.f32 1.442695, %v3583_v20 }
 0x8a3   : > { %v3608_v30 = vmul.f32 1.442695, %v3582_v22  ;;  %v3565_v12 = vpop.xlane.xlu1 %3564  ;;  %v3635_v16 = vsel %vm1522_vm2, %v8354_v15, 0.0 }
 0x8a4   : > { %6636 = vpow2.f32 %v3610_v18  ;;  %v3585_v49 = vsub.f32 %v8276_v6, %v3565_v12  ;;  %3636 = vadd.xlane.f32.xlu1 %v3635_v16  ;;  %v3562_v41 = vpop.xlane.xlu0 %3561 }
 0x8a5   : > { %6638 = vpow2.f32 %v3608_v30  ;;  %v3584_v7 = vsub.f32 %v8270_v3, %v3562_v41 }
 0x8a6   : > { %v8360_v48 = vpop.eup %6628  ;;  %v3614_v57 = vmul.f32 1.442695, %v3585_v49 }
 0x8a7   : > { %v8362_v61 = vpop.eup %6630  ;;  %v3612_v33 = vmul.f32 1.442695, %v3584_v7  ;;  %v3641_v27 = vsel %vm1522_vm2, %v8360_v48, 0.0 }
 0x8a8   : > { %6640 = vpow2.f32 %v3614_v57  ;;  %3642 = vadd.xlane.f32.xlu1 %v3641_v27  ;;  %v3568_v38 = vpop.xlane.xlu0 %3567  ;;  %v3638_v6 = vsel %vm1522_vm2, %v8362_v61, 0.0  ;;  %v8403_v57 = vpop.permute.xlu1 %3943 }
 0x8a9   : > { %6642 = vpow2.f32 %v3612_v33  ;;  %v3586_v36 = vsub.f32 %v8280_v35, %v3568_v38  ;;  %3639 = vadd.xlane.f32.xlu0 %v3638_v6 }
 0x8aa   : > { %v8369_v3 = vpop.eup %6632 }
 0x8ab   : > { %v8371_v60 = vpop.eup %6634  ;;  %v3616_v23 = vmul.f32 1.442695, %v3586_v36  ;;  %v3647_v24 = vsel %vm1522_vm2, %v8369_v3, 0.0 }
 0x8ac   : > { %3648 = vadd.xlane.f32.xlu1 %v3647_v24  ;;  %v3644_v20 = vsel %vm1522_vm2, %v8371_v60, 0.0 }
 0x8ad   : > { %6644 = vpow2.f32 %v3616_v23  ;;  %3645 = vadd.xlane.f32.xlu0 %v3644_v20 }
 0x8ae   : > { %v8377_v11 = vpop.eup %6636 }
 0x8af   : > { %v8379_v22 = vpop.eup %6638  ;;  %v3653_v35 = vsel %vm1522_vm2, %v8377_v11, 0.0 }
 0x8b0   : > { %3654 = vadd.xlane.f32.xlu1 %v3653_v35  ;;  %v3650_v18 = vsel %vm1522_vm2, %v8379_v22, 0.0 }
 0x8b1   : > { %3651 = vadd.xlane.f32.xlu0 %v3650_v18 }
 0x8b2   : > { %v8385_v30 = vpop.eup %6640 }
 0x8b3   : > { %v8387_v12 = vpop.eup %6642  ;;  %v3659_v16 = vsel %vm1522_vm2, %v8385_v30, 0.0 }
 0x8b4   : > { %3660 = vadd.xlane.f32.xlu1 %v3659_v16  ;;  %v3656_v49 = vsel %vm1522_vm2, %v8387_v12, 0.0 }
 0x8b5   : > { %3657 = vadd.xlane.f32.xlu0 %v3656_v49 }
 0x8b7   : > { %v8393_v41 = vpop.eup %6644 }
 0x8b8   : > { %v3662_v7 = vsel %vm1522_vm2, %v8393_v41, 0.0 }
 0x8b9   : > { %3663 = vadd.xlane.f32.xlu0 %v3662_v7 }
 0x8c5   : > { %4186 = vrot.lane.b32.xlu1 %v7522_v19, %s7041_s12 }
 0x8cf   : > { %4135 = vrot.lane.b32.xlu0 %v7524_v21, %s7041_s12 }
 0x8d3   : > { %4133 = vrot.lane.b32.xlu0 %v7505_v43, %s7041_s12 }
 0x8d7   : > { %4184 = vrot.lane.b32.xlu0 %v7503_v42, %s7041_s12 }
 0x8d8   : > { %v3571_v33 = vpop.xlane.xlu1 %3570 }
 0x8d9   : > { %v3587_v27 = vsub.f32 %v8282_v17, %v3571_v33 }
 0x8db   : > { %v3618_v38 = vmul.f32 1.442695, %v3587_v27  ;;  %4235 = vrot.lane.b32.xlu0 %v7509_v53, %s7041_s12 }
 0x8dd   : > { %6646 = vpow2.f32 %v3618_v38 }
 0x8df   : > { %4286 = vrot.lane.b32.xlu0 %v7507_v52, %s7041_s12  ;;  %v3897_v52 = vpop.permute.xlu0 %3896 }
 0x8e3   : > { %4337 = vrot.lane.b32.xlu0 %v7513_v63, %s7041_s12  ;;  %v8428_v53 = vpop.permute.xlu0 %3990 }
 0x8e7   : > { %v8414_v43 = vpop.eup %6646  ;;  %4388 = vrot.lane.b32.xlu0 %v7511_v62, %s7041_s12  ;;  %v8432_v62 = vpop.permute.xlu1 %4037 }
 0x8e8   : > { %v3665_v42 = vsel %vm1522_vm2, %v8414_v43, 0.0 }
 0x8e9   : > { %3666 = vadd.xlane.f32.xlu1 %v3665_v42 }
 0x8eb   : > { %4439 = vrot.lane.b32.xlu0 %v7517_v9, %s7041_s12 }
 0x8f2   : > { %v3622_v63 = vpop.xlane.xlu0 %3621 }
 0x8f3   : > { %6648 = vrcp.f32 %v3622_v63 }
 0x8f9   : > { %v3628_v9 = vpop.xlane.xlu0 %3627 }
 0x8fa   : > { %4237 = vrot.lane.b32.xlu1 %v7531_v32, %s7041_s12 }
 0x8fe   : > { %4288 = vrot.lane.b32.xlu1 %v7529_v31, %s7041_s12  ;;  %v6649_v31 = vpop.eup %6648 }
 0x902   : > { %4339 = vrot.lane.b32.xlu1 %v7542_v45, %s7041_s12 }
 0x906   : > { %4390 = vrot.lane.b32.xlu1 %v7540_v44, %s7041_s12  ;;  %v3684_v44 = vmul.f32 %v6649_v31, %v8320_v47 }
 0x90a   : > { %4441 = vrot.lane.b32.xlu1 %v7556_v59, %s7041_s12 }
 0x90d   : > { %v3625_v19 = vpop.xlane.xlu1 %3624 }
 0x90e   : > { %6650 = vrcp.f32 %v3625_v19  ;;  %4492 = vrot.lane.b32.xlu1 %v7554_v58, %s7041_s12  ;;  %v3634_v58 = vpop.xlane.xlu0 %3633 }
 0x90f   : > { %6652 = vrcp.f32 %v3628_v9 }
 0x911   : > { %v3631_v21 = vpop.xlane.xlu1 %3630 }
 0x912   : > { %6654 = vrcp.f32 %v3631_v21  ;;  %4490 = vrot.lane.b32.xlu1 %v7515_v8, %s7041_s12 }
 0x913   : > { %6656 = vrcp.f32 %v3634_v58 }
 0x918   : > { %v6651_v32 = vpop.eup %6650 }
 0x919   : > { %v3685_v45 = vmul.f32 %v6651_v32, %v8335_v29  ;;  %v6653_v59 = vpop.eup %6652 }
 0x91a   : > { %v3686_v36 = vmul.f32 %v6653_v59, %v8325_v4 }
 0x91b   : > { %v3700_v17 = vpack.c.bf16 %v3685_v45, %v3684_v44 }
 0x91c   : > { %v6655_v6 = vpop.eup %6654 }
 0x91d   : > { %v3687_v23 = vmul.f32 %v6655_v6, %v8339_v34  ;;  %6175 = vmatmul.mubr.msk.bf16.vlgmr.msra.gmra.mrb[88].mxu0 %vm1522_vm2, %v3700_v17 }
 0x91e   : > { %6185 = vmatpush3.bf16.msra.mxu0 %v8343_v40  ;;  %6186 = vmatprep.mubr.msk.bf16.mxu0 %vm7038_vm0, %v9056_v5  ;;  %v6657_v40 = vpop.eup %6656 }
 0x91f   : > { %v3701_v8 = vpack.c.bf16 %v3687_v23, %v3686_v36  ;;  %6196 = vmatprep.subr.bf16.mxu0 %v9056_v5 }
 0x921   : > { %6181 = vmatmul.mubr.msk.bf16.vlgmr.msra.gmra.mrb[120].mxu1 %vm1522_vm2, %v3701_v8 }
 0x922   : > { %6191 = vmatpush3.bf16.msra.mxu1 %v8345_v56  ;;  %6192 = vmatprep.mubr.msk.bf16.mxu1 %vm7038_vm0, %v9056_v5  ;;  %v3688_v56 = vmul.f32 %v6657_v40, %v8330_v51 }
 0x923   : > { %6202 = vmatprep.subr.bf16.mxu1 %v9056_v5 }
 0x931   : > { %v3637_v47 = vpop.xlane.xlu1 %3636 }
 0x932   : > { %6658 = vrcp.f32 %v3637_v47 }
 0x935   : > { %v3643_v4 = vpop.xlane.xlu1 %3642 }
 0x936   : > { %6660 = vrcp.f32 %v3643_v4  ;;  %v3640_v29 = vpop.xlane.xlu0 %3639 }
 0x937   : > { %6662 = vrcp.f32 %v3640_v29 }
 0x939   : > { %v3649_v34 = vpop.xlane.xlu1 %3648 }
 0x93a   : > { %6664 = vrcp.f32 %v3649_v34  ;;  %v3646_v24 = vpop.xlane.xlu0 %3645 }
 0x93b   : > { %6666 = vrcp.f32 %v3646_v24 }
 0x93c   : > { %v6659_v20 = vpop.eup %6658 }
 0x93d   : > { %v3689_v35 = vmul.f32 %v6659_v20, %v8354_v15  ;;  %v3655_v18 = vpop.xlane.xlu1 %3654 }
 0x93e   : > { %6668 = vrcp.f32 %v3655_v18  ;;  %v3652_v16 = vpop.xlane.xlu0 %3651 }
 0x93f   : > { %6670 = vrcp.f32 %v3652_v16  ;;  %v3702_v49 = vpack.c.bf16 %v3689_v35, %v3688_v56 }
 0x940   : > { %v6661_v7 = vpop.eup %6660 }
 0x941   : > { %v6663_v33 = vpop.eup %6662  ;;  %6187 = vmatmul.mubr.msk.bf16.vlgmr.msra.gmra.mrb[92].mxu0 %vm1522_vm2, %v3702_v49  ;;  %v3661_v27 = vpop.xlane.xlu1 %3660  ;;  %v3691_v38 = vmul.f32 %v6661_v7, %v8360_v48 }
 0x942   : > { %v3690_v42 = vmul.f32 %v6663_v33, %v8362_v61  ;;  %6197 = vmatpush3.bf16.msra.mxu0 %v3897_v52  ;;  %6672 = vrcp.f32 %v3661_v27  ;;  %v3658_v63 = vpop.xlane.xlu0 %3657  ;;  %6198 = vmatprep.mubr.msk.bf16.mxu0 %vm7038_vm0, %v9056_v5 }
 0x943   : > { %6674 = vrcp.f32 %v3658_v63  ;;  %6208 = vmatprep.subr.bf16.mxu0 %v9056_v5 }
 0x944   : > { %v6665_v51 = vpop.eup %6664  ;;  %v3703_v15 = vpack.c.bf16 %v3691_v38, %v3690_v42 }
 0x945   : > { %v6667_v9 = vpop.eup %6666  ;;  %v3693_v19 = vmul.f32 %v6665_v51, %v8369_v3 }
 0x946   : > { %v3692_v21 = vmul.f32 %v6667_v9, %v8371_v60  ;;  %6193 = vmatmul.mubr.msk.bf16.vlgmr.msra.gmra.mrb[124].mxu1 %vm1522_vm2, %v3703_v15  ;;  %v3664_v44 = vpop.xlane.xlu0 %3663 }
 0x947   : > { %6203 = vmatpush3.bf16.msra.mxu1 %v8403_v57  ;;  %6204 = vmatprep.mubr.msk.bf16.mxu1 %vm7038_vm0, %v9056_v5  ;;  %6676 = vrcp.f32 %v3664_v44 }
 0x948   : > { %v6669_v48 = vpop.eup %6668  ;;  %v3704_v61 = vpack.c.bf16 %v3693_v19, %v3692_v21  ;;  %6214 = vmatprep.subr.bf16.mxu1 %v9056_v5 }
 0x949   : > { %v6671_v52 = vpop.eup %6670  ;;  %v3695_v31 = vmul.f32 %v6669_v48, %v8377_v11 }
 0x94a   : > { %v3694_v32 = vmul.f32 %v6671_v52, %v8379_v22  ;;  %6199 = vmatmul.mubr.msk.bf16.vlgmr.msra.gmra.mrb[96].mxu0 %vm1522_vm2, %v3704_v61  ;;  %v4136_v11 = vpop.permute.xlu0 %4135 }
 0x94b   : > { %6209 = vmatpush3.bf16.msra.mxu0 %v8428_v53  ;;  %6210 = vmatprep.mubr.msk.bf16.mxu0 %vm7038_vm0, %v9056_v5  ;;  %v4141_v53 = vsel %vm1145_vm1, %v4136_v11, 0 }
 0x94c   : > { %v6673_v3 = vpop.eup %6672  ;;  %v3705_v60 = vpack.c.bf16 %v3695_v31, %v3694_v32  ;;  %6220 = vmatprep.subr.bf16.mxu0 %v9056_v5 }
 0x94d   : > { %v6675_v57 = vpop.eup %6674  ;;  %v3697_v45 = vmul.f32 %v6673_v3, %v8385_v30 }
 0x94e   : > { %v3696_v59 = vmul.f32 %v6675_v57, %v8387_v12  ;;  %6205 = vmatmul.mubr.msk.bf16.vlgmr.msra.gmra.mrb[128].mxu1 %vm1522_vm2, %v3705_v60  ;;  %v4134_v30 = vpop.permute.xlu0 %4133  ;;  %v4187_v12 = vpop.permute.xlu1 %4186 }
 0x94f   : > { %6215 = vmatpush3.bf16.msra.mxu1 %v8432_v62  ;;  %6216 = vmatprep.mubr.msk.bf16.mxu1 %vm7038_vm0, %v9056_v5  ;;  %v4192_v56 = vsel %vm1145_vm1, %v4187_v12, 0 }
 0x950   : > { %v3706_v22 = vpack.c.bf16 %v3697_v45, %v3696_v59  ;;  %6226 = vmatprep.subr.bf16.mxu1 %v9056_v5 }
 0x951   : > { %v6677_v58 = vpop.eup %6676 }
 0x952   : > { %6211 = vmatmul.mubr.msk.bf16.vlgmr.msra.gmra.mrb[100].mxu0 %vm1522_vm2, %v3706_v22  ;;  %v4185_v62 = vpop.permute.xlu0 %4184  ;;  %v3698_v29 = vmul.f32 %v6677_v58, %v8393_v41 }
 0x953   : > { %6222 = vmatprep.mubr.msk.bf16.mxu0 %vm7038_vm0, %v9056_v5 }
 0x954   : > { %6221 = vmatpush3.bf16.xpose.msra.mxu0 %v4141_v53 }
 0x955   : > { %6232 = vmatprep.subr.bf16.mxu0 %v9056_v5 }
 0x956   : > { %v4236_v6 = vpop.permute.xlu0 %4235 }
 0x95a   : > { %v4287_v47 = vpop.permute.xlu0 %4286 }
 0x95b   : > { %6223 = vmatmul.mubr.msk.bf16.vlgmr.msra.gmra.mrb[104].mxu0 %vm1145_vm1, %v4134_v30 }
 0x95c   : > { %6234 = vmatprep.mubr.msk.bf16.mxu0 %vm7038_vm0, %v9056_v5 }
 0x95e   : > { %v4338_v35 = vpop.permute.xlu0 %4337 }
 0x962   : > { %v4389_v16 = vpop.permute.xlu0 %4388 }
 0x966   : > { %v4440_v7 = vpop.permute.xlu0 %4439 }
 0x976   : > { %v3667_v17 = vpop.xlane.xlu1 %3666 }
 0x977   : > { %6678 = vrcp.f32 %v3667_v17 }
 0x97a   : > { %v4238_v36 = vpop.permute.xlu1 %4237 }
 0x97b   : > { %v4243_v23 = vsel %vm1145_vm1, %v4238_v36, 0 }
 0x97c   : > { %6233 = vmatpush3.bf16.xpose.msra.mxu0 %v4243_v23 }
 0x97d   : > { %6244 = vmatprep.subr.bf16.mxu0 %v9056_v5 }
 0x97e   : > { %v4289_v8 = vpop.permute.xlu1 %4288 }
 0x97f   : > { %v4294_v49 = vsel %vm1145_vm1, %v4289_v8, 0 }
 0x981   : > { %v6679_v4 = vpop.eup %6678 }
 0x982   : > { %v3699_v34 = vmul.f32 %v6679_v4, %v8414_v43  ;;  %v4340_v40 = vpop.permute.xlu1 %4339 }
 0x983   : > { %v4345_v24 = vsel %vm1145_vm1, %v4340_v40, 0  ;;  %6235 = vmatmul.mubr.msk.bf16.vlgmr.msra.gmra.mrb[108].mxu0 %vm1145_vm1, %v4236_v6 }
 0x984   : > { %6245 = vmatpush3.bf16.xpose.msra.mxu0 %v4345_v24  ;;  %v3707_v20 = vpack.c.bf16 %v3699_v34, %v3698_v29  ;;  %6246 = vmatprep.mubr.msk.bf16.mxu0 %vm7038_vm0, %v9056_v5 }
 0x985   : > { %6256 = vmatprep.subr.bf16.mxu0 %v9056_v5 }
 0x986   : > { %6217 = vmatmul.mubr.msk.bf16.vlgmr.msra.gmra.mrb[132].mxu1 %vm1522_vm2, %v3707_v20  ;;  %v4391_v41 = vpop.permute.xlu1 %4390 }
 0x987   : > { %6227 = vmatpush3.bf16.xpose.msra.mxu1 %v4192_v56  ;;  %6228 = vmatprep.mubr.msk.bf16.mxu1 %vm7038_vm0, %v9056_v5  ;;  %v4396_v33 = vsel %vm1145_vm1, %v4391_v41, 0 }
 0x988   : > { %6238 = vmatprep.subr.bf16.mxu1 %v9056_v5 }
 0x98a   : > { %v4442_v43 = vpop.permute.xlu1 %4441 }
 0x98b   : > { %v4447_v18 = vsel %vm1145_vm1, %v4442_v43, 0  ;;  %6247 = vmatmul.mubr.msk.bf16.vlgmr.msra.gmra.mrb[112].mxu0 %vm1145_vm1, %v4338_v35 }
 0x98c   : > { %6257 = vmatpush3.bf16.xpose.msra.mxu0 %v4447_v18  ;;  %6258 = vmatprep.mubr.msk.bf16.mxu0 %vm7038_vm0, %v9056_v5 }
 0x98d   : > { %6268 = vmatprep.subr.bf16.mxu0 %v9056_v5 }
 0x98e   : > { %6229 = vmatmul.mubr.msk.bf16.vlgmr.msra.gmra.mrb[136].mxu1 %vm1145_vm1, %v4185_v62  ;;  %v4493_v27 = vpop.permute.xlu1 %4492 }
 0x98f   : > { %6239 = vmatpush3.bf16.xpose.msra.mxu1 %v4294_v49  ;;  %6240 = vmatprep.mubr.msk.bf16.mxu1 %vm7038_vm0, %v9056_v5  ;;  %v4498_v38 = vsel %vm1145_vm1, %v4493_v27, 0 }
 0x990   : > { %6250 = vmatprep.subr.bf16.mxu1 %v9056_v5 }
 0x992   : > { %v4491_v42 = vpop.permute.xlu1 %4490 }
 0x993   : > { %6259 = vmatmul.mubr.msk.bf16.vlgmr.msra.gmra.mrb[116].mxu0 %vm1145_vm1, %v4440_v7 }
 0x994   : > { %6270 = vmatprep.mubr.msk.bf16.mxu0 %vm7038_vm0, %v9056_v5 }
 0x996   : > { %6241 = vmatmul.mubr.msk.bf16.vlgmr.msra.gmra.mrb[140].mxu1 %vm1145_vm1, %v4287_v47 }
 0x997   : > { %6251 = vmatpush3.bf16.xpose.msra.mxu1 %v4396_v33  ;;  %6252 = vmatprep.mubr.msk.bf16.mxu1 %vm7038_vm0, %v9056_v5 }
 0x998   : > { %6262 = vmatprep.subr.bf16.mxu1 %v9056_v5 }
 0x99e   : > { %6253 = vmatmul.mubr.msk.bf16.vlgmr.msra.gmra.mrb[144].mxu1 %vm1145_vm1, %v4389_v16 }
 0x99f   : > { %6263 = vmatpush3.bf16.xpose.msra.mxu1 %v4498_v38  ;;  %6264 = vmatprep.mubr.msk.bf16.mxu1 %vm7038_vm0, %v9056_v5 }
 0x9a0   : > { %6274 = vmatprep.subr.bf16.mxu1 %v9056_v5 }
 0x9a6   : > { %6265 = vmatmul.mubr.msk.bf16.vlgmr.msra.gmra.mrb[148].mxu1 %vm1145_vm1, %v4491_v42 }
 0x9a7   : > { %6276 = vmatprep.mubr.msk.bf16.mxu1 %vm7038_vm0, %v9056_v5 }
 0x9f0   : > { %v8531_v63 = vpop.f32.mrb[88].mxu0 }
 0x9f1   : > { %v6176_v51 = vpop.f32.mrb[89].mxu0 }
 0x9f2   : > { %v8533_v15 = vpop.f32.mrb[90].mxu0 }
 0x9f3   : > { %v4084_v9 = vpack.c.bf16 %v8533_v15, %v8531_v63  ;;  %v6177_v19 = vpop.f32.mrb[91].mxu0  ;;  %v9059_v63 = vpack.c.bf16 %v8214_v2, %v8212_v10  ;;  %v9062_v2 = vld [vmem:[#allocation29_spill] sm:$0xff] }
 0x9f4   : > { %v8537_v21 = vpop.f32.mrb[120].mxu1 }
 0x9f5   : > { %v6182_v48 = vpop.f32.mrb[121].mxu1 }
 0x9f6   : > { %v8539_v61 = vpop.f32.mrb[122].mxu1 }
 0x9f7   : > { %v4085_v52 = vpack.c.bf16 %v8539_v61, %v8537_v21  ;;  %v6183_v31 = vpop.f32.mrb[123].mxu1  ;;  %v9066_v21 = vld [vmem:[#allocation30_spill] sm:$0xff] }
 0xa14   : > { %v8543_v32 = vpop.f32.mrb[92].mxu0 }
 0xa15   : > { %v6188_v44 = vpop.f32.mrb[93].mxu0 }
 0xa16   : > { %v8545_v3 = vpop.f32.mrb[94].mxu0 }
 0xa17   : > { %v4086_v60 = vpack.c.bf16 %v8545_v3, %v8543_v32  ;;  %v6189_v57 = vpop.f32.mrb[95].mxu0  ;;  %v9063_v32 = vld [vmem:[#allocation28_spill] sm:$0xff] }
 0xa18   : > { %v9064_v3 = vpack.c.bf16 %v9062_v2, %v9063_v32 }
 0xa19   : > { %v8549_v45 = vpop.f32.mrb[124].mxu1 }
 0xa1a   : > { %v6194_v59 = vpop.f32.mrb[125].mxu1 }
 0xa1b   : > { %v8551_v11 = vpop.f32.mrb[126].mxu1 }
 0xa1c   : > { %v4087_v22 = vpack.c.bf16 %v8551_v11, %v8549_v45  ;;  %v6195_v53 = vpop.f32.mrb[127].mxu1 }
 0xa1d   : > { %v8555_v30 = vpop.f32.mrb[96].mxu0 }
 0xa1e   : > { %v6200_v12 = vpop.f32.mrb[97].mxu0 }
 0xa1f   : > { %v8557_v62 = vpop.f32.mrb[98].mxu0 }
 0xa20   : > { %v4088_v17 = vpack.c.bf16 %v8557_v62, %v8555_v30  ;;  %v6201_v6 = vpop.f32.mrb[99].mxu0 }
 0xa21   : > { %v8561_v36 = vpop.f32.mrb[128].mxu1 }
 0xa22   : > { %v6206_v23 = vpop.f32.mrb[129].mxu1 }
 0xa23   : > { %v8563_v8 = vpop.f32.mrb[130].mxu1 }
 0xa24   : > { %v4089_v58 = vpack.c.bf16 %v8563_v8, %v8561_v36  ;;  %v6207_v47 = vpop.f32.mrb[131].mxu1  ;;  %v9071_v8 = vld [vmem:[#allocation35_spill] sm:$0xff] }
 0xa25   : > { %v8567_v4 = vpop.f32.mrb[100].mxu0 }
 0xa26   : > { %v6212_v29 = vpop.f32.mrb[101].mxu0 }
 0xa27   : > { %v8569_v34 = vpop.f32.mrb[102].mxu0 }
 0xa28   : > { %v4090_v40 = vpack.c.bf16 %v8569_v34, %v8567_v4  ;;  %v6213_v24 = vpop.f32.mrb[103].mxu0 }
 0xa2e   : > { %v8573_v20 = vpop.f32.mrb[104].mxu0 }
 0xa2f   : > { %v6224_v56 = vpop.f32.mrb[105].mxu0  ;;  %v4541_v35 = vsel %vm1522_vm2, %v8573_v20, -inf }
 0xa30   : > { %4542 = vmax.xlane.f32.xlu0 %v4541_v35  ;;  %v8577_v41 = vpop.f32.mrb[106].mxu0 }
 0xa31   : > { %v6225_v43 = vpop.f32.mrb[107].mxu0  ;;  %v4544_v18 = vsel %vm1522_vm2, %v8577_v41, -inf }
 0xa32   : > { %4545 = vmax.xlane.f32.xlu1 %v4544_v18 }
 0xa56   : > { %v8581_v16 = vpop.f32.mrb[108].mxu0 }
 0xa57   : > { %v6236_v49 = vpop.f32.mrb[109].mxu0 }
 0xa58   : > { %v8583_v7 = vpop.f32.mrb[110].mxu0 }
 0xa59   : > { %v8585_v33 = vpop.f32.mrb[132].mxu1  ;;  %v6237_v27 = vpop.f32.mrb[111].mxu0  ;;  %v4556_v38 = vsel %vm1522_vm2, %v8583_v7, -inf }
 0xa5a   : > { %4557 = vmax.xlane.f32.xlu1 %v4556_v38  ;;  %v6218_v42 = vpop.f32.mrb[133].mxu1  ;;  %v4553_v27 = vsel %vm1522_vm2, %v8581_v16, -inf }
 0xa5b   : > { %v8589_v51 = vpop.f32.mrb[134].mxu1 }
 0xa5c   : > { %v6219_v48 = vpop.f32.mrb[135].mxu1 }
 0xa5e   : > { %v8593_v31 = vpop.f32.mrb[112].mxu0 }
 0xa5f   : > { %v6248_v44 = vpop.f32.mrb[113].mxu0 }
 0xa60   : > { %v8595_v57 = vpop.f32.mrb[114].mxu0 }
 0xa61   : > { %v8597_v59 = vpop.f32.mrb[136].mxu1  ;;  %v6249_v53 = vpop.f32.mrb[115].mxu0 }
 0xa62   : > { %v6230_v12 = vpop.f32.mrb[137].mxu1  ;;  %v4547_v6 = vsel %vm1522_vm2, %v8597_v59, -inf  ;;  %v4568_v53 = vsel %vm1522_vm2, %v8595_v57, -inf }
 0xa63   : > { %4548 = vmax.xlane.f32.xlu0 %v4547_v6  ;;  %v8601_v23 = vpop.f32.mrb[138].mxu1 }
 0xa64   : > { %v6231_v47 = vpop.f32.mrb[139].mxu1  ;;  %v4550_v24 = vsel %vm1522_vm2, %v8601_v23, -inf }
 0xa65   : > { %v4565_v47 = vsel %vm1522_vm2, %v8593_v31, -inf }
 0xa66   : > { %v8603_v29 = vpop.f32.mrb[116].mxu0 }
 0xa67   : > { %v6260_v56 = vpop.f32.mrb[117].mxu0  ;;  %4551 = vmax.xlane.f32.xlu0 %v4550_v24 }
 0xa68   : > { %v8607_v35 = vpop.f32.mrb[118].mxu0 }
 0xa69   : > { %v8609_v43 = vpop.f32.mrb[140].mxu1  ;;  %v6261_v18 = vpop.f32.mrb[119].mxu0 }
 0xa6a   : > { %v6242_v49 = vpop.f32.mrb[141].mxu1  ;;  %v4559_v44 = vsel %vm1522_vm2, %v8609_v43, -inf }
 0xa6b   : > { %4554 = vmax.xlane.f32.xlu0 %v4553_v27  ;;  %v8613_v38 = vpop.f32.mrb[142].mxu1  ;;  %v4580_v27 = vsel %vm1522_vm2, %v8607_v35, -inf }
 0xa6c   : > { %v6243_v42 = vpop.f32.mrb[143].mxu1  ;;  %v4562_v48 = vsel %vm1522_vm2, %v8613_v38, -inf }
 0xa6d   : > { %4563 = vmax.xlane.f32.xlu1 %v4562_v48 }
 0xa6f   : > { %4560 = vmax.xlane.f32.xlu0 %v4559_v44  ;;  %v4577_v44 = vsel %vm1522_vm2, %v8603_v29, -inf }
 0xa71   : > { %4569 = vmax.xlane.f32.xlu1 %v4568_v53  ;;  %v8621_v12 = vpop.f32.mrb[144].mxu1 }
 0xa72   : > { %v6254_v6 = vpop.f32.mrb[145].mxu1  ;;  %v4571_v49 = vsel %vm1522_vm2, %v8621_v12, -inf }
 0xa73   : > { %4566 = vmax.xlane.f32.xlu0 %v4565_v47  ;;  %v8625_v24 = vpop.f32.mrb[146].mxu1 }
 0xa74   : > { %v6255_v56 = vpop.f32.mrb[147].mxu1  ;;  %v4574_v18 = vsel %vm1522_vm2, %v8625_v24, -inf }
 0xa75   : > { %4575 = vmax.xlane.f32.xlu1 %v4574_v18 }
 0xa77   : > { %4572 = vmax.xlane.f32.xlu0 %v4571_v49 }
 0xa79   : > { %4581 = vmax.xlane.f32.xlu1 %v4580_v27  ;;  %v8633_v42 = vpop.f32.mrb[148].mxu1 }
 0xa7a   : > { %v6266_v48 = vpop.f32.mrb[149].mxu1  ;;  %v4583_v47 = vsel %vm1522_vm2, %v8633_v42, -inf }
 0xa7b   : > { %4578 = vmax.xlane.f32.xlu0 %v4577_v44  ;;  %v8637_v53 = vpop.f32.mrb[150].mxu1 }
 0xa7c   : > { %v6267_v6 = vpop.f32.mrb[151].mxu1  ;;  %v4586_v56 = vsel %vm1522_vm2, %v8637_v53, -inf }
 0xa7f   : > { %4584 = vmax.xlane.f32.xlu0 %v4583_v47 }
 0xa8a   : > { %4772 = vrot.lane.b32.xlu1 %v7597_v13, %s7041_s12 }
 0xa8e   : > { %4819 = vrot.lane.b32.xlu1 %v7607_v28, %s7041_s12 }
 0xa92   : > { %4866 = vrot.lane.b32.xlu1 %v7605_v26, %s7041_s12 }
 0xa95   : > { %4725 = vrot.lane.b32.xlu0 %v7599_v14, %s7041_s12 }
 0xa99   : > { %4913 = vrot.lane.b32.xlu0 %v7611_v46, %s7041_s12 }
 0xab6   : > { %4587 = vmax.xlane.f32.xlu1 %v4586_v56 }
 0xabd   : > { %v4543_v18 = vpop.xlane.xlu0 %4542 }
 0xabe   : > { %v4589_v49 = vsub.f32 %v8573_v20, %v4543_v18 }
 0xabf   : > { %v4546_v26 = vpop.xlane.xlu1 %4545 }
 0xac0   : > { %v4605_v13 = vmul.f32 1.442695, %v4589_v49  ;;  %v4590_v46 = vsub.f32 %v8577_v41, %v4546_v26 }
 0xac2   : > { %6680 = vpow2.f32 %v4605_v13  ;;  %v4607_v27 = vmul.f32 1.442695, %v4590_v46 }
 0xac4   : > { %6682 = vpow2.f32 %v4607_v27 }
 0xac7   : > { %4960 = vrot.lane.b32.xlu1 %v7609_v39, %s7041_s12 }
 0xacc   : > { %v8656_v28 = vpop.eup %6680 }
 0xacd   : > { %v4637_v14 = vsel %vm1522_vm2, %v8656_v28, 0.0 }
 0xace   : > { %4638 = vadd.xlane.f32.xlu0 %v4637_v14  ;;  %v8661_v48 = vpop.eup %6682 }
 0xacf   : > { %v4640_v20 = vsel %vm1522_vm2, %v8661_v48, 0.0 }
 0xae7   : > { %v4558_v44 = vpop.xlane.xlu1 %4557 }
 0xae8   : > { %v4594_v47 = vsub.f32 %v8583_v7, %v4558_v44 }
 0xaea   : > { %v4615_v41 = vmul.f32 1.442695, %v4594_v47 }
 0xaeb   : > { %4641 = vadd.xlane.f32.xlu1 %v4640_v20 }
 0xaf0   : > { %v4549_v6 = vpop.xlane.xlu0 %4548 }
 0xaf1   : > { %v4591_v39 = vsub.f32 %v8597_v59, %v4549_v6 }
 0xaf3   : > { %v4609_v56 = vmul.f32 1.442695, %v4591_v39 }
 0xaf4   : > { %v4552_v18 = vpop.xlane.xlu0 %4551 }
 0xaf5   : > { %6684 = vpow2.f32 %v4609_v56  ;;  %v4592_v49 = vsub.f32 %v8601_v23, %v4552_v18 }
 0xaf7   : > { %v4611_v13 = vmul.f32 1.442695, %v4592_v49 }
 0xaf8   : > { %v4555_v14 = vpop.xlane.xlu0 %4554 }
 0xaf9   : > { %6686 = vpow2.f32 %v4611_v13  ;;  %v4593_v26 = vsub.f32 %v8581_v16, %v4555_v14 }
 0xafa   : > { %v4564_v46 = vpop.xlane.xlu1 %4563  ;;  %6688 = vpow2.f32 %v4615_v41 }
 0xafb   : > { %v4613_v27 = vmul.f32 1.442695, %v4593_v26  ;;  %v4596_v20 = vsub.f32 %v8613_v38, %v4564_v46 }
 0xafc   : > { %v4561_v19 = vpop.xlane.xlu0 %4560 }
 0xafd   : > { %6690 = vpow2.f32 %v4613_v27  ;;  %v4619_v59 = vmul.f32 1.442695, %v4596_v20  ;;  %v4595_v7 = vsub.f32 %v8609_v43, %v4561_v19 }
 0xafe   : > { %v4570_v44 = vpop.xlane.xlu1 %4569 }
 0xaff   : > { %v8671_v6 = vpop.eup %6684  ;;  %6692 = vpow2.f32 %v4619_v59  ;;  %v4617_v23 = vmul.f32 1.442695, %v4595_v7  ;;  %v4598_v39 = vsub.f32 %v8595_v57, %v4570_v44 }
 0xb00   : > { %v4567_v47 = vpop.xlane.xlu0 %4566  ;;  %v4643_v16 = vsel %vm1522_vm2, %v8671_v6, 0.0 }
 0xb01   : > { %6694 = vpow2.f32 %v4617_v23  ;;  %v4623_v56 = vmul.f32 1.442695, %v4598_v39  ;;  %v4597_v38 = vsub.f32 %v8593_v31, %v4567_v47  ;;  %4644 = vadd.xlane.f32.xlu0 %v4643_v16 }
 0xb02   : > { %v4576_v18 = vpop.xlane.xlu1 %4575 }
 0xb03   : > { %v8677_v49 = vpop.eup %6686  ;;  %v4621_v19 = vmul.f32 1.442695, %v4597_v38  ;;  %v4600_v43 = vsub.f32 %v8625_v24, %v4576_v18  ;;  %6696 = vpow2.f32 %v4623_v56 }
 0xb04   : > { %v4573_v41 = vpop.xlane.xlu0 %4572  ;;  %v4646_v57 = vsel %vm1522_vm2, %v8677_v49, 0.0  ;;  %v8682_v13 = vpop.eup %6688 }
 0xb05   : > { %6698 = vpow2.f32 %v4621_v19  ;;  %v4627_v14 = vmul.f32 1.442695, %v4600_v43  ;;  %v4599_v26 = vsub.f32 %v8621_v12, %v4573_v41  ;;  %4647 = vadd.xlane.f32.xlu1 %v4646_v57  ;;  %v4652_v7 = vsel %vm1522_vm2, %v8682_v13, 0.0 }
 0xb06   : > { %v4582_v31 = vpop.xlane.xlu1 %4581 }
 0xb07   : > { %v8685_v46 = vpop.eup %6690  ;;  %v4625_v27 = vmul.f32 1.442695, %v4599_v26  ;;  %v4602_v20 = vsub.f32 %v8607_v35, %v4582_v31  ;;  %6700 = vpow2.f32 %v4627_v14 }
 0xb08   : > { %v4579_v24 = vpop.xlane.xlu0 %4578  ;;  %v4649_v59 = vsel %vm1522_vm2, %v8685_v46, 0.0 }
 0xb09   : > { %v8692_v44 = vpop.eup %6692  ;;  %6702 = vpow2.f32 %v4625_v27  ;;  %v4631_v23 = vmul.f32 1.442695, %v4602_v20  ;;  %v4601_v12 = vsub.f32 %v8603_v29, %v4579_v24  ;;  %4650 = vadd.xlane.f32.xlu0 %v4649_v59  ;;  %4653 = vadd.xlane.f32.xlu1 %v4652_v7 }
 0xb0a   : > { %v4773_v39 = vpop.permute.xlu1 %4772  ;;  %v4658_v38 = vsel %vm1522_vm2, %v8692_v44, 0.0 }
 0xb0b   : > { %v8695_v47 = vpop.eup %6694  ;;  %v4629_v35 = vmul.f32 1.442695, %v4601_v12  ;;  %6275 = vmatpush3.bf16.msra.mxu1 %v4773_v39  ;;  %6704 = vpow2.f32 %v4631_v23  ;;  %v9057_v39 = vpack.c.bf16 %v8190_v50, %v8188_v1 }
 0xb0c   : > { %v4585_v16 = vpop.xlane.xlu0 %4584  ;;  %v4655_v56 = vsel %vm1522_vm2, %v8695_v47, 0.0  ;;  %6286 = vmatprep.subr.bf16.mxu1 %v9056_v5 }
 0xb0d   : > { %6706 = vpow2.f32 %v4629_v35  ;;  %v4603_v29 = vsub.f32 %v8633_v42, %v4585_v16  ;;  %4656 = vadd.xlane.f32.xlu0 %v4655_v56  ;;  %4659 = vadd.xlane.f32.xlu1 %v4658_v38  ;;  %v8703_v18 = vpop.eup %6696  ;;  %v9058_v56 = vpack.c.bf16 %v8202_v0, %v8200_v25  ;;  %v9060_v0 = vld [vmem:[#allocation27_spill] sm:$0xff] }
 0xb0e   : > { %v4664_v14 = vsel %vm1522_vm2, %v8703_v18, 0.0  ;;  %v4820_v35 = vpop.permute.xlu1 %4819 }
 0xb0f   : > { %v8705_v19 = vpop.eup %6698  ;;  %v4633_v43 = vmul.f32 1.442695, %v4603_v29 }
 0xb10   : > { %v4726_v41 = vpop.permute.xlu0 %4725  ;;  %v4661_v57 = vsel %vm1522_vm2, %v8705_v19, 0.0 }
 0xb11   : > { %6708 = vpow2.f32 %v4633_v43  ;;  %4662 = vadd.xlane.f32.xlu0 %v4661_v57  ;;  %6269 = vmatpush3.bf16.msra.mxu0 %v4726_v41  ;;  %v8711_v26 = vpop.eup %6700 }
 0xb12   : > { %4665 = vadd.xlane.f32.xlu1 %v4664_v14  ;;  %6280 = vmatprep.subr.bf16.mxu0 %v9056_v5  ;;  %v4670_v27 = vsel %vm1522_vm2, %v8711_v26, 0.0  ;;  %v4867_v16 = vpop.permute.xlu1 %4866 }
 0xb13   : > { %v8714_v42 = vpop.eup %6702 }
 0xb14   : > { %v4667_v31 = vsel %vm1522_vm2, %v8714_v42, 0.0  ;;  %v4914_v10 = vpop.permute.xlu0 %4913 }
 0xb15   : > { %4668 = vadd.xlane.f32.xlu0 %v4667_v31  ;;  %v8720_v20 = vpop.eup %6704 }
 0xb16   : > { %4671 = vadd.xlane.f32.xlu1 %v4670_v27  ;;  %v4676_v7 = vsel %vm1522_vm2, %v8720_v20, 0.0 }
 0xb17   : > { %v8722_v24 = vpop.eup %6706 }
 0xb18   : > { %v4673_v59 = vsel %vm1522_vm2, %v8722_v24, 0.0 }
 0xb19   : > { %4674 = vadd.xlane.f32.xlu0 %v4673_v59 }
 0xb1a   : > { %4677 = vadd.xlane.f32.xlu1 %v4676_v7 }
 0xb1b   : > { %v8728_v23 = vpop.eup %6708 }
 0xb1c   : > { %v4679_v12 = vsel %vm1522_vm2, %v8728_v23, 0.0 }
 0xb1d   : > { %4680 = vadd.xlane.f32.xlu0 %v4679_v12 }
 0xb33   : > { %5007 = vrot.lane.b32.xlu0 %v7615_v55, %s7041_s12 }
 0xb37   : > { %3083 = vrot.lane.b32.xlu0 %v9057_v39, %s7041_s12 }
 0xb3b   : > { %4100 = vrot.lane.b32.xlu0 %v4084_v9, %s7040_s10  ;;  %v9061_v9 = vpack.c.bf16 %v8196_v37, %v9060_v0  ;;  %v9065_v37 = vld [vmem:[#allocation31_spill] sm:$0xff] }
 0xb3c   : > { %v9067_v61 = vpack.c.bf16 %v9065_v37, %v9066_v21 }
 0xb3f   : > { %3087 = vrot.lane.b32.xlu0 %v9058_v56, %s7041_s12 }
 0xb43   : > { %4104 = vrot.lane.b32.xlu0 %v4086_v60, %s7040_s10  ;;  %v4588_v55 = vpop.xlane.xlu1 %4587 }
 0xb44   : > { %v4604_v1 = vsub.f32 %v8637_v53, %v4588_v55 }
 0xb46   : > { %v4635_v50 = vmul.f32 1.442695, %v4604_v1 }
 0xb47   : > { %3091 = vrot.lane.b32.xlu0 %v9059_v63, %s7041_s12  ;;  %v8773_v60 = vpop.permute.xlu1 %4960 }
 0xb48   : > { %6710 = vpow2.f32 %v4635_v50 }
 0xb52   : > { %v8755_v15 = vpop.eup %6710 }
 0xb53   : > { %v4682_v25 = vsel %vm1522_vm2, %v8755_v15, 0.0 }
 0xb54   : > { %4683 = vadd.xlane.f32.xlu1 %v4682_v25 }
 0xb5b   : > { %v4639_v53 = vpop.xlane.xlu0 %4638 }
 0xb5c   : > { %6712 = vrcp.f32 %v4639_v53 }
 0xb65   : > { %5054 = vrot.lane.b32.xlu1 %v7613_v54, %s7041_s12 }
 0xb69   : > { %3085 = vrot.lane.b32.xlu1 %v9061_v9, %s7041_s12 }
 0xb6d   : > { %4102 = vrot.lane.b32.xlu1 %v4085_v52, %s7040_s10  ;;  %v6713_v52 = vpop.eup %6712 }
 0xb6e   : > { %v4701_v29 = vmul.f32 %v6713_v52, %v8656_v28 }
 0xb71   : > { %3089 = vrot.lane.b32.xlu1 %v9064_v3, %s7041_s12 }
 0xb75   : > { %4106 = vrot.lane.b32.xlu1 %v4087_v22, %s7040_s10 }
 0xb78   : > { %v4642_v54 = vpop.xlane.xlu1 %4641 }
 0xb79   : > { %6714 = vrcp.f32 %v4642_v54  ;;  %3093 = vrot.lane.b32.xlu1 %v9067_v61, %s7041_s12 }
 0xb83   : > { %v6715_v38 = vpop.eup %6714 }
 0xb84   : > { %v4702_v43 = vmul.f32 %v6715_v38, %v8661_v48 }
 0xb86   : > { %v4717_v41 = vpack.c.bf16 %v4702_v43, %v4701_v29 }
 0xb88   : > { %6271 = vmatmul.mubr.msk.bf16.vlgmr.msra.gmra.mrb[120].mxu0 %vm1522_vm2, %v4717_v41 }
 0xb89   : > { %6281 = vmatpush3.bf16.msra.mxu0 %v4820_v35  ;;  %6282 = vmatprep.mubr.msk.bf16.mxu0 %vm7038_vm0, %v9056_v5 }
 0xb8a   : > { %6292 = vmatprep.subr.bf16.mxu0 %v9056_v5 }
 0xb8e   : > { %v4645_v45 = vpop.xlane.xlu0 %4644 }
 0xb8f   : > { %6716 = vrcp.f32 %v4645_v45 }
 0xb92   : > { %v4648_v11 = vpop.xlane.xlu1 %4647 }
 0xb93   : > { %6718 = vrcp.f32 %v4648_v11 }
 0xb96   : > { %v4651_v22 = vpop.xlane.xlu0 %4650  ;;  %v4654_v57 = vpop.xlane.xlu1 %4653 }
 0xb97   : > { %6720 = vrcp.f32 %v4651_v22 }
 0xb98   : > { %6722 = vrcp.f32 %v4654_v57 }
 0xb99   : > { %v6717_v48 = vpop.eup %6716 }
 0xb9a   : > { %v4657_v28 = vpop.xlane.xlu0 %4656  ;;  %v4660_v14 = vpop.xlane.xlu1 %4659  ;;  %v4703_v27 = vmul.f32 %v6717_v48, %v8671_v6 }
 0xb9b   : > { %6724 = vrcp.f32 %v4657_v28 }
 0xb9c   : > { %6726 = vrcp.f32 %v4660_v14 }
 0xb9d   : > { %v6719_v31 = vpop.eup %6718 }
 0xb9e   : > { %v4704_v59 = vmul.f32 %v6719_v31, %v8677_v49  ;;  %v4663_v7 = vpop.xlane.xlu0 %4662 }
 0xb9f   : > { %6728 = vrcp.f32 %v4663_v7  ;;  %v4666_v12 = vpop.xlane.xlu1 %4665  ;;  %v6480_v7 = vld [vmem:[#allocation14] sm:$0xff]  }
 0xba0   : > { %6730 = vrcp.f32 %v4666_v12  ;;  %v4718_v39 = vpack.c.bf16 %v4704_v59, %v4703_v27  ;;  %v6482_v12 = vld [vmem:[#allocation14 + $0x10] sm:$0xff]  }
 0xba1   : > { %v6721_v35 = vpop.eup %6720 }
 0xba2   : > { %v6723_v56 = vpop.eup %6722  ;;  %v4705_v55 = vmul.f32 %v6721_v35, %v8685_v46  ;;  %v4669_v1 = vpop.xlane.xlu0 %4668  ;;  %6277 = vmatmul.mubr.msk.bf16.vlgmr.msra.gmra.mrb[152].mxu1 %vm1522_vm2, %v4718_v39  ;;  %v6483_v39 = vld [vmem:[#allocation14 + $0x18] sm:$0xff]  }
 0xba3   : > { %v4706_v50 = vmul.f32 %v6723_v56, %v8682_v13  ;;  %6732 = vrcp.f32 %v4669_v1  ;;  %6287 = vmatpush3.bf16.msra.mxu1 %v4867_v16  ;;  %v4672_v63 = vpop.xlane.xlu1 %4671  ;;  %6288 = vmatprep.mubr.msk.bf16.mxu1 %vm7038_vm0, %v9056_v5 }
 0xba4   : > { %6734 = vrcp.f32 %v4672_v63  ;;  %6298 = vmatprep.subr.bf16.mxu1 %v9056_v5  ;;  %v6485_v63 = vld [vmem:[#allocation14 + $0x28] sm:$0xff]  }
 0xba5   : > { %v6725_v6 = vpop.eup %6724  ;;  %v4719_v49 = vpack.c.bf16 %v4706_v50, %v4705_v55  ;;  %v6484_v50 = vld [vmem:[#allocation14 + $0x20] sm:$0xff]  }
 0xba6   : > { %v6727_v25 = vpop.eup %6726  ;;  %v4707_v0 = vmul.f32 %v6725_v6, %v8695_v47  ;;  %v4675_v46 = vpop.xlane.xlu0 %4674  ;;  %v6486_v6 = vld [vmem:[#allocation14 + $0x30] sm:$0xff]  }
 0xba7   : > { %v4708_v9 = vmul.f32 %v6727_v25, %v8692_v44  ;;  %6736 = vrcp.f32 %v4675_v46  ;;  %6283 = vmatmul.mubr.msk.bf16.vlgmr.msra.gmra.mrb[124].mxu0 %vm1522_vm2, %v4719_v49  ;;  %v4678_v13 = vpop.xlane.xlu1 %4677  ;;  %v6487_v49 = vld [vmem:[#allocation14 + $0x38] sm:$0xff]  }
 0xba8   : > { %6293 = vmatpush3.bf16.msra.mxu0 %v4914_v10  ;;  %6738 = vrcp.f32 %v4678_v13  ;;  %6294 = vmatprep.mubr.msk.bf16.mxu0 %vm7038_vm0, %v9056_v5 }
 0xba9   : > { %v6729_v16 = vpop.eup %6728  ;;  %v4720_v2 = vpack.c.bf16 %v4708_v9, %v4707_v0  ;;  %6304 = vmatprep.subr.bf16.mxu0 %v9056_v5 }
 0xbaa   : > { %v6731_v32 = vpop.eup %6730  ;;  %v4709_v3 = vmul.f32 %v6729_v16, %v8705_v19  ;;  %v4681_v47 = vpop.xlane.xlu0 %4680 }
 0xbab   : > { %v4710_v53 = vmul.f32 %v6731_v32, %v8703_v18  ;;  %6289 = vmatmul.mubr.msk.bf16.vlgmr.msra.gmra.mrb[156].mxu1 %vm1522_vm2, %v4720_v2  ;;  %6740 = vrcp.f32 %v4681_v47 }
 0xbac   : > { %6299 = vmatpush3.bf16.msra.mxu1 %v8773_v60  ;;  %6300 = vmatprep.mubr.msk.bf16.mxu1 %vm7038_vm0, %v9056_v5 }
 0xbad   : > { %v6733_v44 = vpop.eup %6732  ;;  %v4721_v10 = vpack.c.bf16 %v4710_v53, %v4709_v3  ;;  %6310 = vmatprep.subr.bf16.mxu1 %v9056_v5 }
 0xbae   : > { %v6735_v54 = vpop.eup %6734  ;;  %v4711_v37 = vmul.f32 %v6733_v44, %v8714_v42  ;;  %v5008_v21 = vpop.permute.xlu0 %5007 }
 0xbaf   : > { %v4712_v19 = vmul.f32 %v6735_v54, %v8711_v26  ;;  %6295 = vmatmul.mubr.msk.bf16.vlgmr.msra.gmra.mrb[128].mxu0 %vm1522_vm2, %v4721_v10  ;;  %v9068_v54 = vld [vmem:[#allocation33_spill] sm:$0xff] }
 0xbb0   : > { %6305 = vmatpush3.bf16.msra.mxu0 %v5008_v21  ;;  %6306 = vmatprep.mubr.msk.bf16.mxu0 %vm7038_vm0, %v9056_v5 }
 0xbb1   : > { %v6737_v18 = vpop.eup %6736  ;;  %v4722_v60 = vpack.c.bf16 %v4712_v19, %v4711_v37  ;;  %6316 = vmatprep.subr.bf16.mxu0 %v6480_v7  ;;  %v9069_v37 = vld [vmem:[#allocation32_spill] sm:$0xff] }
 0xbb2   : > { %v6739_v61 = vpop.eup %6738  ;;  %v4713_v52 = vmul.f32 %v6737_v18, %v8722_v24  ;;  %v3084_v38 = vpop.permute.xlu0 %3083  ;;  %v9070_v21 = vpack.c.bf16 %v9068_v54, %v9069_v37 }
 0xbb3   : > { %v4714_v29 = vmul.f32 %v6739_v61, %v8720_v20  ;;  %3108 = vst.msk [vmem:[#allocation2] sm:$0xff] %vm3107_vm3, %v3084_v38  ;;  %6301 = vmatmul.mubr.msk.bf16.vlgmr.msra.gmra.mrb[160].mxu1 %vm1522_vm2, %v4722_v60 }
 0xbb4   : > { %6312 = vmatprep.mubr.msk.bf16.mxu1 %vm7038_vm0, %v9056_v5 }
 0xbb5   : > { %v4723_v26 = vpack.c.bf16 %v4714_v29, %v4713_v52  ;;  %v6741_v11 = vpop.eup %6740 }
 0xbb6   : > { %v4101_v42 = vpop.permute.xlu0 %4100  ;;  %v4715_v57 = vmul.f32 %v6741_v11, %v8728_v23  ;;  %v6481_v23 = vld [vmem:[#allocation14 + $0x8] sm:$0xff]  }
 0xbb7   : > { %4125 = vst.msk [vmem:[#allocation2] sm:$0xff] %vm4124_vm4, %v4101_v42  ;;  %6307 = vmatmul.mubr.msk.bf16.vlgmr.msra.gmra.mrb[132].mxu0 %vm1522_vm2, %v4723_v26 }
 0xbb8   : > { %6317 = vmatpush3.bf16.msra.mxu0 %v6480_v7 }
 0xbb9   : > { %6318 = vmatprep.subr.bf16.mxu0 %v6481_v23 }
 0xbba   : > { %v3088_v43 = vpop.permute.xlu0 %3087 }
 0xbbb   : > { %3110 = vst.msk [vmem:[#allocation2 + $0x10] sm:$0xff] %vm3107_vm3, %v3088_v43 }
 0xbbc   : > { %6319 = vmatpush3.bf16.msra.mxu0 %v6481_v23 }
 0xbbd   : > { %6320 = vmatprep.subr.bf16.mxu0 %v6482_v12 }
 0xbbe   : > { %v4105_v24 = vpop.permute.xlu0 %4104 }
 0xbbf   : > { %4127 = vst.msk [vmem:[#allocation2 + $0x10] sm:$0xff] %vm4124_vm4, %v4105_v24 }
 0xbc0   : > { %6321 = vmatpush3.bf16.msra.mxu0 %v6482_v12 }
 0xbc1   : > { %6322 = vmatprep.subr.bf16.mxu0 %v6483_v39 }
 0xbc2   : > { %v3092_v20 = vpop.permute.xlu0 %3091 }
 0xbc3   : > { %3112 = vst.msk [vmem:[#allocation2 + $0x20] sm:$0xff] %vm3107_vm3, %v3092_v20 }
 0xbc4   : > { %6323 = vmatpush3.bf16.msra.mxu0 %v6483_v39 }
 0xbc5   : > { %6324 = vmatprep.subr.bf16.mxu0 %v6484_v50 }
 0xbc8   : > { %6325 = vmatpush3.bf16.msra.mxu0 %v6484_v50 }
 0xbc9   : > { %6326 = vmatprep.subr.bf16.mxu0 %v6485_v63 }
 0xbcc   : > { %6327 = vmatpush3.bf16.msra.mxu0 %v6485_v63 }
 0xbcd   : > { %6328 = vmatprep.subr.bf16.mxu0 %v6486_v6 }
 0xbd0   : > { %6329 = vmatpush3.bf16.msra.mxu0 %v6486_v6 }
 0xbd1   : > { %6330 = vmatprep.subr.bf16.mxu0 %v6487_v49 }
 0xbd4   : > { %6331 = vmatpush3.bf16.msra.mxu0 %v6487_v49 }
 0xbe1   : > { %v4684_v41 = vpop.xlane.xlu1 %4683 }
 0xbe2   : > { %6742 = vrcp.f32 %v4684_v41 }
 0xbe5   : > { %v5055_v45 = vpop.permute.xlu1 %5054 }
 0xbe6   : > { %6311 = vmatpush3.bf16.msra.mxu1 %v5055_v45 }
 0xbe9   : > { %v3086_v5 = vpop.permute.xlu1 %3085 }
 0xbea   : > { %3109 = vst.msk [vmem:[#allocation2 + $0x8] sm:$0xff] %vm3107_vm3, %v3086_v5  ;;  %v9074_v5 = vpack.c.bf16 %v8589_v51, %v8585_v33 }
 0xbec   : > { %v6743_v22 = vpop.eup %6742 }
 0xbed   : > { %v4716_v28 = vmul.f32 %v6743_v22, %v8755_v15  ;;  %v4103_v14 = vpop.permute.xlu1 %4102 }
 0xbee   : > { %4126 = vst.msk [vmem:[#allocation2 + $0x8] sm:$0xff] %vm4124_vm4, %v4103_v14 }
 0xbef   : > { %v4724_v48 = vpack.c.bf16 %v4716_v28, %v4715_v57 }
 0xbf1   : > { %6313 = vmatmul.mubr.msk.bf16.vlgmr.msra.gmra.mrb[164].mxu1 %vm1522_vm2, %v4724_v48  ;;  %v3090_v31 = vpop.permute.xlu1 %3089 }
 0xbf2   : > { %3111 = vst.msk [vmem:[#allocation2 + $0x18] sm:$0xff] %vm3107_vm3, %v3090_v31 }
 0xbf5   : > { %v4107_v27 = vpop.permute.xlu1 %4106 }
 0xbf6   : > { %4128 = vst.msk [vmem:[#allocation2 + $0x18] sm:$0xff] %vm4124_vm4, %v4107_v27 }
 0xbf9   : > { %v3094_v59 = vpop.permute.xlu1 %3093 }
 0xbfa   : > { %3113 = vst.msk [vmem:[#allocation2 + $0x28] sm:$0xff] %vm3107_vm3, %v3094_v59 }
 0xc5b   : > { %v4765_v15 = vpop.f32.mrb[120].mxu0 }
 0xc5c   : > { %v6272_v35 = vpop.f32.mrb[121].mxu0 }
 0xc5d   : > { %v4768_v56 = vpop.f32.mrb[122].mxu0 }
 0xc5e   : > { %v5101_v55 = vpack.c.bf16 %v4768_v56, %v4765_v15  ;;  %v6273_v1 = vpop.f32.mrb[123].mxu0 }
 0xc60   : > { %5117 = vrot.lane.b32.xlu0 %v5101_v55, %s7039_s16 }
 0xc64   : > { %4108 = vrot.lane.b32.xlu0 %v4088_v17, %s7040_s10 }
 0xc75   : > { %v4812_v25 = vpop.f32.mrb[152].mxu1 }
 0xc76   : > { %v6278_v0 = vpop.f32.mrb[153].mxu1 }
 0xc77   : > { %v4815_v46 = vpop.f32.mrb[154].mxu1 }
 0xc78   : > { %v5102_v9 = vpack.c.bf16 %v4815_v46, %v4812_v25  ;;  %v6279_v13 = vpop.f32.mrb[155].mxu1  ;;  %v5626_v25 = vld [vmem:[%s9075_s6] ss:$0 sm:$0xff] }
 0xc7a   : > { %v4859_v16 = vpop.f32.mrb[124].mxu0  ;;  %5119 = vrot.lane.b32.xlu1 %v5102_v9, %s7039_s16 }
 0xc7b   : > { %v6284_v2 = vpop.f32.mrb[125].mxu0 }
 0xc7c   : > { %v4862_v30 = vpop.f32.mrb[126].mxu0 }
 0xc7d   : > { %v5103_v62 = vpack.c.bf16 %v4862_v30, %v4859_v16  ;;  %v6285_v17 = vpop.f32.mrb[127].mxu0 }
 0xc7e   : > { %v4906_v32 = vpop.f32.mrb[156].mxu1  ;;  %4110 = vrot.lane.b32.xlu1 %v4089_v58, %s7040_s10  ;;  %v9072_v58 = vld [vmem:[#allocation34_spill] sm:$0xff] }
 0xc7f   : > { %5121 = vrot.lane.b32.xlu0 %v5103_v62, %s7039_s16  ;;  %v6290_v3 = vpop.f32.mrb[157].mxu1  ;;  %v9073_v52 = vpack.c.bf16 %v9071_v8, %v9072_v58 }
 0xc80   : > { %v4909_v47 = vpop.f32.mrb[158].mxu1 }
 0xc81   : > { %v5104_v53 = vpack.c.bf16 %v4909_v47, %v4906_v32  ;;  %v6291_v44 = vpop.f32.mrb[159].mxu1 }
 0xc82   : > { %v4953_v10 = vpop.f32.mrb[128].mxu0 }
 0xc83   : > { %3095 = vrot.lane.b32.xlu0 %v9070_v21, %s7041_s12  ;;  %v6296_v19 = vpop.f32.mrb[129].mxu0  ;;  %5123 = vrot.lane.b32.xlu1 %v5104_v53, %s7039_s16 }
 0xc84   : > { %v4956_v18 = vpop.f32.mrb[130].mxu0 }
 0xc85   : > { %v5105_v60 = vpack.c.bf16 %v4956_v18, %v4953_v10  ;;  %v6297_v61 = vpop.f32.mrb[131].mxu0 }
 0xc86   : > { %v5000_v36 = vpop.f32.mrb[160].mxu1 }
 0xc87   : > { %5125 = vrot.lane.b32.xlu0 %v5105_v60, %s7039_s16  ;;  %3097 = vrot.lane.b32.xlu1 %v9073_v52, %s7041_s12  ;;  %v6302_v38 = vpop.f32.mrb[161].mxu1 }
 0xc88   : > { %v5003_v29 = vpop.f32.mrb[162].mxu1 }
 0xc89   : > { %v5106_v26 = vpack.c.bf16 %v5003_v29, %v5000_v36  ;;  %v6303_v42 = vpop.f32.mrb[163].mxu1 }
 0xc8a   : > { %v5047_v43 = vpop.f32.mrb[132].mxu0 }
 0xc8b   : > { %4112 = vrot.lane.b32.xlu0 %v4090_v40, %s7040_s10  ;;  %v6308_v24 = vpop.f32.mrb[133].mxu0  ;;  %5127 = vrot.lane.b32.xlu1 %v5106_v26, %s7039_s16 }
 0xc8c   : > { %v5050_v20 = vpop.f32.mrb[134].mxu0 }
 0xc8d   : > { %v5107_v41 = vpack.c.bf16 %v5050_v20, %v5047_v43  ;;  %v6309_v45 = vpop.f32.mrb[135].mxu0 }
 0xc8f   : > { %5129 = vrot.lane.b32.xlu0 %v5107_v41, %s7039_s16  ;;  %4114 = vrot.lane.b32.xlu1 %v9074_v5, %s7040_s10 }
 0xcc4   : > { %v5094_v11 = vpop.f32.mrb[164].mxu1 }
 0xcc5   : > { %v6314_v22 = vpop.f32.mrb[165].mxu1 }
 0xcc6   : > { %v5097_v57 = vpop.f32.mrb[166].mxu1 }
 0xcc7   : > { %v5108_v28 = vpack.c.bf16 %v5097_v57, %v5094_v11  ;;  %v6315_v14 = vpop.f32.mrb[167].mxu1 }
 0xcc9   : > { %5131 = vrot.lane.b32.xlu1 %v5108_v28, %s7039_s16 }
 0xcd2   : > { %v5118_v4 = vpop.permute.xlu0 %5117 }
 0xcd3   : > { %5142 = vst.msk [vmem:[#allocation2] sm:$0xff] %vm5141_vm5, %v5118_v4 }
 0xcd6   : > { %v4109_v34 = vpop.permute.xlu0 %4108 }
 0xcd7   : > { %4129 = vst.msk [vmem:[#allocation2 + $0x20] sm:$0xff] %vm4124_vm4, %v4109_v34 }
 0xcda   : > { %v5150_v40 = vld [vmem:[#allocation2] sm:$0xff] }
 0xcdb   : > { %6332 = vmatprep.mubr.bf16.mxu0 %v5150_v40 }
 0xcec   : > { %v5120_v48 = vpop.permute.xlu1 %5119 }
 0xced   : > { %5143 = vst.msk [vmem:[#allocation2 + $0x8] sm:$0xff] %vm5141_vm5, %v5120_v48 }
 0xcf0   : > { %v4111_v33 = vpop.permute.xlu1 %4110 }
 0xcf1   : > { %v5122_v51 = vpop.permute.xlu0 %5121  ;;  %4130 = vst.msk [vmem:[#allocation2 + $0x28] sm:$0xff] %vm4124_vm4, %v4111_v33 }
 0xcf2   : > { %5144 = vst.msk [vmem:[#allocation2 + $0x10] sm:$0xff] %vm5141_vm5, %v5122_v51 }
 0xcf4   : > { %v5151_v31 = vld [vmem:[#allocation2 + $0x8] sm:$0xff] }
 0xcf5   : > { %v3096_v27 = vpop.permute.xlu0 %3095  ;;  %v5124_v59 = vpop.permute.xlu1 %5123  ;;  %6333 = vmatmul.mubr.bf16.vlgmr.msra.gmra.mrb[136].mxu0 %v5151_v31 }
 0xcf6   : > { %3114 = vst.msk [vmem:[#allocation2 + $0x30] sm:$0xff] %vm3107_vm3, %v3096_v27 }
 0xcf7   : > { %5145 = vst.msk [vmem:[#allocation2 + $0x18] sm:$0xff] %vm5141_vm5, %v5124_v59 }
 0xcf9   : > { %v5126_v7 = vpop.permute.xlu0 %5125  ;;  %v3098_v23 = vpop.permute.xlu1 %3097  ;;  %v5152_v15 = vld [vmem:[#allocation2 + $0x10] sm:$0xff] }
 0xcfa   : > { %5146 = vst.msk [vmem:[#allocation2 + $0x20] sm:$0xff] %vm5141_vm5, %v5126_v7  ;;  %6336 = vmatprep.mubr.bf16.mxu0 %v5152_v15 }
 0xcfb   : > { %3115 = vst.msk [vmem:[#allocation2 + $0x38] sm:$0xff] %vm3107_vm3, %v3098_v23 }
 0xcfd   : > { %v4113_v12 = vpop.permute.xlu0 %4112  ;;  %v5128_v39 = vpop.permute.xlu1 %5127 }
 0xcfe   : > { %v5153_v35 = vld [vmem:[#allocation2 + $0x18] sm:$0xff]  ;;  %4131 = vst.msk [vmem:[#allocation2 + $0x30] sm:$0xff] %vm4124_vm4, %v4113_v12 }
 0xcff   : > { %5147 = vst.msk [vmem:[#allocation2 + $0x28] sm:$0xff] %vm5141_vm5, %v5128_v39  ;;  %6337 = vmatmul.mubr.bf16.gmra.mrb[140].mxu0 %v5153_v35 }
 0xd01   : > { %v5130_v56 = vpop.permute.xlu0 %5129  ;;  %v4115_v55 = vpop.permute.xlu1 %4114  ;;  %v5154_v1 = vld [vmem:[#allocation2 + $0x20] sm:$0xff] }
 0xd02   : > { %5148 = vst.msk [vmem:[#allocation2 + $0x30] sm:$0xff] %vm5141_vm5, %v5130_v56  ;;  %6340 = vmatprep.mubr.bf16.mxu0 %v5154_v1 }
 0xd03   : > { %4132 = vst.msk [vmem:[#allocation2 + $0x38] sm:$0xff] %vm4124_vm4, %v4115_v55 }
 0xd06   : > { %v5155_v50 = vld [vmem:[#allocation2 + $0x28] sm:$0xff] }
 0xd07   : > { %6341 = vmatmul.mubr.bf16.gmra.mrb[144].mxu0 %v5155_v50 }
 0xd09   : > { %v5156_v63 = vld [vmem:[#allocation2 + $0x30] sm:$0xff] }
 0xd0a   : > { %6344 = vmatprep.mubr.bf16.mxu0 %v5156_v63 }
 0xd3b   : > { %v5132_v6 = vpop.permute.xlu1 %5131 }
 0xd3c   : > { %5149 = vst.msk [vmem:[#allocation2 + $0x38] sm:$0xff] %vm5141_vm5, %v5132_v6 }
 0xd43   : > { %v5157_v49 = vld [vmem:[#allocation2 + $0x38] sm:$0xff] }
 0xd44   : > { %6345 = vmatmul.mubr.bf16.gmra.mrb[148].mxu0 %v5157_v49 }
 0xdc8   : > { %v6334_v0 = vpop.f32.mrb[136].mxu0 }
 0xdc9   : > { %v5272_v46 = vadd.f32 %v6334_v0, %v5626_v25  ;;  %v5263_v9 = vpop.f32.mrb[137].mxu0 }
 0xdca   : > { %v5264_v13 = vadd.f32 %v5626_v25, %v5263_v9  ;;  %v6335_v16 = vpop.f32.mrb[138].mxu0 }
 0xdcb   : > { %5328 = vst [vmem:[%s8884_s17 + $0x10] sm:$0xff] %v5272_v46  ;;  %v5275_v2 = vadd.f32 %v6335_v16, %v5626_v25  ;;  %v5266_v30 = vpop.f32.mrb[139].mxu0 }
 0xdcc   : > { %5326 = vst [vmem:[%s8884_s17] sm:$0xff] %v5264_v13  ;;  %v5267_v62 = vadd.f32 %v5626_v25, %v5266_v30 }
 0xdcd   : > { %5329 = vst [vmem:[%s8884_s17 + $0x18] sm:$0xff] %v5275_v2 }
 0xdce   : > { %5327 = vst [vmem:[%s8884_s17 + $0x8] sm:$0xff] %v5267_v62 }
 0xdd2   : > { %v6338_v17 = vpop.f32.mrb[140].mxu0 }
 0xdd3   : > { %v5288_v32 = vadd.f32 %v6338_v17, %v5626_v25  ;;  %v5279_v3 = vpop.f32.mrb[141].mxu0 }
 0xdd4   : > { %v5280_v47 = vadd.f32 %v5626_v25, %v5279_v3  ;;  %v6339_v53 = vpop.f32.mrb[142].mxu0 }
 0xdd5   : > { %5332 = vst [vmem:[%s8884_s17 + $0x30] sm:$0xff] %v5288_v32  ;;  %v5291_v44 = vadd.f32 %v6339_v53, %v5626_v25  ;;  %v5282_v10 = vpop.f32.mrb[143].mxu0 }
 0xdd6   : > { %5330 = vst [vmem:[%s8884_s17 + $0x20] sm:$0xff] %v5280_v47  ;;  %v5283_v54 = vadd.f32 %v5626_v25, %v5282_v10 }
 0xdd7   : > { %5333 = vst [vmem:[%s8884_s17 + $0x38] sm:$0xff] %v5291_v44 }
 0xdd8   : > { %5331 = vst [vmem:[%s8884_s17 + $0x28] sm:$0xff] %v5283_v54 }
 0xdda   : > { %v6342_v37 = vpop.f32.mrb[144].mxu0 }
 0xddb   : > { %v5304_v21 = vadd.f32 %v6342_v37, %v5626_v25  ;;  %v5295_v19 = vpop.f32.mrb[145].mxu0 }
 0xddc   : > { %v5296_v18 = vadd.f32 %v5626_v25, %v5295_v19  ;;  %v6343_v60 = vpop.f32.mrb[146].mxu0 }
 0xddd   : > { %5336 = vst [vmem:[%s8884_s17 + $0x50] sm:$0xff] %v5304_v21  ;;  %v5307_v61 = vadd.f32 %v6343_v60, %v5626_v25  ;;  %v5298_v36 = vpop.f32.mrb[147].mxu0 }
 0xdde   : > { %5334 = vst [vmem:[%s8884_s17 + $0x40] sm:$0xff] %v5296_v18  ;;  %v5299_v8 = vadd.f32 %v5626_v25, %v5298_v36 }
 0xddf   : > { %5337 = vst [vmem:[%s8884_s17 + $0x58] sm:$0xff] %v5307_v61 }
 0xde0   : > { %5335 = vst [vmem:[%s8884_s17 + $0x48] sm:$0xff] %v5299_v8 }
 0xe17   : > { %v6346_v58 = vpop.f32.mrb[148].mxu0 }
 0xe18   : > { %v5320_v52 = vadd.f32 %v6346_v58, %v5626_v25  ;;  %v5311_v38 = vpop.f32.mrb[149].mxu0 }
 0xe19   : > { %v5312_v29 = vadd.f32 %v5626_v25, %v5311_v38  ;;  %v6347_v26 = vpop.f32.mrb[150].mxu0 }
 0xe1a   : > { %5340 = vst [vmem:[%s8884_s17 + $0x70] sm:$0xff] %v5320_v52  ;;  %v5323_v42 = vadd.f32 %v6347_v26, %v5626_v25  ;;  %v5314_v43 = vpop.f32.mrb[151].mxu0 }
 0xe1b   : > { %5338 = vst [vmem:[%s8884_s17 + $0x60] sm:$0xff] %v5312_v29  ;;  %v5315_v24 = vadd.f32 %v5626_v25, %v5314_v43 }
 0xe1c   : > { %5341 = vst [vmem:[%s8884_s17 + $0x78] sm:$0xff] %v5323_v42 }
 0xe1d   : > { %5339 = vst [vmem:[%s8884_s17 + $0x68] sm:$0xff] %v5315_v24 }
 0xe1e   : > { %6959 = shalt.err (!%p6956_p12)
}
 0xe1f   : > { %s6960_s15 = scalar_lea.hbm %s8904_s28, 2048  ;;  %s6964_s1 = scalar_lea.hbm %s9077_s26, 4096 }
 0xe20   : > { %p6961_p8 = scmp.ne.s32.totalorder %s8904_s28, %s6960_s15  ;;  %p6965_p1 = scmp.lt.u32.totalorder %s8904_s28, %s9077_s26 }
 0xe21   : > { %p6966_p6 = scmp.lt.u32.totalorder %s6964_s1, %s6960_s15  ;;  %p6968_p5 = scmp.lt.u32.totalorder %s6960_s15, %s8904_s28 }
 0xe22   : > { %p6962_p10 = pnand %p6961_p8, %p9078_p2 }
 0xe23   : > { %p6967_p3 = por %p6966_p6, %p6965_p1 }
 0xe24   : > { %p6963_p0 = pneg %p6962_p10 }
 0xe25   : > { %p6969_p4 = por %p6968_p5, %p6967_p3 }
 0xe27   : > { %p6970_p11 = pnand %p6969_p4, %p6963_p0 }
 0xe29   : > { %6973 = shalt.err (!%p6970_p11)
}
 0xe2a   : > { %s7043_s12 = smov 128   ;;  %s7044_s30 = smov 8  }
 0xe2b   : > { %6370 = dma.vmem_to_hbm [thread:$0]  (%p9078_p2), %s8906_s27, 2048, %s8904_s28, %s5343_s21, %s7043_s12, %s7043_s12, %s7044_s30  }
 0xe2c PF: > { %s9079_s3 = sld [smem:[#allocation21_spill]]  ;;  %s9080_s6 = sld [smem:[#allocation23_spill]] }
 0xe2d   : > { %s9081_s17 = sld [smem:[#allocation22_spill]] }
 0xe32   : > { %s5371_s22 = sand.u32 1, %s9079_s3   ;;  %p9082_p13 = scmp.ne.s32.totalorder %s9080_s6, 0 }
 0xe33   : > { %p9083_p7 = scmp.ge.s32.totalorder %s9081_s17, 2  ;;  %s5372_s7 = scalar_lea.sflag [#allocation5], %s5371_s22 }
 0xe35   : > { %p6396_p9 = pnand %p9083_p7, %p9082_p13 }
 0xe37   : > { %7007 = dma.done.wait (!%p6396_p9), %s5372_s7, 2048  }
 0xe38   : > { %7009 = vsyncadd (!%p6396_p9), %s5372_s7, 4294965248  ;;  %s9084_s20 = sld [smem:[#allocation24_spill]]  ;;  %s9085_s25 = sld [smem:[#allocation26_spill]] }
 0xe39   : > { %s9086_s17 = smov %s7016_s18  ;;  %s9087_s18 = smov %s7020_s19 }
 0xe3e   : > { %p29_p12 = scmp.ge.s32.totalorder %s9084_s20, 4   ;;  %s9088_s19 = smov %s9085_s25 }
 0xe40   :  { %31 = sbr.rel (!%p29_p12) target bundleno = 17 (0x11), region = 149 }
 0xe47   :  { %5377 = vsyncpa [#allocation4], 1 }
 0xe48   :  { %5379 = vsyncpa [#allocation4 + $0x1], 1 }
 0xe49   :  { %5380 = vsyncpa [#allocation7], 1 }
 0xe4a   :  { %5382 = vsyncpa [#allocation7 + $0x1], 1 }
 0xe4b   :  { %5383 = vsyncpa [#allocation10], 1 }
 0xe4c   :  { %5384 = vsyncpa [#allocation13], 1 }
 0xe4d   :  { %5385 = vsyncpa [#allocation5], 1 }
 0xe4e   :  { %5387 = vsyncpa [#allocation5 + $0x1], 1 }

</bundles_post_ra>
